<compile_context>
chip_gen: v7x
topology: tpu7x:2x2x1
jax: 0.10.0
libtpu: 0.0.40
codegen_flags: <defaults>
</compile_context>

<pallas_src>
import functools
import math

import jax
import jax.numpy as jnp
from jax import lax
from jax.experimental import pallas as pl
from jax.experimental.pallas import tpu as pltpu


# --------------------------------------------------------------------------
# config (small synthetic shapes, lane-dense feature dims)
# --------------------------------------------------------------------------
CFG = dict(
    # vision (SigLIP)
    image_size=16,
    patch_size=8,
    num_channels=3,
    vision_hidden=128,
    vision_heads=4,
    vision_head_dim=32,
    vision_intermediate=256,
    vision_layers=2,
    ln_eps=1e-6,
    # projector
    projection_dim=128,
    # text (Gemma, GQA)
    vocab_size=256,
    text_hidden=128,
    text_heads=4,
    text_kv_heads=2,
    text_head_dim=32,
    text_intermediate=256,
    text_layers=2,
    rms_eps=1e-6,
    rope_theta=10000.0,
    image_token_index=99,
    bos_token_id=2,
    newline_token_id=108,
)


# --------------------------------------------------------------------------
# in-kernel helpers (operate on values, not refs)
# --------------------------------------------------------------------------
def _bf16_dot(a, b):
    # MXU matmul: bf16 operands, f32 accumulation.
    return jnp.dot(a.astype(jnp.bfloat16), b.astype(jnp.bfloat16),
                   preferred_element_type=jnp.float32)


def _gelu_tanh(x):
    c = math.sqrt(2.0 / math.pi)
    return 0.5 * x * (1.0 + jnp.tanh(c * (x + 0.044715 * x * x * x)))


def _layernorm(x, g, b, eps):
    mu = jnp.mean(x, axis=-1, keepdims=True)
    var = jnp.mean((x - mu) * (x - mu), axis=-1, keepdims=True)
    return (x - mu) * lax.rsqrt(var + eps) * g + b


def _rmsnorm(x, w, eps):
    # Gemma RMSNorm: x * rsqrt(mean(x^2)+eps) * (1 + w)
    var = jnp.mean(x * x, axis=-1, keepdims=True)
    return x * lax.rsqrt(var + eps) * (1.0 + w)


def _rope_rotate(x, cos, sin, half):
    # NeoX RoPE in f32: x*cos + rotate_half(x)*sin, rotate_half via lane concat
    # (no D x D matmul, no bf16 rounding before the rotation).
    rot = jnp.concatenate([-x[:, half:], x[:, :half]], axis=-1)
    return x * cos + rot * sin


def _mha(q, k, v, *, n_heads, n_kv_heads, head_dim, scale, causal,
         cos=None, sin=None):
    # q: (S, H*Dh), k/v: (S, Hkv*Dh) f32.  Returns lane-contiguous (S, H*Dh).
    S = q.shape[0]
    half = head_dim // 2

    mask = None
    if causal:  # build the (S, S) additive mask ONCE (not per head)
        qi = lax.broadcasted_iota(jnp.int32, (S, S), 0)
        ki = lax.broadcasted_iota(jnp.int32, (S, S), 1)
        mask = jnp.where(ki <= qi, 0.0, -1e30).astype(jnp.float32)

    # pre-rotate / pre-cast K,V once per KV head (GQA shares them across Q heads)
    k_heads, v_heads = [], []
    for g in range(n_kv_heads):
        kg = k[:, g * head_dim:(g + 1) * head_dim]
        vg = v[:, g * head_dim:(g + 1) * head_dim]
        if cos is not None:
            kg = _rope_rotate(kg, cos, sin, half)
        k_heads.append(kg.astype(jnp.bfloat16))
        v_heads.append(vg.astype(jnp.bfloat16))

    outs = []
    for h in range(n_heads):
        g = (h * n_kv_heads) // n_heads
        qh = q[:, h * head_dim:(h + 1) * head_dim]
        if cos is not None:
            qh = _rope_rotate(qh, cos, sin, half)
        s = lax.dot_general(qh.astype(jnp.bfloat16), k_heads[g],
                            (((1,), (1,)), ((), ())),
                            preferred_element_type=jnp.float32) * scale
        if mask is not None:
            s = s + mask
        m = jnp.max(s, axis=-1, keepdims=True)
        p = jnp.exp(s - m)
        p = p / jnp.sum(p, axis=-1, keepdims=True)       # exact divide
        outs.append(jnp.dot(p.astype(jnp.bfloat16), v_heads[g],
                            preferred_element_type=jnp.float32))
    # heads occupy contiguous lane ranges -> single full-K out-proj by caller
    return jnp.concatenate(outs, axis=-1)


# --------------------------------------------------------------------------
# fused Pallas kernels (one per stack)
# --------------------------------------------------------------------------
def _siglip_tower_kernel(
        patches_ref, pw_ref, pb_ref, pos_ref,                    # patch embed
        ln1g_ref, ln1b_ref, qkvw_ref, qkvb_ref, ow_ref, ob_ref,   # layer l
        ln2g_ref, ln2b_ref, fc1w_ref, fc1b_ref, fc2w_ref, fc2b_ref,
        postg_ref, postb_ref, projw_ref, projb_ref,               # fused head
        o_ref, x_scr,
        *, n_heads, head_dim, eps, out_scale):
    l = pl.program_id(1)
    D = n_heads * head_dim

    @pl.when(l == 0)
    def _():  # conv-as-matmul patch embedding + positional embedding
        x_scr[...] = (_bf16_dot(patches_ref[...], pw_ref[...])
                      + pb_ref[...] + pos_ref[...])

    x = x_scr[...]
    # attention block
    h = _layernorm(x, ln1g_ref[...], ln1b_ref[...], eps)
    qkv = _bf16_dot(h, qkvw_ref[...]) + qkvb_ref[...]
    attn = _mha(qkv[:, :D], qkv[:, D:2 * D], qkv[:, 2 * D:],
                n_heads=n_heads, n_kv_heads=n_heads, head_dim=head_dim,
                scale=head_dim ** -0.5, causal=False)
    x = x + _bf16_dot(attn, ow_ref[...]) + ob_ref[...]
    # MLP block
    h = _layernorm(x, ln2g_ref[...], ln2b_ref[...], eps)
    h = _gelu_tanh(_bf16_dot(h, fc1w_ref[...]) + fc1b_ref[...])
    x = x + _bf16_dot(h, fc2w_ref[...]) + fc2b_ref[...]
    x_scr[...] = x

    @pl.when(l == pl.num_programs(1) - 1)
    def _():  # SigLIP post-LN + multimodal projector + hidden**-0.5 scaling
        hh = _layernorm(x, postg_ref[...], postb_ref[...], eps)
        y = _bf16_dot(hh, projw_ref[...]) + projb_ref[...]
        o_ref[...] = (y * out_scale).astype(o_ref.dtype)


def _gemma_stack_kernel(
        emb_ref, cos_ref, sin_ref,
        ln1_ref, qkvw_ref, ow_ref, ln2_ref, guw_ref, dw_ref,      # layer l
        fln_ref,                                                   # final norm
        o_ref, x_scr,
        *, n_heads, n_kv_heads, head_dim, eps, emb_scale):
    l = pl.program_id(0)
    D = n_heads * head_dim
    Dkv = n_kv_heads * head_dim

    @pl.when(l == 0)
    def _():  # Gemma embedding normalizer
        x_scr[...] = emb_ref[...].astype(jnp.float32) * emb_scale

    x = x_scr[...]
    # attention block (RoPE applied per head in f32 inside _mha)
    nx = _rmsnorm(x, ln1_ref[...], eps)
    qkv = _bf16_dot(nx, qkvw_ref[...])
    attn = _mha(qkv[:, :D], qkv[:, D:D + Dkv], qkv[:, D + Dkv:],
                n_heads=n_heads, n_kv_heads=n_kv_heads, head_dim=head_dim,
                scale=head_dim ** -0.5, causal=True,
                cos=cos_ref[...], sin=sin_ref[...])
    x = x + _bf16_dot(attn, ow_ref[...])
    # GeGLU MLP block
    nx = _rmsnorm(x, ln2_ref[...], eps)
    gu = _bf16_dot(nx, guw_ref[...])
    F = gu.shape[-1] // 2
    x = x + _bf16_dot(_gelu_tanh(gu[:, :F]) * gu[:, F:], dw_ref[...])
    x_scr[...] = x

    @pl.when(l == pl.num_programs(0) - 1)
    def _():  # final RMSNorm fused into the last layer step
        o_ref[...] = _rmsnorm(x, fln_ref[...], eps).astype(o_ref.dtype)


# --------------------------------------------------------------------------
# pallas_call wrappers
# --------------------------------------------------------------------------
def _cparams(sem):
    # >32 MiB (per review) but still <= v7x's 64 MiB physical VMEM.
    return pltpu.CompilerParams(dimension_semantics=sem,
                                vmem_limit_bytes=64 * 1024 * 1024)


def siglip_tower_and_projector(pixel_values, vp, proj_w, proj_b, cfg):
    patch = cfg["patch_size"]
    patches = jax.vmap(lambda im: _patchify(im, patch))(pixel_values)  # (B,P,K)
    B, P, K = patches.shape
    Dv = cfg["vision_hidden"]
    Dp = cfg["projection_dim"]
    L = cfg["vision_layers"]
    out_scale = float(cfg["text_hidden"]) ** -0.5

    def res2(shape):   # resident 2-D param (same block for every grid step)
        return pl.BlockSpec(shape, lambda b, l: (0, 0))

    def res3(shape):   # per-image resident 3-D input (batch-indexed)
        return pl.BlockSpec((None,) + tuple(shape[1:]), lambda b, l: (b, 0, 0))

    def lyr(shape):    # layer-stacked weight (layer-indexed, double-buffered)
        return pl.BlockSpec((None,) + tuple(shape[1:]), lambda b, l: (l, 0, 0))

    kernel = functools.partial(
        _siglip_tower_kernel, n_heads=cfg["vision_heads"],
        head_dim=cfg["vision_head_dim"], eps=cfg["ln_eps"], out_scale=out_scale)

    args = (patches, vp["patch_w"], vp["patch_b"], vp["pos_embed"],
            vp["ln1_g"], vp["ln1_b"], vp["qkv_w"], vp["qkv_b"],
            vp["o_w"], vp["o_b"], vp["ln2_g"], vp["ln2_b"],
            vp["fc1_w"], vp["fc1_b"], vp["fc2_w"], vp["fc2_b"],
            vp["post_ln_g"], vp["post_ln_b"], proj_w, proj_b)

    in_specs = [res3(patches.shape), res2(vp["patch_w"].shape),
                res2(vp["patch_b"].shape), res2(vp["pos_embed"].shape)]
    in_specs += [lyr(vp[n].shape) for n in
                 ("ln1_g", "ln1_b", "qkv_w", "qkv_b", "o_w", "o_b",
                  "ln2_g", "ln2_b", "fc1_w", "fc1_b", "fc2_w", "fc2_b")]
    in_specs += [res2(vp["post_ln_g"].shape), res2(vp["post_ln_b"].shape),
                 res2(proj_w.shape), res2(proj_b.shape)]

    out = pl.pallas_call(
        kernel,
        grid=(B, L),
        in_specs=in_specs,
        out_specs=pl.BlockSpec((None, P, Dp), lambda b, l: (b, 0, 0)),
        out_shape=jax.ShapeDtypeStruct((B, P, Dp), jnp.bfloat16),
        scratch_shapes=[pltpu.VMEM((P, Dv), jnp.float32)],
        compiler_params=_cparams(("parallel", "arbitrary")),
    )(*args)
    return out.reshape(B * P, Dp)


def gemma_decoder(inputs_embeds, tp, positions, cfg):
    S, D = inputs_embeds.shape
    Dh = cfg["text_head_dim"]
    L = cfg["text_layers"]
    cos, sin = _rope_cos_sin(positions, Dh, cfg["rope_theta"])

    def res(shape):
        nd = len(shape)
        return pl.BlockSpec(tuple(shape), lambda l, _n=nd: (0,) * _n)

    def lyr(shape):
        nd = len(shape)
        return pl.BlockSpec((None,) + tuple(shape[1:]),
                            lambda l, _n=nd: (l,) + (0,) * (_n - 1))

    kernel = functools.partial(
        _gemma_stack_kernel, n_heads=cfg["text_heads"],
        n_kv_heads=cfg["text_kv_heads"], head_dim=Dh, eps=cfg["rms_eps"],
        emb_scale=float(D) ** 0.5)

    args = (inputs_embeds, cos, sin,
            tp["input_ln"], tp["qkv_w"], tp["o_w"],
            tp["post_ln"], tp["gate_up_w"], tp["down_w"], tp["final_ln"])

    in_specs = [res(inputs_embeds.shape), res(cos.shape), res(sin.shape)]
    in_specs += [lyr(tp[n].shape) for n in
                 ("input_ln", "qkv_w", "o_w", "post_ln", "gate_up_w", "down_w")]
    in_specs += [res(tp["final_ln"].shape)]

    return pl.pallas_call(
        kernel,
        grid=(L,),
        in_specs=in_specs,
        out_specs=pl.BlockSpec((S, D), lambda l: (0, 0)),
        out_shape=jax.ShapeDtypeStruct((S, D), jnp.float32),
        scratch_shapes=[pltpu.VMEM((S, D), jnp.float32)],
        compiler_params=_cparams(("arbitrary",)),
    )(*args)


# --------------------------------------------------------------------------
# model glue (plain JAX): patchify, RoPE tables, embedding merge
# --------------------------------------------------------------------------
def _patchify(img, patch):
    # img: (C, H, W) -> (num_patches, C*patch*patch), matching torch Conv2d
    # weight flattening order (C, kh, kw).
    C, H, W = img.shape
    x = img.reshape(C, H // patch, patch, W // patch, patch)
    x = x.transpose(1, 3, 0, 2, 4)
    return x.reshape((H // patch) * (W // patch), C * patch * patch)


def _rope_cos_sin(positions, dim, theta):
    inv_freq = 1.0 / (theta ** (jnp.arange(0, dim, 2, dtype=jnp.float32) / dim))
    freqs = positions.astype(jnp.float32)[:, None] * inv_freq[None, :]
    emb = jnp.concatenate([freqs, freqs], axis=-1)          # (S, dim), NeoX
    return jnp.cos(emb), jnp.sin(emb)


def paligemma_forward(params, input_ids, positions, pixel_values, cfg=CFG):
    # vision tower + post-LN + projector + hidden**-0.5 (one fused pallas_call)
    vision_embeds = siglip_tower_and_projector(
        pixel_values, params["vision"], params["proj_w"], params["proj_b"], cfg)

    # text embeddings + merge_multimodal_embeddings
    text_embeds = params["text"]["embed"][input_ids]
    mask = input_ids == cfg["image_token_index"]
    # TODO(synk): clip silently reuses the last vision embedding when the
    # prompt contains more image tokens than produced embeddings (vLLM raises).
    idx = jnp.clip(jnp.cumsum(mask.astype(jnp.int32)) - 1, 0,
                   vision_embeds.shape[0] - 1)
    inputs_embeds = jnp.where(mask[:, None], vision_embeds[idx],
                              text_embeds).astype(jnp.bfloat16)

    # Gemma decoder stack (one fused pallas_call) -> final hidden states
    return gemma_decoder(inputs_embeds, params["text"], positions, cfg)


# --------------------------------------------------------------------------
# deterministic parameter init (matmul weights bf16, norms/biases f32,
# per-layer tensors stacked along a leading L axis for the layer grid)
# --------------------------------------------------------------------------
def init_params(key, cfg=CFG):
    def nrm(k, shape, scale=0.02, dtype=jnp.bfloat16):
        return (scale * jax.random.normal(k, shape, dtype=jnp.float32)).astype(dtype)

    keys = iter(jax.random.split(key, 32))
    Dv, Fv, Lv = cfg["vision_hidden"], cfg["vision_intermediate"], cfg["vision_layers"]
    Dt, Ft, Lt = cfg["text_hidden"], cfg["text_intermediate"], cfg["text_layers"]
    H, Hkv, Dh = cfg["text_heads"], cfg["text_kv_heads"], cfg["text_head_dim"]
    C, p = cfg["num_channels"], cfg["patch_size"]
    P = (cfg["image_size"] // p) ** 2

    vision = dict(
        patch_w=nrm(next(keys), (C * p * p, Dv)),
        patch_b=jnp.zeros((1, Dv), jnp.float32),
        pos_embed=nrm(next(keys), (P, Dv), dtype=jnp.float32),
        ln1_g=jnp.ones((Lv, 1, Dv), jnp.float32),
        ln1_b=jnp.zeros((Lv, 1, Dv), jnp.float32),
        qkv_w=nrm(next(keys), (Lv, Dv, 3 * Dv)),
        qkv_b=jnp.zeros((Lv, 1, 3 * Dv), jnp.float32),
        o_w=nrm(next(keys), (Lv, Dv, Dv)),
        o_b=jnp.zeros((Lv, 1, Dv), jnp.float32),
        ln2_g=jnp.ones((Lv, 1, Dv), jnp.float32),
        ln2_b=jnp.zeros((Lv, 1, Dv), jnp.float32),
        fc1_w=nrm(next(keys), (Lv, Dv, Fv)),
        fc1_b=jnp.zeros((Lv, 1, Fv), jnp.float32),
        fc2_w=nrm(next(keys), (Lv, Fv, Dv)),
        fc2_b=jnp.zeros((Lv, 1, Dv), jnp.float32),
        post_ln_g=jnp.ones((1, Dv), jnp.float32),
        post_ln_b=jnp.zeros((1, Dv), jnp.float32),
    )

    qkv_width = (H + 2 * Hkv) * Dh       # fused QKV with GQA-sized K/V
    text = dict(
        embed=nrm(next(keys), (cfg["vocab_size"], Dt), scale=1.0,
                  dtype=jnp.bfloat16),
        input_ln=jnp.zeros((Lt, 1, Dt), jnp.float32),  # Gemma RMSNorm (1 + w)
        qkv_w=nrm(next(keys), (Lt, Dt, qkv_width)),
        o_w=nrm(next(keys), (Lt, H * Dh, Dt)),
        post_ln=jnp.zeros((Lt, 1, Dt), jnp.float32),
        gate_up_w=nrm(next(keys), (Lt, Dt, 2 * Ft)),
        down_w=nrm(next(keys), (Lt, Ft, Dt)),
        final_ln=jnp.zeros((1, Dt), jnp.float32),
    )

    proj_w = nrm(next(keys), (Dv, cfg["projection_dim"]))
    proj_b = jnp.zeros((1, cfg["projection_dim"]), jnp.float32)
    return dict(vision=vision, text=text, proj_w=proj_w, proj_b=proj_b)


# TODO(synk): vLLM runtime pieces (tokenizer/HF processor, paged KV cache,
# logits processor / sampling, weight loading) have no Pallas equivalent and
# are out of scope for this forward-pass kernel.

if __name__ == "__main__":
    key = jax.random.PRNGKey(0)
    pkey, xkey = jax.random.split(key)
    params = init_params(pkey)

    # one image, NCHW like PyTorch
    pixel_values = jax.random.uniform(
        xkey, (1, CFG["num_channels"], CFG["image_size"], CFG["image_size"]),
        dtype=jnp.float32, minval=-1.0, maxval=1.0)

    num_image_tokens = (CFG["image_size"] // CFG["patch_size"]) ** 2  # = 4
    input_ids = jnp.array(
        [CFG["image_token_index"]] * num_image_tokens
        + [CFG["bos_token_id"], 10, 11, CFG["newline_token_id"]],
        dtype=jnp.int32)
    positions = jnp.arange(input_ids.shape[0], dtype=jnp.int32)

    fwd = jax.jit(paligemma_forward)
    hidden_states = fwd(params, input_ids, positions, pixel_values)
    hidden_states = jax.block_until_ready(hidden_states)
    assert hidden_states.shape == (input_ids.shape[0], CFG["text_hidden"])
    assert bool(jnp.all(jnp.isfinite(hidden_states)))
    print("KERNEL_OK")
</pallas_src>

<mosaic_0001>
module attributes {stable_mosaic.version = 11 : i64} {
  func.func @_siglip_tower_kernel(%arg0: i32, %arg1: i32, %arg2: memref<1x4x192xf32, #tpu.memory_space<vmem>>, %arg3: memref<192x128xbf16, #tpu.memory_space<vmem>>, %arg4: memref<1x128xf32, #tpu.memory_space<vmem>>, %arg5: memref<4x128xf32, #tpu.memory_space<vmem>>, %arg6: memref<1x1x128xf32, #tpu.memory_space<vmem>>, %arg7: memref<1x1x128xf32, #tpu.memory_space<vmem>>, %arg8: memref<1x128x384xbf16, #tpu.memory_space<vmem>>, %arg9: memref<1x1x384xf32, #tpu.memory_space<vmem>>, %arg10: memref<1x128x128xbf16, #tpu.memory_space<vmem>>, %arg11: memref<1x1x128xf32, #tpu.memory_space<vmem>>, %arg12: memref<1x1x128xf32, #tpu.memory_space<vmem>>, %arg13: memref<1x1x128xf32, #tpu.memory_space<vmem>>, %arg14: memref<1x128x256xbf16, #tpu.memory_space<vmem>>, %arg15: memref<1x1x256xf32, #tpu.memory_space<vmem>>, %arg16: memref<1x256x128xbf16, #tpu.memory_space<vmem>>, %arg17: memref<1x1x128xf32, #tpu.memory_space<vmem>>, %arg18: memref<1x128xf32, #tpu.memory_space<vmem>>, %arg19: memref<1x128xf32, #tpu.memory_space<vmem>>, %arg20: memref<128x128xbf16, #tpu.memory_space<vmem>>, %arg21: memref<1x128xf32, #tpu.memory_space<vmem>>, %arg22: memref<1x4x128xbf16, #tpu.memory_space<vmem>>, %arg23: memref<4x128xf32, #tpu.memory_space<vmem>>) attributes {dimension_semantics = [#tpu.dimension_semantics<parallel>, #tpu.dimension_semantics<arbitrary>], iteration_bounds = array<i64: 1, 2>, scalar_prefetch = 0 : i64, scratch_operands = 1 : i64, tpu.core_type = #tpu.core_type<tc>, window_params = [{transform_indices = @transform_0, window_bounds = array<i64: 1, 4, 192>}, {pipeline_mode = #tpu.pipeline_mode<synchronous>, transform_indices = @transform_1, window_bounds = array<i64: 192, 128>}, {pipeline_mode = #tpu.pipeline_mode<synchronous>, transform_indices = @transform_2, window_bounds = array<i64: 1, 128>}, {pipeline_mode = #tpu.pipeline_mode<synchronous>, transform_indices = @transform_3, window_bounds = array<i64: 4, 128>}, {transform_indices = @transform_4, window_bounds = array<i64: 1, 1, 128>}, {transform_indices = @transform_5, window_bounds = array<i64: 1, 1, 128>}, {transform_indices = @transform_6, window_bounds = array<i64: 1, 128, 384>}, {transform_indices = @transform_7, window_bounds = array<i64: 1, 1, 384>}, {transform_indices = @transform_8, window_bounds = array<i64: 1, 128, 128>}, {transform_indices = @transform_9, window_bounds = array<i64: 1, 1, 128>}, {transform_indices = @transform_10, window_bounds = array<i64: 1, 1, 128>}, {transform_indices = @transform_11, window_bounds = array<i64: 1, 1, 128>}, {transform_indices = @transform_12, window_bounds = array<i64: 1, 128, 256>}, {transform_indices = @transform_13, window_bounds = array<i64: 1, 1, 256>}, {transform_indices = @transform_14, window_bounds = array<i64: 1, 256, 128>}, {transform_indices = @transform_15, window_bounds = array<i64: 1, 1, 128>}, {pipeline_mode = #tpu.pipeline_mode<synchronous>, transform_indices = @transform_16, window_bounds = array<i64: 1, 128>}, {pipeline_mode = #tpu.pipeline_mode<synchronous>, transform_indices = @transform_17, window_bounds = array<i64: 1, 128>}, {pipeline_mode = #tpu.pipeline_mode<synchronous>, transform_indices = @transform_18, window_bounds = array<i64: 128, 128>}, {pipeline_mode = #tpu.pipeline_mode<synchronous>, transform_indices = @transform_19, window_bounds = array<i64: 1, 128>}, {transform_indices = @transform_20, window_bounds = array<i64: 1, 4, 128>}]} {
    %c0_i32 = arith.constant 0 : i32
    %0 = arith.cmpi eq, %arg1, %c0_i32 : i32
    %1 = arith.extui %0 : i1 to i32
    %c0_i32_0 = arith.constant 0 : i32
    %2 = arith.cmpi ne, %1, %c0_i32_0 : i32
    scf.if %2 {
      %c0_78 = arith.constant 0 : index
      %c0_79 = arith.constant 0 : index
      %c0_80 = arith.constant 0 : index
      %195 = vector.load %arg2[%c0_78, %c0_79, %c0_80] : memref<1x4x192xf32, #tpu.memory_space<vmem>>, vector<1x4x192xf32>
      %196 = vector.shape_cast %195 : vector<1x4x192xf32> to vector<4x192xf32>
      %c0_81 = arith.constant 0 : index
      %c0_82 = arith.constant 0 : index
      %197 = vector.load %arg3[%c0_81, %c0_82] : memref<192x128xbf16, #tpu.memory_space<vmem>>, vector<192x128xbf16>
      %198 = arith.truncf %196 : vector<4x192xf32> to vector<4x192xbf16>
      %cst_83 = arith.constant dense<0.000000e+00> : vector<4x128xf32>
      %199 = tpu.matmul %198, %197, %cst_83 {dimension_numbers = #tpu.dot_dimension_numbers<[1], [0], [0], [1], [0, 0, 1, 1], [], []>} : vector<4x192xbf16>, vector<192x128xbf16>, vector<4x128xf32> -> vector<4x128xf32>
      %c0_84 = arith.constant 0 : index
      %c0_85 = arith.constant 0 : index
      %200 = vector.load %arg4[%c0_84, %c0_85] : memref<1x128xf32, #tpu.memory_space<vmem>>, vector<1x128xf32>
      %201 = vector.broadcast %200 : vector<1x128xf32> to vector<4x128xf32>
      %202 = arith.addf %199, %201 : vector<4x128xf32>
      %c0_86 = arith.constant 0 : index
      %c0_87 = arith.constant 0 : index
      %203 = vector.load %arg5[%c0_86, %c0_87] : memref<4x128xf32, #tpu.memory_space<vmem>>, vector<4x128xf32>
      %204 = arith.addf %202, %203 : vector<4x128xf32>
      %c0_88 = arith.constant 0 : index
      %c0_89 = arith.constant 0 : index
      %205 = vector.load %arg23[%c0_88, %c0_89] : memref<4x128xf32, #tpu.memory_space<vmem>>, vector<4x128xf32>
      tpu.vector_store %arg23[%c0_88, %c0_89], %204 {strides = array<i32>} : memref<4x128xf32, #tpu.memory_space<vmem>>, vector<4x128xf32>,
    } else {
    }
    %c0 = arith.constant 0 : index
    %c0_1 = arith.constant 0 : index
    %3 = vector.load %arg23[%c0, %c0_1] : memref<4x128xf32, #tpu.memory_space<vmem>>, vector<4x128xf32>
    %c0_2 = arith.constant 0 : index
    %c0_3 = arith.constant 0 : index
    %c0_4 = arith.constant 0 : index
    %4 = vector.load %arg6[%c0_2, %c0_3, %c0_4] : memref<1x1x128xf32, #tpu.memory_space<vmem>>, vector<1x1x128xf32>
    %5 = vector.shape_cast %4 : vector<1x1x128xf32> to vector<1x128xf32>
    %c0_5 = arith.constant 0 : index
    %c0_6 = arith.constant 0 : index
    %c0_7 = arith.constant 0 : index
    %6 = vector.load %arg7[%c0_5, %c0_6, %c0_7] : memref<1x1x128xf32, #tpu.memory_space<vmem>>, vector<1x1x128xf32>
    %7 = vector.shape_cast %6 : vector<1x1x128xf32> to vector<1x128xf32>
    %cst = arith.constant dense<0.000000e+00> : vector<4xf32>
    %8 = vector.multi_reduction <add>, %3, %cst [1] : vector<4x128xf32> to vector<4xf32>
    %9 = vector.shape_cast %8 : vector<4xf32> to vector<4x1xf32>
    %cst_8 = arith.constant 1.280000e+02 : f32
    %10 = vector.broadcast %cst_8 : f32 to vector<4x1xf32>
    %11 = arith.divf %9, %10 : vector<4x1xf32>
    %12 = vector.broadcast %11 : vector<4x1xf32> to vector<4x128xf32>
    %13 = arith.subf %3, %12 : vector<4x128xf32>
    %14 = vector.broadcast %11 : vector<4x1xf32> to vector<4x128xf32>
    %15 = arith.subf %3, %14 : vector<4x128xf32>
    %16 = arith.mulf %13, %15 : vector<4x128xf32>
    %cst_9 = arith.constant dense<0.000000e+00> : vector<4xf32>
    %17 = vector.multi_reduction <add>, %16, %cst_9 [1] : vector<4x128xf32> to vector<4xf32>
    %18 = vector.shape_cast %17 : vector<4xf32> to vector<4x1xf32>
    %cst_10 = arith.constant 1.280000e+02 : f32
    %19 = vector.broadcast %cst_10 : f32 to vector<4x1xf32>
    %20 = arith.divf %18, %19 : vector<4x1xf32>
    %21 = vector.broadcast %11 : vector<4x1xf32> to vector<4x128xf32>
    %22 = arith.subf %3, %21 : vector<4x128xf32>
    %cst_11 = arith.constant 9.99999997E-7 : f32
    %23 = vector.broadcast %cst_11 : f32 to vector<4x1xf32>
    %24 = arith.addf %20, %23 : vector<4x1xf32>
    %25 = math.rsqrt %24 : vector<4x1xf32>
    %26 = vector.broadcast %25 : vector<4x1xf32> to vector<4x128xf32>
    %27 = arith.mulf %22, %26 : vector<4x128xf32>
    %28 = vector.broadcast %5 : vector<1x128xf32> to vector<4x128xf32>
    %29 = arith.mulf %27, %28 : vector<4x128xf32>
    %30 = vector.broadcast %7 : vector<1x128xf32> to vector<4x128xf32>
    %31 = arith.addf %29, %30 : vector<4x128xf32>
    %c0_12 = arith.constant 0 : index
    %c0_13 = arith.constant 0 : index
    %c0_14 = arith.constant 0 : index
    %32 = vector.load %arg8[%c0_12, %c0_13, %c0_14] : memref<1x128x384xbf16, #tpu.memory_space<vmem>>, vector<1x128x384xbf16>
    %33 = vector.shape_cast %32 : vector<1x128x384xbf16> to vector<128x384xbf16>
    %34 = arith.truncf %31 : vector<4x128xf32> to vector<4x128xbf16>
    %cst_15 = arith.constant dense<0.000000e+00> : vector<4x384xf32>
    %35 = tpu.matmul %34, %33, %cst_15 {dimension_numbers = #tpu.dot_dimension_numbers<[1], [0], [0], [1], [0, 0, 1, 1], [], []>} : vector<4x128xbf16>, vector<128x384xbf16>, vector<4x384xf32> -> vector<4x384xf32>
    %c0_16 = arith.constant 0 : index
    %c0_17 = arith.constant 0 : index
    %c0_18 = arith.constant 0 : index
    %36 = vector.load %arg9[%c0_16, %c0_17, %c0_18] : memref<1x1x384xf32, #tpu.memory_space<vmem>>, vector<1x1x384xf32>
    %37 = vector.shape_cast %36 : vector<1x1x384xf32> to vector<1x384xf32>
    %38 = vector.broadcast %37 : vector<1x384xf32> to vector<4x384xf32>
    %39 = arith.addf %35, %38 : vector<4x384xf32>
    %40 = vector.extract_strided_slice %39 {offsets = [0, 0], sizes = [4, 128], strides = [1, 1]} : vector<4x384xf32> to vector<4x128xf32>
    %41 = vector.extract_strided_slice %39 {offsets = [0, 128], sizes = [4, 128], strides = [1, 1]} : vector<4x384xf32> to vector<4x128xf32>
    %42 = vector.extract_strided_slice %39 {offsets = [0, 256], sizes = [4, 128], strides = [1, 1]} : vector<4x384xf32> to vector<4x128xf32>
    %43 = vector.extract_strided_slice %41 {offsets = [0, 0], sizes = [4, 32], strides = [1, 1]} : vector<4x128xf32> to vector<4x32xf32>
    %44 = vector.extract_strided_slice %42 {offsets = [0, 0], sizes = [4, 32], strides = [1, 1]} : vector<4x128xf32> to vector<4x32xf32>
    %45 = arith.truncf %43 : vector<4x32xf32> to vector<4x32xbf16>
    %46 = arith.truncf %44 : vector<4x32xf32> to vector<4x32xbf16>
    %47 = vector.extract_strided_slice %41 {offsets = [0, 32], sizes = [4, 32], strides = [1, 1]} : vector<4x128xf32> to vector<4x32xf32>
    %48 = vector.extract_strided_slice %42 {offsets = [0, 32], sizes = [4, 32], strides = [1, 1]} : vector<4x128xf32> to vector<4x32xf32>
    %49 = arith.truncf %47 : vector<4x32xf32> to vector<4x32xbf16>
    %50 = arith.truncf %48 : vector<4x32xf32> to vector<4x32xbf16>
    %51 = vector.extract_strided_slice %41 {offsets = [0, 64], sizes = [4, 32], strides = [1, 1]} : vector<4x128xf32> to vector<4x32xf32>
    %52 = vector.extract_strided_slice %42 {offsets = [0, 64], sizes = [4, 32], strides = [1, 1]} : vector<4x128xf32> to vector<4x32xf32>
    %53 = arith.truncf %51 : vector<4x32xf32> to vector<4x32xbf16>
    %54 = arith.truncf %52 : vector<4x32xf32> to vector<4x32xbf16>
    %55 = vector.extract_strided_slice %41 {offsets = [0, 96], sizes = [4, 32], strides = [1, 1]} : vector<4x128xf32> to vector<4x32xf32>
    %56 = vector.extract_strided_slice %42 {offsets = [0, 96], sizes = [4, 32], strides = [1, 1]} : vector<4x128xf32> to vector<4x32xf32>
    %57 = arith.truncf %55 : vector<4x32xf32> to vector<4x32xbf16>
    %58 = arith.truncf %56 : vector<4x32xf32> to vector<4x32xbf16>
    %59 = vector.extract_strided_slice %40 {offsets = [0, 0], sizes = [4, 32], strides = [1, 1]} : vector<4x128xf32> to vector<4x32xf32>
    %60 = arith.truncf %59 : vector<4x32xf32> to vector<4x32xbf16>
    %cst_19 = arith.constant dense<0.000000e+00> : vector<4x4xf32>
    %61 = tpu.matmul %60, %45, %cst_19 {dimension_numbers = #tpu.dot_dimension_numbers<[1], [1], [0], [0], [0, 0, 1, 0], [], []>} : vector<4x32xbf16>, vector<4x32xbf16>, vector<4x4xf32> -> vector<4x4xf32>
    %cst_20 = arith.constant 0.176776692 : f32
    %62 = vector.broadcast %cst_20 : f32 to vector<4x4xf32>
    %63 = arith.mulf %61, %62 : vector<4x4xf32>
    %cst_21 = arith.constant dense<0xFF800000> : vector<4xf32>
    %64 = vector.multi_reduction <maximumf>, %63, %cst_21 [1] : vector<4x4xf32> to vector<4xf32>
    %65 = vector.shape_cast %64 : vector<4xf32> to vector<4x1xf32>
    %66 = vector.broadcast %65 : vector<4x1xf32> to vector<4x4xf32>
    %67 = arith.subf %63, %66 : vector<4x4xf32>
    %68 = math.exp %67 : vector<4x4xf32>
    %cst_22 = arith.constant dense<0.000000e+00> : vector<4xf32>
    %69 = vector.multi_reduction <add>, %68, %cst_22 [1] : vector<4x4xf32> to vector<4xf32>
    %70 = vector.shape_cast %69 : vector<4xf32> to vector<4x1xf32>
    %71 = vector.broadcast %70 : vector<4x1xf32> to vector<4x4xf32>
    %72 = arith.divf %68, %71 : vector<4x4xf32>
    %73 = arith.truncf %72 : vector<4x4xf32> to vector<4x4xbf16>
    %cst_23 = arith.constant dense<0.000000e+00> : vector<4x32xf32>
    %74 = tpu.matmul %73, %46, %cst_23 {dimension_numbers = #tpu.dot_dimension_numbers<[1], [0], [0], [1], [0, 0, 1, 1], [], []>} : vector<4x4xbf16>, vector<4x32xbf16>, vector<4x32xf32> -> vector<4x32xf32>
    %75 = vector.extract_strided_slice %40 {offsets = [0, 32], sizes = [4, 32], strides = [1, 1]} : vector<4x128xf32> to vector<4x32xf32>
    %76 = arith.truncf %75 : vector<4x32xf32> to vector<4x32xbf16>
    %cst_24 = arith.constant dense<0.000000e+00> : vector<4x4xf32>
    %77 = tpu.matmul %76, %49, %cst_24 {dimension_numbers = #tpu.dot_dimension_numbers<[1], [1], [0], [0], [0, 0, 1, 0], [], []>} : vector<4x32xbf16>, vector<4x32xbf16>, vector<4x4xf32> -> vector<4x4xf32>
    %cst_25 = arith.constant 0.176776692 : f32
    %78 = vector.broadcast %cst_25 : f32 to vector<4x4xf32>
    %79 = arith.mulf %77, %78 : vector<4x4xf32>
    %cst_26 = arith.constant dense<0xFF800000> : vector<4xf32>
    %80 = vector.multi_reduction <maximumf>, %79, %cst_26 [1] : vector<4x4xf32> to vector<4xf32>
    %81 = vector.shape_cast %80 : vector<4xf32> to vector<4x1xf32>
    %82 = vector.broadcast %81 : vector<4x1xf32> to vector<4x4xf32>
    %83 = arith.subf %79, %82 : vector<4x4xf32>
    %84 = math.exp %83 : vector<4x4xf32>
    %cst_27 = arith.constant dense<0.000000e+00> : vector<4xf32>
    %85 = vector.multi_reduction <add>, %84, %cst_27 [1] : vector<4x4xf32> to vector<4xf32>
    %86 = vector.shape_cast %85 : vector<4xf32> to vector<4x1xf32>
    %87 = vector.broadcast %86 : vector<4x1xf32> to vector<4x4xf32>
    %88 = arith.divf %84, %87 : vector<4x4xf32>
    %89 = arith.truncf %88 : vector<4x4xf32> to vector<4x4xbf16>
    %cst_28 = arith.constant dense<0.000000e+00> : vector<4x32xf32>
    %90 = tpu.matmul %89, %50, %cst_28 {dimension_numbers = #tpu.dot_dimension_numbers<[1], [0], [0], [1], [0, 0, 1, 1], [], []>} : vector<4x4xbf16>, vector<4x32xbf16>, vector<4x32xf32> -> vector<4x32xf32>
    %91 = vector.extract_strided_slice %40 {offsets = [0, 64], sizes = [4, 32], strides = [1, 1]} : vector<4x128xf32> to vector<4x32xf32>
    %92 = arith.truncf %91 : vector<4x32xf32> to vector<4x32xbf16>
    %cst_29 = arith.constant dense<0.000000e+00> : vector<4x4xf32>
    %93 = tpu.matmul %92, %53, %cst_29 {dimension_numbers = #tpu.dot_dimension_numbers<[1], [1], [0], [0], [0, 0, 1, 0], [], []>} : vector<4x32xbf16>, vector<4x32xbf16>, vector<4x4xf32> -> vector<4x4xf32>
    %cst_30 = arith.constant 0.176776692 : f32
    %94 = vector.broadcast %cst_30 : f32 to vector<4x4xf32>
    %95 = arith.mulf %93, %94 : vector<4x4xf32>
    %cst_31 = arith.constant dense<0xFF800000> : vector<4xf32>
    %96 = vector.multi_reduction <maximumf>, %95, %cst_31 [1] : vector<4x4xf32> to vector<4xf32>
    %97 = vector.shape_cast %96 : vector<4xf32> to vector<4x1xf32>
    %98 = vector.broadcast %97 : vector<4x1xf32> to vector<4x4xf32>
    %99 = arith.subf %95, %98 : vector<4x4xf32>
    %100 = math.exp %99 : vector<4x4xf32>
    %cst_32 = arith.constant dense<0.000000e+00> : vector<4xf32>
    %101 = vector.multi_reduction <add>, %100, %cst_32 [1] : vector<4x4xf32> to vector<4xf32>
    %102 = vector.shape_cast %101 : vector<4xf32> to vector<4x1xf32>
    %103 = vector.broadcast %102 : vector<4x1xf32> to vector<4x4xf32>
    %104 = arith.divf %100, %103 : vector<4x4xf32>
    %105 = arith.truncf %104 : vector<4x4xf32> to vector<4x4xbf16>
    %cst_33 = arith.constant dense<0.000000e+00> : vector<4x32xf32>
    %106 = tpu.matmul %105, %54, %cst_33 {dimension_numbers = #tpu.dot_dimension_numbers<[1], [0], [0], [1], [0, 0, 1, 1], [], []>} : vector<4x4xbf16>, vector<4x32xbf16>, vector<4x32xf32> -> vector<4x32xf32>
    %107 = vector.extract_strided_slice %40 {offsets = [0, 96], sizes = [4, 32], strides = [1, 1]} : vector<4x128xf32> to vector<4x32xf32>
    %108 = arith.truncf %107 : vector<4x32xf32> to vector<4x32xbf16>
    %cst_34 = arith.constant dense<0.000000e+00> : vector<4x4xf32>
    %109 = tpu.matmul %108, %57, %cst_34 {dimension_numbers = #tpu.dot_dimension_numbers<[1], [1], [0], [0], [0, 0, 1, 0], [], []>} : vector<4x32xbf16>, vector<4x32xbf16>, vector<4x4xf32> -> vector<4x4xf32>
    %cst_35 = arith.constant 0.176776692 : f32
    %110 = vector.broadcast %cst_35 : f32 to vector<4x4xf32>
    %111 = arith.mulf %109, %110 : vector<4x4xf32>
    %cst_36 = arith.constant dense<0xFF800000> : vector<4xf32>
    %112 = vector.multi_reduction <maximumf>, %111, %cst_36 [1] : vector<4x4xf32> to vector<4xf32>
    %113 = vector.shape_cast %112 : vector<4xf32> to vector<4x1xf32>
    %114 = vector.broadcast %113 : vector<4x1xf32> to vector<4x4xf32>
    %115 = arith.subf %111, %114 : vector<4x4xf32>
    %116 = math.exp %115 : vector<4x4xf32>
    %cst_37 = arith.constant dense<0.000000e+00> : vector<4xf32>
    %117 = vector.multi_reduction <add>, %116, %cst_37 [1] : vector<4x4xf32> to vector<4xf32>
    %118 = vector.shape_cast %117 : vector<4xf32> to vector<4x1xf32>
    %119 = vector.broadcast %118 : vector<4x1xf32> to vector<4x4xf32>
    %120 = arith.divf %116, %119 : vector<4x4xf32>
    %121 = arith.truncf %120 : vector<4x4xf32> to vector<4x4xbf16>
    %cst_38 = arith.constant dense<0.000000e+00> : vector<4x32xf32>
    %122 = tpu.matmul %121, %58, %cst_38 {dimension_numbers = #tpu.dot_dimension_numbers<[1], [0], [0], [1], [0, 0, 1, 1], [], []>} : vector<4x4xbf16>, vector<4x32xbf16>, vector<4x32xf32> -> vector<4x32xf32>
    %123 = tpu.concatenate %74, %90, %106, %122 in 1 : vector<4x32xf32>, vector<4x32xf32>, vector<4x32xf32>, vector<4x32xf32> -> vector<4x128xf32>
    %c0_39 = arith.constant 0 : index
    %c0_40 = arith.constant 0 : index
    %c0_41 = arith.constant 0 : index
    %124 = vector.load %arg10[%c0_39, %c0_40, %c0_41] : memref<1x128x128xbf16, #tpu.memory_space<vmem>>, vector<1x128x128xbf16>
    %125 = vector.shape_cast %124 : vector<1x128x128xbf16> to vector<128x128xbf16>
    %126 = arith.truncf %123 : vector<4x128xf32> to vector<4x128xbf16>
    %cst_42 = arith.constant dense<0.000000e+00> : vector<4x128xf32>
    %127 = tpu.matmul %126, %125, %cst_42 {dimension_numbers = #tpu.dot_dimension_numbers<[1], [0], [0], [1], [0, 0, 1, 1], [], []>} : vector<4x128xbf16>, vector<128x128xbf16>, vector<4x128xf32> -> vector<4x128xf32>
    %128 = arith.addf %3, %127 : vector<4x128xf32>
    %c0_43 = arith.constant 0 : index
    %c0_44 = arith.constant 0 : index
    %c0_45 = arith.constant 0 : index
    %129 = vector.load %arg11[%c0_43, %c0_44, %c0_45] : memref<1x1x128xf32, #tpu.memory_space<vmem>>, vector<1x1x128xf32>
    %130 = vector.shape_cast %129 : vector<1x1x128xf32> to vector<1x128xf32>
    %131 = vector.broadcast %130 : vector<1x128xf32> to vector<4x128xf32>
    %132 = arith.addf %128, %131 : vector<4x128xf32>
    %c0_46 = arith.constant 0 : index
    %c0_47 = arith.constant 0 : index
    %c0_48 = arith.constant 0 : index
    %133 = vector.load %arg12[%c0_46, %c0_47, %c0_48] : memref<1x1x128xf32, #tpu.memory_space<vmem>>, vector<1x1x128xf32>
    %134 = vector.shape_cast %133 : vector<1x1x128xf32> to vector<1x128xf32>
    %c0_49 = arith.constant 0 : index
    %c0_50 = arith.constant 0 : index
    %c0_51 = arith.constant 0 : index
    %135 = vector.load %arg13[%c0_49, %c0_50, %c0_51] : memref<1x1x128xf32, #tpu.memory_space<vmem>>, vector<1x1x128xf32>
    %136 = vector.shape_cast %135 : vector<1x1x128xf32> to vector<1x128xf32>
    %cst_52 = arith.constant dense<0.000000e+00> : vector<4xf32>
    %137 = vector.multi_reduction <add>, %132, %cst_52 [1] : vector<4x128xf32> to vector<4xf32>
    %138 = vector.shape_cast %137 : vector<4xf32> to vector<4x1xf32>
    %cst_53 = arith.constant 1.280000e+02 : f32
    %139 = vector.broadcast %cst_53 : f32 to vector<4x1xf32>
    %140 = arith.divf %138, %139 : vector<4x1xf32>
    %141 = vector.broadcast %140 : vector<4x1xf32> to vector<4x128xf32>
    %142 = arith.subf %132, %141 : vector<4x128xf32>
    %143 = vector.broadcast %140 : vector<4x1xf32> to vector<4x128xf32>
    %144 = arith.subf %132, %143 : vector<4x128xf32>
    %145 = arith.mulf %142, %144 : vector<4x128xf32>
    %cst_54 = arith.constant dense<0.000000e+00> : vector<4xf32>
    %146 = vector.multi_reduction <add>, %145, %cst_54 [1] : vector<4x128xf32> to vector<4xf32>
    %147 = vector.shape_cast %146 : vector<4xf32> to vector<4x1xf32>
    %cst_55 = arith.constant 1.280000e+02 : f32
    %148 = vector.broadcast %cst_55 : f32 to vector<4x1xf32>
    %149 = arith.divf %147, %148 : vector<4x1xf32>
    %150 = vector.broadcast %140 : vector<4x1xf32> to vector<4x128xf32>
    %151 = arith.subf %132, %150 : vector<4x128xf32>
    %cst_56 = arith.constant 9.99999997E-7 : f32
    %152 = vector.broadcast %cst_56 : f32 to vector<4x1xf32>
    %153 = arith.addf %149, %152 : vector<4x1xf32>
    %154 = math.rsqrt %153 : vector<4x1xf32>
    %155 = vector.broadcast %154 : vector<4x1xf32> to vector<4x128xf32>
    %156 = arith.mulf %151, %155 : vector<4x128xf32>
    %157 = vector.broadcast %134 : vector<1x128xf32> to vector<4x128xf32>
    %158 = arith.mulf %156, %157 : vector<4x128xf32>
    %159 = vector.broadcast %136 : vector<1x128xf32> to vector<4x128xf32>
    %160 = arith.addf %158, %159 : vector<4x128xf32>
    %c0_57 = arith.constant 0 : index
    %c0_58 = arith.constant 0 : index
    %c0_59 = arith.constant 0 : index
    %161 = vector.load %arg14[%c0_57, %c0_58, %c0_59] : memref<1x128x256xbf16, #tpu.memory_space<vmem>>, vector<1x128x256xbf16>
    %162 = vector.shape_cast %161 : vector<1x128x256xbf16> to vector<128x256xbf16>
    %163 = arith.truncf %160 : vector<4x128xf32> to vector<4x128xbf16>
    %cst_60 = arith.constant dense<0.000000e+00> : vector<4x256xf32>
    %164 = tpu.matmul %163, %162, %cst_60 {dimension_numbers = #tpu.dot_dimension_numbers<[1], [0], [0], [1], [0, 0, 1, 1], [], []>} : vector<4x128xbf16>, vector<128x256xbf16>, vector<4x256xf32> -> vector<4x256xf32>
    %c0_61 = arith.constant 0 : index
    %c0_62 = arith.constant 0 : index
    %c0_63 = arith.constant 0 : index
    %165 = vector.load %arg15[%c0_61, %c0_62, %c0_63] : memref<1x1x256xf32, #tpu.memory_space<vmem>>, vector<1x1x256xf32>
    %166 = vector.shape_cast %165 : vector<1x1x256xf32> to vector<1x256xf32>
    %167 = vector.broadcast %166 : vector<1x256xf32> to vector<4x256xf32>
    %168 = arith.addf %164, %167 : vector<4x256xf32>
    %cst_64 = arith.constant 5.000000e-01 : f32
    %169 = vector.broadcast %cst_64 : f32 to vector<4x256xf32>
    %170 = arith.mulf %169, %168 : vector<4x256xf32>
    %cst_65 = arith.constant 4.471500e-02 : f32
    %171 = vector.broadcast %cst_65 : f32 to vector<4x256xf32>
    %172 = arith.mulf %171, %168 : vector<4x256xf32>
    %173 = arith.mulf %172, %168 : vector<4x256xf32>
    %174 = arith.mulf %173, %168 : vector<4x256xf32>
    %175 = arith.addf %168, %174 : vector<4x256xf32>
    %cst_66 = arith.constant 0.797884583 : f32
    %176 = vector.broadcast %cst_66 : f32 to vector<4x256xf32>
    %177 = arith.mulf %176, %175 : vector<4x256xf32>
    %178 = math.tanh %177 : vector<4x256xf32>
    %cst_67 = arith.constant 1.000000e+00 : f32
    %179 = vector.broadcast %cst_67 : f32 to vector<4x256xf32>
    %180 = arith.addf %179, %178 : vector<4x256xf32>
    %181 = arith.mulf %170, %180 : vector<4x256xf32>
    %c0_68 = arith.constant 0 : index
    %c0_69 = arith.constant 0 : index
    %c0_70 = arith.constant 0 : index
    %182 = vector.load %arg16[%c0_68, %c0_69, %c0_70] : memref<1x256x128xbf16, #tpu.memory_space<vmem>>, vector<1x256x128xbf16>
    %183 = vector.shape_cast %182 : vector<1x256x128xbf16> to vector<256x128xbf16>
    %184 = arith.truncf %181 : vector<4x256xf32> to vector<4x256xbf16>
    %cst_71 = arith.constant dense<0.000000e+00> : vector<4x128xf32>
    %185 = tpu.matmul %184, %183, %cst_71 {dimension_numbers = #tpu.dot_dimension_numbers<[1], [0], [0], [1], [0, 0, 1, 1], [], []>} : vector<4x256xbf16>, vector<256x128xbf16>, vector<4x128xf32> -> vector<4x128xf32>
    %186 = arith.addf %132, %185 : vector<4x128xf32>
    %c0_72 = arith.constant 0 : index
    %c0_73 = arith.constant 0 : index
    %c0_74 = arith.constant 0 : index
    %187 = vector.load %arg17[%c0_72, %c0_73, %c0_74] : memref<1x1x128xf32, #tpu.memory_space<vmem>>, vector<1x1x128xf32>
    %188 = vector.shape_cast %187 : vector<1x1x128xf32> to vector<1x128xf32>
    %189 = vector.broadcast %188 : vector<1x128xf32> to vector<4x128xf32>
    %190 = arith.addf %186, %189 : vector<4x128xf32>
    %c0_75 = arith.constant 0 : index
    %c0_76 = arith.constant 0 : index
    %191 = vector.load %arg23[%c0_75, %c0_76] : memref<4x128xf32, #tpu.memory_space<vmem>>, vector<4x128xf32>
    tpu.vector_store %arg23[%c0_75, %c0_76], %190 {strides = array<i32>} : memref<4x128xf32, #tpu.memory_space<vmem>>, vector<4x128xf32>,
    %c1_i32 = arith.constant 1 : i32
    %192 = arith.cmpi eq, %arg1, %c1_i32 : i32
    %193 = arith.extui %192 : i1 to i32
    %c0_i32_77 = arith.constant 0 : i32
    %194 = arith.cmpi ne, %193, %c0_i32_77 : i32
    scf.if %194 {
      %c0_78 = arith.constant 0 : index
      %c0_79 = arith.constant 0 : index
      %195 = vector.load %arg18[%c0_78, %c0_79] : memref<1x128xf32, #tpu.memory_space<vmem>>, vector<1x128xf32>
      %c0_80 = arith.constant 0 : index
      %c0_81 = arith.constant 0 : index
      %196 = vector.load %arg19[%c0_80, %c0_81] : memref<1x128xf32, #tpu.memory_space<vmem>>, vector<1x128xf32>
      %cst_82 = arith.constant dense<0.000000e+00> : vector<4xf32>
      %197 = vector.multi_reduction <add>, %190, %cst_82 [1] : vector<4x128xf32> to vector<4xf32>
      %198 = vector.shape_cast %197 : vector<4xf32> to vector<4x1xf32>
      %cst_83 = arith.constant 1.280000e+02 : f32
      %199 = vector.broadcast %cst_83 : f32 to vector<4x1xf32>
      %200 = arith.divf %198, %199 : vector<4x1xf32>
      %201 = vector.broadcast %200 : vector<4x1xf32> to vector<4x128xf32>
      %202 = arith.subf %190, %201 : vector<4x128xf32>
      %203 = vector.broadcast %200 : vector<4x1xf32> to vector<4x128xf32>
      %204 = arith.subf %190, %203 : vector<4x128xf32>
      %205 = arith.mulf %202, %204 : vector<4x128xf32>
      %cst_84 = arith.constant dense<0.000000e+00> : vector<4xf32>
      %206 = vector.multi_reduction <add>, %205, %cst_84 [1] : vector<4x128xf32> to vector<4xf32>
      %207 = vector.shape_cast %206 : vector<4xf32> to vector<4x1xf32>
      %cst_85 = arith.constant 1.280000e+02 : f32
      %208 = vector.broadcast %cst_85 : f32 to vector<4x1xf32>
      %209 = arith.divf %207, %208 : vector<4x1xf32>
      %210 = vector.broadcast %200 : vector<4x1xf32> to vector<4x128xf32>
      %211 = arith.subf %190, %210 : vector<4x128xf32>
      %cst_86 = arith.constant 9.99999997E-7 : f32
      %212 = vector.broadcast %cst_86 : f32 to vector<4x1xf32>
      %213 = arith.addf %209, %212 : vector<4x1xf32>
      %214 = math.rsqrt %213 : vector<4x1xf32>
      %215 = vector.broadcast %214 : vector<4x1xf32> to vector<4x128xf32>
      %216 = arith.mulf %211, %215 : vector<4x128xf32>
      %217 = vector.broadcast %195 : vector<1x128xf32> to vector<4x128xf32>
      %218 = arith.mulf %216, %217 : vector<4x128xf32>
      %219 = vector.broadcast %196 : vector<1x128xf32> to vector<4x128xf32>
      %220 = arith.addf %218, %219 : vector<4x128xf32>
      %c0_87 = arith.constant 0 : index
      %c0_88 = arith.constant 0 : index
      %221 = vector.load %arg20[%c0_87, %c0_88] : memref<128x128xbf16, #tpu.memory_space<vmem>>, vector<128x128xbf16>
      %222 = arith.truncf %220 : vector<4x128xf32> to vector<4x128xbf16>
      %cst_89 = arith.constant dense<0.000000e+00> : vector<4x128xf32>
      %223 = tpu.matmul %222, %221, %cst_89 {dimension_numbers = #tpu.dot_dimension_numbers<[1], [0], [0], [1], [0, 0, 1, 1], [], []>} : vector<4x128xbf16>, vector<128x128xbf16>, vector<4x128xf32> -> vector<4x128xf32>
      %c0_90 = arith.constant 0 : index
      %c0_91 = arith.constant 0 : index
      %224 = vector.load %arg21[%c0_90, %c0_91] : memref<1x128xf32, #tpu.memory_space<vmem>>, vector<1x128xf32>
      %225 = vector.broadcast %224 : vector<1x128xf32> to vector<4x128xf32>
      %226 = arith.addf %223, %225 : vector<4x128xf32>
      %cst_92 = arith.constant 0.0883883461 : f32
      %227 = vector.broadcast %cst_92 : f32 to vector<4x128xf32>
      %228 = arith.mulf %226, %227 : vector<4x128xf32>
      %229 = arith.truncf %228 : vector<4x128xf32> to vector<4x128xbf16>
      %c0_93 = arith.constant 0 : index
      %c0_94 = arith.constant 0 : index
      %c0_95 = arith.constant 0 : index
      %230 = vector.load %arg22[%c0_93, %c0_94, %c0_95] : memref<1x4x128xbf16, #tpu.memory_space<vmem>>, vector<1x4x128xbf16>
      %231 = vector.shape_cast %230 : vector<1x4x128xbf16> to vector<4x128xbf16>
      %232 = vector.shape_cast %229 : vector<4x128xbf16> to vector<1x4x128xbf16>
      tpu.vector_store %arg22[%c0_93, %c0_94, %c0_95], %232 {strides = array<i32>} : memref<1x4x128xbf16, #tpu.memory_space<vmem>>, vector<1x4x128xbf16>,
    } else {
    }
    return
  }
  func.func @transform_0(%arg0: i32, %arg1: i32) -> (i32, i32, i32) {
    %c0_i32 = arith.constant 0 : i32
    %c0_i32_0 = arith.constant 0 : i32
    %c0_i32_1 = arith.constant 0 : i32
    return %arg0, %c0_i32, %c0_i32_0 : i32, i32, i32
  }
  func.func @transform_1(%arg0: i32, %arg1: i32) -> (i32, i32) {
    %c0_i32 = arith.constant 0 : i32
    %c0_i32_0 = arith.constant 0 : i32
    %c0_i32_1 = arith.constant 0 : i32
    return %c0_i32, %c0_i32_0 : i32, i32
  }
  func.func @transform_2(%arg0: i32, %arg1: i32) -> (i32, i32) {
    %c0_i32 = arith.constant 0 : i32
    %c0_i32_0 = arith.constant 0 : i32
    %c0_i32_1 = arith.constant 0 : i32
    return %c0_i32, %c0_i32_0 : i32, i32
  }
  func.func @transform_3(%arg0: i32, %arg1: i32) -> (i32, i32) {
    %c0_i32 = arith.constant 0 : i32
    %c0_i32_0 = arith.constant 0 : i32
    %c0_i32_1 = arith.constant 0 : i32
    return %c0_i32, %c0_i32_0 : i32, i32
  }
  func.func @transform_4(%arg0: i32, %arg1: i32) -> (i32, i32, i32) {
    %c0_i32 = arith.constant 0 : i32
    %c0_i32_0 = arith.constant 0 : i32
    %c0_i32_1 = arith.constant 0 : i32
    return %arg1, %c0_i32, %c0_i32_0 : i32, i32, i32
  }
  func.func @transform_5(%arg0: i32, %arg1: i32) -> (i32, i32, i32) {
    %c0_i32 = arith.constant 0 : i32
    %c0_i32_0 = arith.constant 0 : i32
    %c0_i32_1 = arith.constant 0 : i32
    return %arg1, %c0_i32, %c0_i32_0 : i32, i32, i32
  }
  func.func @transform_6(%arg0: i32, %arg1: i32) -> (i32, i32, i32) {
    %c0_i32 = arith.constant 0 : i32
    %c0_i32_0 = arith.constant 0 : i32
    %c0_i32_1 = arith.constant 0 : i32
    return %arg1, %c0_i32, %c0_i32_0 : i32, i32, i32
  }
  func.func @transform_7(%arg0: i32, %arg1: i32) -> (i32, i32, i32) {
    %c0_i32 = arith.constant 0 : i32
    %c0_i32_0 = arith.constant 0 : i32
    %c0_i32_1 = arith.constant 0 : i32
    return %arg1, %c0_i32, %c0_i32_0 : i32, i32, i32
  }
  func.func @transform_8(%arg0: i32, %arg1: i32) -> (i32, i32, i32) {
    %c0_i32 = arith.constant 0 : i32
    %c0_i32_0 = arith.constant 0 : i32
    %c0_i32_1 = arith.constant 0 : i32
    return %arg1, %c0_i32, %c0_i32_0 : i32, i32, i32
  }
  func.func @transform_9(%arg0: i32, %arg1: i32) -> (i32, i32, i32) {
    %c0_i32 = arith.constant 0 : i32
    %c0_i32_0 = arith.constant 0 : i32
    %c0_i32_1 = arith.constant 0 : i32
    return %arg1, %c0_i32, %c0_i32_0 : i32, i32, i32
  }
  func.func @transform_10(%arg0: i32, %arg1: i32) -> (i32, i32, i32) {
    %c0_i32 = arith.constant 0 : i32
    %c0_i32_0 = arith.constant 0 : i32
    %c0_i32_1 = arith.constant 0 : i32
    return %arg1, %c0_i32, %c0_i32_0 : i32, i32, i32
  }
  func.func @transform_11(%arg0: i32, %arg1: i32) -> (i32, i32, i32) {
    %c0_i32 = arith.constant 0 : i32
    %c0_i32_0 = arith.constant 0 : i32
    %c0_i32_1 = arith.constant 0 : i32
    return %arg1, %c0_i32, %c0_i32_0 : i32, i32, i32
  }
  func.func @transform_12(%arg0: i32, %arg1: i32) -> (i32, i32, i32) {
    %c0_i32 = arith.constant 0 : i32
    %c0_i32_0 = arith.constant 0 : i32
    %c0_i32_1 = arith.constant 0 : i32
    return %arg1, %c0_i32, %c0_i32_0 : i32, i32, i32
  }
  func.func @transform_13(%arg0: i32, %arg1: i32) -> (i32, i32, i32) {
    %c0_i32 = arith.constant 0 : i32
    %c0_i32_0 = arith.constant 0 : i32
    %c0_i32_1 = arith.constant 0 : i32
    return %arg1, %c0_i32, %c0_i32_0 : i32, i32, i32
  }
  func.func @transform_14(%arg0: i32, %arg1: i32) -> (i32, i32, i32) {
    %c0_i32 = arith.constant 0 : i32
    %c0_i32_0 = arith.constant 0 : i32
    %c0_i32_1 = arith.constant 0 : i32
    return %arg1, %c0_i32, %c0_i32_0 : i32, i32, i32
  }
  func.func @transform_15(%arg0: i32, %arg1: i32) -> (i32, i32, i32) {
    %c0_i32 = arith.constant 0 : i32
    %c0_i32_0 = arith.constant 0 : i32
    %c0_i32_1 = arith.constant 0 : i32
    return %arg1, %c0_i32, %c0_i32_0 : i32, i32, i32
  }
  func.func @transform_16(%arg0: i32, %arg1: i32) -> (i32, i32) {
    %c0_i32 = arith.constant 0 : i32
    %c0_i32_0 = arith.constant 0 : i32
    %c0_i32_1 = arith.constant 0 : i32
    return %c0_i32, %c0_i32_0 : i32, i32
  }
  func.func @transform_17(%arg0: i32, %arg1: i32) -> (i32, i32) {
    %c0_i32 = arith.constant 0 : i32
    %c0_i32_0 = arith.constant 0 : i32
    %c0_i32_1 = arith.constant 0 : i32
    return %c0_i32, %c0_i32_0 : i32, i32
  }
  func.func @transform_18(%arg0: i32, %arg1: i32) -> (i32, i32) {
    %c0_i32 = arith.constant 0 : i32
    %c0_i32_0 = arith.constant 0 : i32
    %c0_i32_1 = arith.constant 0 : i32
    return %c0_i32, %c0_i32_0 : i32, i32
  }
  func.func @transform_19(%arg0: i32, %arg1: i32) -> (i32, i32) {
    %c0_i32 = arith.constant 0 : i32
    %c0_i32_0 = arith.constant 0 : i32
    %c0_i32_1 = arith.constant 0 : i32
    return %c0_i32, %c0_i32_0 : i32, i32
  }
  func.func @transform_20(%arg0: i32, %arg1: i32) -> (i32, i32, i32) {
    %c0_i32 = arith.constant 0 : i32
    %c0_i32_0 = arith.constant 0 : i32
    %c0_i32_1 = arith.constant 0 : i32
    return %arg0, %c0_i32, %c0_i32_0 : i32, i32, i32
  }
}

module attributes {stable_mosaic.version = 11 : i64} {
  func.func @_gemma_stack_kernel(%arg0: i32, %arg1: memref<8x128xbf16, #tpu.memory_space<vmem>>, %arg2: memref<8x32xf32, #tpu.memory_space<vmem>>, %arg3: memref<8x32xf32, #tpu.memory_space<vmem>>, %arg4: memref<1x1x128xf32, #tpu.memory_space<vmem>>, %arg5: memref<1x128x256xbf16, #tpu.memory_space<vmem>>, %arg6: memref<1x128x128xbf16, #tpu.memory_space<vmem>>, %arg7: memref<1x1x128xf32, #tpu.memory_space<vmem>>, %arg8: memref<1x128x512xbf16, #tpu.memory_space<vmem>>, %arg9: memref<1x256x128xbf16, #tpu.memory_space<vmem>>, %arg10: memref<1x128xf32, #tpu.memory_space<vmem>>, %arg11: memref<8x128xf32, #tpu.memory_space<vmem>>, %arg12: memref<8x128xf32, #tpu.memory_space<vmem>>) attributes {dimension_semantics = [#tpu.dimension_semantics<arbitrary>], iteration_bounds = array<i64: 2>, scalar_prefetch = 0 : i64, scratch_operands = 1 : i64, tpu.core_type = #tpu.core_type<tc>, window_params = [{pipeline_mode = #tpu.pipeline_mode<synchronous>, transform_indices = @transform_0, window_bounds = array<i64: 8, 128>}, {pipeline_mode = #tpu.pipeline_mode<synchronous>, transform_indices = @transform_1, window_bounds = array<i64: 8, 32>}, {pipeline_mode = #tpu.pipeline_mode<synchronous>, transform_indices = @transform_2, window_bounds = array<i64: 8, 32>}, {transform_indices = @transform_3, window_bounds = array<i64: 1, 1, 128>}, {transform_indices = @transform_4, window_bounds = array<i64: 1, 128, 256>}, {transform_indices = @transform_5, window_bounds = array<i64: 1, 128, 128>}, {transform_indices = @transform_6, window_bounds = array<i64: 1, 1, 128>}, {transform_indices = @transform_7, window_bounds = array<i64: 1, 128, 512>}, {transform_indices = @transform_8, window_bounds = array<i64: 1, 256, 128>}, {pipeline_mode = #tpu.pipeline_mode<synchronous>, transform_indices = @transform_9, window_bounds = array<i64: 1, 128>}, {pipeline_mode = #tpu.pipeline_mode<synchronous>, transform_indices = @transform_10, window_bounds = array<i64: 8, 128>}]} {
    %c0_i32 = arith.constant 0 : i32
    %0 = arith.cmpi eq, %arg0, %c0_i32 : i32
    %1 = arith.extui %0 : i1 to i32
    %c0_i32_0 = arith.constant 0 : i32
    %2 = arith.cmpi ne, %1, %c0_i32_0 : i32
    scf.if %2 {
      %c0_70 = arith.constant 0 : index
      %c0_71 = arith.constant 0 : index
      %210 = vector.load %arg1[%c0_70, %c0_71] : memref<8x128xbf16, #tpu.memory_space<vmem>>, vector<8x128xbf16>
      %211 = arith.extf %210 : vector<8x128xbf16> to vector<8x128xf32>
      %cst_72 = arith.constant 11.3137083 : f32
      %212 = vector.broadcast %cst_72 : f32 to vector<8x128xf32>
      %213 = arith.mulf %211, %212 : vector<8x128xf32>
      %c0_73 = arith.constant 0 : index
      %c0_74 = arith.constant 0 : index
      %214 = vector.load %arg12[%c0_73, %c0_74] : memref<8x128xf32, #tpu.memory_space<vmem>>, vector<8x128xf32>
      tpu.vector_store %arg12[%c0_73, %c0_74], %213 {strides = array<i32>} : memref<8x128xf32, #tpu.memory_space<vmem>>, vector<8x128xf32>,
    } else {
    }
    %c0 = arith.constant 0 : index
    %c0_1 = arith.constant 0 : index
    %3 = vector.load %arg12[%c0, %c0_1] : memref<8x128xf32, #tpu.memory_space<vmem>>, vector<8x128xf32>
    %c0_2 = arith.constant 0 : index
    %c0_3 = arith.constant 0 : index
    %c0_4 = arith.constant 0 : index
    %4 = vector.load %arg4[%c0_2, %c0_3, %c0_4] : memref<1x1x128xf32, #tpu.memory_space<vmem>>, vector<1x1x128xf32>
    %5 = vector.shape_cast %4 : vector<1x1x128xf32> to vector<1x128xf32>
    %6 = arith.mulf %3, %3 : vector<8x128xf32>
    %cst = arith.constant dense<0.000000e+00> : vector<8xf32>
    %7 = vector.multi_reduction <add>, %6, %cst [1] : vector<8x128xf32> to vector<8xf32>
    %8 = vector.shape_cast %7 : vector<8xf32> to vector<8x1xf32>
    %cst_5 = arith.constant 1.280000e+02 : f32
    %9 = vector.broadcast %cst_5 : f32 to vector<8x1xf32>
    %10 = arith.divf %8, %9 : vector<8x1xf32>
    %cst_6 = arith.constant 9.99999997E-7 : f32
    %11 = vector.broadcast %cst_6 : f32 to vector<8x1xf32>
    %12 = arith.addf %10, %11 : vector<8x1xf32>
    %13 = math.rsqrt %12 : vector<8x1xf32>
    %14 = vector.broadcast %13 : vector<8x1xf32> to vector<8x128xf32>
    %15 = arith.mulf %3, %14 : vector<8x128xf32>
    %cst_7 = arith.constant 1.000000e+00 : f32
    %16 = vector.broadcast %cst_7 : f32 to vector<1x128xf32>
    %17 = arith.addf %16, %5 : vector<1x128xf32>
    %18 = vector.broadcast %17 : vector<1x128xf32> to vector<8x128xf32>
    %19 = arith.mulf %15, %18 : vector<8x128xf32>
    %c0_8 = arith.constant 0 : index
    %c0_9 = arith.constant 0 : index
    %c0_10 = arith.constant 0 : index
    %20 = vector.load %arg5[%c0_8, %c0_9, %c0_10] : memref<1x128x256xbf16, #tpu.memory_space<vmem>>, vector<1x128x256xbf16>
    %21 = vector.shape_cast %20 : vector<1x128x256xbf16> to vector<128x256xbf16>
    %22 = arith.truncf %19 : vector<8x128xf32> to vector<8x128xbf16>
    %cst_11 = arith.constant dense<0.000000e+00> : vector<8x256xf32>
    %23 = tpu.matmul %22, %21, %cst_11 {dimension_numbers = #tpu.dot_dimension_numbers<[1], [0], [0], [1], [0, 0, 1, 1], [], []>} : vector<8x128xbf16>, vector<128x256xbf16>, vector<8x256xf32> -> vector<8x256xf32>
    %24 = vector.extract_strided_slice %23 {offsets = [0, 0], sizes = [8, 128], strides = [1, 1]} : vector<8x256xf32> to vector<8x128xf32>
    %25 = vector.extract_strided_slice %23 {offsets = [0, 128], sizes = [8, 64], strides = [1, 1]} : vector<8x256xf32> to vector<8x64xf32>
    %26 = vector.extract_strided_slice %23 {offsets = [0, 192], sizes = [8, 64], strides = [1, 1]} : vector<8x256xf32> to vector<8x64xf32>
    %c0_12 = arith.constant 0 : index
    %c0_13 = arith.constant 0 : index
    %27 = vector.load %arg2[%c0_12, %c0_13] : memref<8x32xf32, #tpu.memory_space<vmem>>, vector<8x32xf32>
    %c0_14 = arith.constant 0 : index
    %c0_15 = arith.constant 0 : index
    %28 = vector.load %arg3[%c0_14, %c0_15] : memref<8x32xf32, #tpu.memory_space<vmem>>, vector<8x32xf32>
    %29 = tpu.iota {dimensions = array<i32: 0>} : vector<8x8xi32>
    %30 = tpu.iota {dimensions = array<i32: 1>} : vector<8x8xi32>
    %31 = arith.cmpi sle, %30, %29 : vector<8x8xi32>
    %cst_16 = arith.constant 0.000000e+00 : f32
    %cst_17 = arith.constant -1.000000e+30 : f32
    %32 = vector.broadcast %cst_16 : f32 to vector<8x8xf32>
    %33 = vector.broadcast %cst_17 : f32 to vector<8x8xf32>
    %34 = arith.select %31, %32, %33 : vector<8x8xi1>, vector<8x8xf32>
    %35 = vector.extract_strided_slice %25 {offsets = [0, 0], sizes = [8, 32], strides = [1, 1]} : vector<8x64xf32> to vector<8x32xf32>
    %36 = vector.extract_strided_slice %26 {offsets = [0, 0], sizes = [8, 32], strides = [1, 1]} : vector<8x64xf32> to vector<8x32xf32>
    %37 = vector.extract_strided_slice %35 {offsets = [0, 16], sizes = [8, 16], strides = [1, 1]} : vector<8x32xf32> to vector<8x16xf32>
    %cst_18 = arith.constant 0.000000e+00 : f32
    %38 = vector.broadcast %cst_18 : f32 to vector<8x16xf32>
    %39 = arith.subf %38, %37 : vector<8x16xf32>
    %40 = vector.extract_strided_slice %35 {offsets = [0, 0], sizes = [8, 16], strides = [1, 1]} : vector<8x32xf32> to vector<8x16xf32>
    %41 = tpu.concatenate %39, %40 in 1 : vector<8x16xf32>, vector<8x16xf32> -> vector<8x32xf32>
    %42 = arith.mulf %35, %27 : vector<8x32xf32>
    %43 = arith.mulf %41, %28 : vector<8x32xf32>
    %44 = arith.addf %42, %43 : vector<8x32xf32>
    %45 = arith.truncf %44 : vector<8x32xf32> to vector<8x32xbf16>
    %46 = arith.truncf %36 : vector<8x32xf32> to vector<8x32xbf16>
    %47 = vector.extract_strided_slice %25 {offsets = [0, 32], sizes = [8, 32], strides = [1, 1]} : vector<8x64xf32> to vector<8x32xf32>
    %48 = vector.extract_strided_slice %26 {offsets = [0, 32], sizes = [8, 32], strides = [1, 1]} : vector<8x64xf32> to vector<8x32xf32>
    %49 = vector.extract_strided_slice %47 {offsets = [0, 16], sizes = [8, 16], strides = [1, 1]} : vector<8x32xf32> to vector<8x16xf32>
    %cst_19 = arith.constant 0.000000e+00 : f32
    %50 = vector.broadcast %cst_19 : f32 to vector<8x16xf32>
    %51 = arith.subf %50, %49 : vector<8x16xf32>
    %52 = vector.extract_strided_slice %47 {offsets = [0, 0], sizes = [8, 16], strides = [1, 1]} : vector<8x32xf32> to vector<8x16xf32>
    %53 = tpu.concatenate %51, %52 in 1 : vector<8x16xf32>, vector<8x16xf32> -> vector<8x32xf32>
    %54 = arith.mulf %47, %27 : vector<8x32xf32>
    %55 = arith.mulf %53, %28 : vector<8x32xf32>
    %56 = arith.addf %54, %55 : vector<8x32xf32>
    %57 = arith.truncf %56 : vector<8x32xf32> to vector<8x32xbf16>
    %58 = arith.truncf %48 : vector<8x32xf32> to vector<8x32xbf16>
    %59 = vector.extract_strided_slice %24 {offsets = [0, 0], sizes = [8, 32], strides = [1, 1]} : vector<8x128xf32> to vector<8x32xf32>
    %60 = vector.extract_strided_slice %59 {offsets = [0, 16], sizes = [8, 16], strides = [1, 1]} : vector<8x32xf32> to vector<8x16xf32>
    %cst_20 = arith.constant 0.000000e+00 : f32
    %61 = vector.broadcast %cst_20 : f32 to vector<8x16xf32>
    %62 = arith.subf %61, %60 : vector<8x16xf32>
    %63 = vector.extract_strided_slice %59 {offsets = [0, 0], sizes = [8, 16], strides = [1, 1]} : vector<8x32xf32> to vector<8x16xf32>
    %64 = tpu.concatenate %62, %63 in 1 : vector<8x16xf32>, vector<8x16xf32> -> vector<8x32xf32>
    %65 = arith.mulf %59, %27 : vector<8x32xf32>
    %66 = arith.mulf %64, %28 : vector<8x32xf32>
    %67 = arith.addf %65, %66 : vector<8x32xf32>
    %68 = arith.truncf %67 : vector<8x32xf32> to vector<8x32xbf16>
    %cst_21 = arith.constant dense<0.000000e+00> : vector<8x8xf32>
    %69 = tpu.matmul %68, %45, %cst_21 {dimension_numbers = #tpu.dot_dimension_numbers<[1], [1], [0], [0], [0, 0, 1, 0], [], []>} : vector<8x32xbf16>, vector<8x32xbf16>, vector<8x8xf32> -> vector<8x8xf32>
    %cst_22 = arith.constant 0.176776692 : f32
    %70 = vector.broadcast %cst_22 : f32 to vector<8x8xf32>
    %71 = arith.mulf %69, %70 : vector<8x8xf32>
    %72 = arith.addf %71, %34 : vector<8x8xf32>
    %cst_23 = arith.constant dense<0xFF800000> : vector<8xf32>
    %73 = vector.multi_reduction <maximumf>, %72, %cst_23 [1] : vector<8x8xf32> to vector<8xf32>
    %74 = vector.shape_cast %73 : vector<8xf32> to vector<8x1xf32>
    %75 = vector.broadcast %74 : vector<8x1xf32> to vector<8x8xf32>
    %76 = arith.subf %72, %75 : vector<8x8xf32>
    %77 = math.exp %76 : vector<8x8xf32>
    %cst_24 = arith.constant dense<0.000000e+00> : vector<8xf32>
    %78 = vector.multi_reduction <add>, %77, %cst_24 [1] : vector<8x8xf32> to vector<8xf32>
    %79 = vector.shape_cast %78 : vector<8xf32> to vector<8x1xf32>
    %80 = vector.broadcast %79 : vector<8x1xf32> to vector<8x8xf32>
    %81 = arith.divf %77, %80 : vector<8x8xf32>
    %82 = arith.truncf %81 : vector<8x8xf32> to vector<8x8xbf16>
    %cst_25 = arith.constant dense<0.000000e+00> : vector<8x32xf32>
    %83 = tpu.matmul %82, %46, %cst_25 {dimension_numbers = #tpu.dot_dimension_numbers<[1], [0], [0], [1], [0, 0, 1, 1], [], []>} : vector<8x8xbf16>, vector<8x32xbf16>, vector<8x32xf32> -> vector<8x32xf32>
    %84 = vector.extract_strided_slice %24 {offsets = [0, 32], sizes = [8, 32], strides = [1, 1]} : vector<8x128xf32> to vector<8x32xf32>
    %85 = vector.extract_strided_slice %84 {offsets = [0, 16], sizes = [8, 16], strides = [1, 1]} : vector<8x32xf32> to vector<8x16xf32>
    %cst_26 = arith.constant 0.000000e+00 : f32
    %86 = vector.broadcast %cst_26 : f32 to vector<8x16xf32>
    %87 = arith.subf %86, %85 : vector<8x16xf32>
    %88 = vector.extract_strided_slice %84 {offsets = [0, 0], sizes = [8, 16], strides = [1, 1]} : vector<8x32xf32> to vector<8x16xf32>
    %89 = tpu.concatenate %87, %88 in 1 : vector<8x16xf32>, vector<8x16xf32> -> vector<8x32xf32>
    %90 = arith.mulf %84, %27 : vector<8x32xf32>
    %91 = arith.mulf %89, %28 : vector<8x32xf32>
    %92 = arith.addf %90, %91 : vector<8x32xf32>
    %93 = arith.truncf %92 : vector<8x32xf32> to vector<8x32xbf16>
    %cst_27 = arith.constant dense<0.000000e+00> : vector<8x8xf32>
    %94 = tpu.matmul %93, %45, %cst_27 {dimension_numbers = #tpu.dot_dimension_numbers<[1], [1], [0], [0], [0, 0, 1, 0], [], []>} : vector<8x32xbf16>, vector<8x32xbf16>, vector<8x8xf32> -> vector<8x8xf32>
    %cst_28 = arith.constant 0.176776692 : f32
    %95 = vector.broadcast %cst_28 : f32 to vector<8x8xf32>
    %96 = arith.mulf %94, %95 : vector<8x8xf32>
    %97 = arith.addf %96, %34 : vector<8x8xf32>
    %cst_29 = arith.constant dense<0xFF800000> : vector<8xf32>
    %98 = vector.multi_reduction <maximumf>, %97, %cst_29 [1] : vector<8x8xf32> to vector<8xf32>
    %99 = vector.shape_cast %98 : vector<8xf32> to vector<8x1xf32>
    %100 = vector.broadcast %99 : vector<8x1xf32> to vector<8x8xf32>
    %101 = arith.subf %97, %100 : vector<8x8xf32>
    %102 = math.exp %101 : vector<8x8xf32>
    %cst_30 = arith.constant dense<0.000000e+00> : vector<8xf32>
    %103 = vector.multi_reduction <add>, %102, %cst_30 [1] : vector<8x8xf32> to vector<8xf32>
    %104 = vector.shape_cast %103 : vector<8xf32> to vector<8x1xf32>
    %105 = vector.broadcast %104 : vector<8x1xf32> to vector<8x8xf32>
    %106 = arith.divf %102, %105 : vector<8x8xf32>
    %107 = arith.truncf %106 : vector<8x8xf32> to vector<8x8xbf16>
    %cst_31 = arith.constant dense<0.000000e+00> : vector<8x32xf32>
    %108 = tpu.matmul %107, %46, %cst_31 {dimension_numbers = #tpu.dot_dimension_numbers<[1], [0], [0], [1], [0, 0, 1, 1], [], []>} : vector<8x8xbf16>, vector<8x32xbf16>, vector<8x32xf32> -> vector<8x32xf32>
    %109 = vector.extract_strided_slice %24 {offsets = [0, 64], sizes = [8, 32], strides = [1, 1]} : vector<8x128xf32> to vector<8x32xf32>
    %110 = vector.extract_strided_slice %109 {offsets = [0, 16], sizes = [8, 16], strides = [1, 1]} : vector<8x32xf32> to vector<8x16xf32>
    %cst_32 = arith.constant 0.000000e+00 : f32
    %111 = vector.broadcast %cst_32 : f32 to vector<8x16xf32>
    %112 = arith.subf %111, %110 : vector<8x16xf32>
    %113 = vector.extract_strided_slice %109 {offsets = [0, 0], sizes = [8, 16], strides = [1, 1]} : vector<8x32xf32> to vector<8x16xf32>
    %114 = tpu.concatenate %112, %113 in 1 : vector<8x16xf32>, vector<8x16xf32> -> vector<8x32xf32>
    %115 = arith.mulf %109, %27 : vector<8x32xf32>
    %116 = arith.mulf %114, %28 : vector<8x32xf32>
    %117 = arith.addf %115, %116 : vector<8x32xf32>
    %118 = arith.truncf %117 : vector<8x32xf32> to vector<8x32xbf16>
    %cst_33 = arith.constant dense<0.000000e+00> : vector<8x8xf32>
    %119 = tpu.matmul %118, %57, %cst_33 {dimension_numbers = #tpu.dot_dimension_numbers<[1], [1], [0], [0], [0, 0, 1, 0], [], []>} : vector<8x32xbf16>, vector<8x32xbf16>, vector<8x8xf32> -> vector<8x8xf32>
    %cst_34 = arith.constant 0.176776692 : f32
    %120 = vector.broadcast %cst_34 : f32 to vector<8x8xf32>
    %121 = arith.mulf %119, %120 : vector<8x8xf32>
    %122 = arith.addf %121, %34 : vector<8x8xf32>
    %cst_35 = arith.constant dense<0xFF800000> : vector<8xf32>
    %123 = vector.multi_reduction <maximumf>, %122, %cst_35 [1] : vector<8x8xf32> to vector<8xf32>
    %124 = vector.shape_cast %123 : vector<8xf32> to vector<8x1xf32>
    %125 = vector.broadcast %124 : vector<8x1xf32> to vector<8x8xf32>
    %126 = arith.subf %122, %125 : vector<8x8xf32>
    %127 = math.exp %126 : vector<8x8xf32>
    %cst_36 = arith.constant dense<0.000000e+00> : vector<8xf32>
    %128 = vector.multi_reduction <add>, %127, %cst_36 [1] : vector<8x8xf32> to vector<8xf32>
    %129 = vector.shape_cast %128 : vector<8xf32> to vector<8x1xf32>
    %130 = vector.broadcast %129 : vector<8x1xf32> to vector<8x8xf32>
    %131 = arith.divf %127, %130 : vector<8x8xf32>
    %132 = arith.truncf %131 : vector<8x8xf32> to vector<8x8xbf16>
    %cst_37 = arith.constant dense<0.000000e+00> : vector<8x32xf32>
    %133 = tpu.matmul %132, %58, %cst_37 {dimension_numbers = #tpu.dot_dimension_numbers<[1], [0], [0], [1], [0, 0, 1, 1], [], []>} : vector<8x8xbf16>, vector<8x32xbf16>, vector<8x32xf32> -> vector<8x32xf32>
    %134 = vector.extract_strided_slice %24 {offsets = [0, 96], sizes = [8, 32], strides = [1, 1]} : vector<8x128xf32> to vector<8x32xf32>
    %135 = vector.extract_strided_slice %134 {offsets = [0, 16], sizes = [8, 16], strides = [1, 1]} : vector<8x32xf32> to vector<8x16xf32>
    %cst_38 = arith.constant 0.000000e+00 : f32
    %136 = vector.broadcast %cst_38 : f32 to vector<8x16xf32>
    %137 = arith.subf %136, %135 : vector<8x16xf32>
    %138 = vector.extract_strided_slice %134 {offsets = [0, 0], sizes = [8, 16], strides = [1, 1]} : vector<8x32xf32> to vector<8x16xf32>
    %139 = tpu.concatenate %137, %138 in 1 : vector<8x16xf32>, vector<8x16xf32> -> vector<8x32xf32>
    %140 = arith.mulf %134, %27 : vector<8x32xf32>
    %141 = arith.mulf %139, %28 : vector<8x32xf32>
    %142 = arith.addf %140, %141 : vector<8x32xf32>
    %143 = arith.truncf %142 : vector<8x32xf32> to vector<8x32xbf16>
    %cst_39 = arith.constant dense<0.000000e+00> : vector<8x8xf32>
    %144 = tpu.matmul %143, %57, %cst_39 {dimension_numbers = #tpu.dot_dimension_numbers<[1], [1], [0], [0], [0, 0, 1, 0], [], []>} : vector<8x32xbf16>, vector<8x32xbf16>, vector<8x8xf32> -> vector<8x8xf32>
    %cst_40 = arith.constant 0.176776692 : f32
    %145 = vector.broadcast %cst_40 : f32 to vector<8x8xf32>
    %146 = arith.mulf %144, %145 : vector<8x8xf32>
    %147 = arith.addf %146, %34 : vector<8x8xf32>
    %cst_41 = arith.constant dense<0xFF800000> : vector<8xf32>
    %148 = vector.multi_reduction <maximumf>, %147, %cst_41 [1] : vector<8x8xf32> to vector<8xf32>
    %149 = vector.shape_cast %148 : vector<8xf32> to vector<8x1xf32>
    %150 = vector.broadcast %149 : vector<8x1xf32> to vector<8x8xf32>
    %151 = arith.subf %147, %150 : vector<8x8xf32>
    %152 = math.exp %151 : vector<8x8xf32>
    %cst_42 = arith.constant dense<0.000000e+00> : vector<8xf32>
    %153 = vector.multi_reduction <add>, %152, %cst_42 [1] : vector<8x8xf32> to vector<8xf32>
    %154 = vector.shape_cast %153 : vector<8xf32> to vector<8x1xf32>
    %155 = vector.broadcast %154 : vector<8x1xf32> to vector<8x8xf32>
    %156 = arith.divf %152, %155 : vector<8x8xf32>
    %157 = arith.truncf %156 : vector<8x8xf32> to vector<8x8xbf16>
    %cst_43 = arith.constant dense<0.000000e+00> : vector<8x32xf32>
    %158 = tpu.matmul %157, %58, %cst_43 {dimension_numbers = #tpu.dot_dimension_numbers<[1], [0], [0], [1], [0, 0, 1, 1], [], []>} : vector<8x8xbf16>, vector<8x32xbf16>, vector<8x32xf32> -> vector<8x32xf32>
    %159 = tpu.concatenate %83, %108, %133, %158 in 1 : vector<8x32xf32>, vector<8x32xf32>, vector<8x32xf32>, vector<8x32xf32> -> vector<8x128xf32>
    %c0_44 = arith.constant 0 : index
    %c0_45 = arith.constant 0 : index
    %c0_46 = arith.constant 0 : index
    %160 = vector.load %arg6[%c0_44, %c0_45, %c0_46] : memref<1x128x128xbf16, #tpu.memory_space<vmem>>, vector<1x128x128xbf16>
    %161 = vector.shape_cast %160 : vector<1x128x128xbf16> to vector<128x128xbf16>
    %162 = arith.truncf %159 : vector<8x128xf32> to vector<8x128xbf16>
    %cst_47 = arith.constant dense<0.000000e+00> : vector<8x128xf32>
    %163 = tpu.matmul %162, %161, %cst_47 {dimension_numbers = #tpu.dot_dimension_numbers<[1], [0], [0], [1], [0, 0, 1, 1], [], []>} : vector<8x128xbf16>, vector<128x128xbf16>, vector<8x128xf32> -> vector<8x128xf32>
    %164 = arith.addf %3, %163 : vector<8x128xf32>
    %c0_48 = arith.constant 0 : index
    %c0_49 = arith.constant 0 : index
    %c0_50 = arith.constant 0 : index
    %165 = vector.load %arg7[%c0_48, %c0_49, %c0_50] : memref<1x1x128xf32, #tpu.memory_space<vmem>>, vector<1x1x128xf32>
    %166 = vector.shape_cast %165 : vector<1x1x128xf32> to vector<1x128xf32>
    %167 = arith.mulf %164, %164 : vector<8x128xf32>
    %cst_51 = arith.constant dense<0.000000e+00> : vector<8xf32>
    %168 = vector.multi_reduction <add>, %167, %cst_51 [1] : vector<8x128xf32> to vector<8xf32>
    %169 = vector.shape_cast %168 : vector<8xf32> to vector<8x1xf32>
    %cst_52 = arith.constant 1.280000e+02 : f32
    %170 = vector.broadcast %cst_52 : f32 to vector<8x1xf32>
    %171 = arith.divf %169, %170 : vector<8x1xf32>
    %cst_53 = arith.constant 9.99999997E-7 : f32
    %172 = vector.broadcast %cst_53 : f32 to vector<8x1xf32>
    %173 = arith.addf %171, %172 : vector<8x1xf32>
    %174 = math.rsqrt %173 : vector<8x1xf32>
    %175 = vector.broadcast %174 : vector<8x1xf32> to vector<8x128xf32>
    %176 = arith.mulf %164, %175 : vector<8x128xf32>
    %cst_54 = arith.constant 1.000000e+00 : f32
    %177 = vector.broadcast %cst_54 : f32 to vector<1x128xf32>
    %178 = arith.addf %177, %166 : vector<1x128xf32>
    %179 = vector.broadcast %178 : vector<1x128xf32> to vector<8x128xf32>
    %180 = arith.mulf %176, %179 : vector<8x128xf32>
    %c0_55 = arith.constant 0 : index
    %c0_56 = arith.constant 0 : index
    %c0_57 = arith.constant 0 : index
    %181 = vector.load %arg8[%c0_55, %c0_56, %c0_57] : memref<1x128x512xbf16, #tpu.memory_space<vmem>>, vector<1x128x512xbf16>
    %182 = vector.shape_cast %181 : vector<1x128x512xbf16> to vector<128x512xbf16>
    %183 = arith.truncf %180 : vector<8x128xf32> to vector<8x128xbf16>
    %cst_58 = arith.constant dense<0.000000e+00> : vector<8x512xf32>
    %184 = tpu.matmul %183, %182, %cst_58 {dimension_numbers = #tpu.dot_dimension_numbers<[1], [0], [0], [1], [0, 0, 1, 1], [], []>} : vector<8x128xbf16>, vector<128x512xbf16>, vector<8x512xf32> -> vector<8x512xf32>
    %185 = vector.extract_strided_slice %184 {offsets = [0, 0], sizes = [8, 256], strides = [1, 1]} : vector<8x512xf32> to vector<8x256xf32>
    %cst_59 = arith.constant 5.000000e-01 : f32
    %186 = vector.broadcast %cst_59 : f32 to vector<8x256xf32>
    %187 = arith.mulf %186, %185 : vector<8x256xf32>
    %cst_60 = arith.constant 4.471500e-02 : f32
    %188 = vector.broadcast %cst_60 : f32 to vector<8x256xf32>
    %189 = arith.mulf %188, %185 : vector<8x256xf32>
    %190 = arith.mulf %189, %185 : vector<8x256xf32>
    %191 = arith.mulf %190, %185 : vector<8x256xf32>
    %192 = arith.addf %185, %191 : vector<8x256xf32>
    %cst_61 = arith.constant 0.797884583 : f32
    %193 = vector.broadcast %cst_61 : f32 to vector<8x256xf32>
    %194 = arith.mulf %193, %192 : vector<8x256xf32>
    %195 = math.tanh %194 : vector<8x256xf32>
    %cst_62 = arith.constant 1.000000e+00 : f32
    %196 = vector.broadcast %cst_62 : f32 to vector<8x256xf32>
    %197 = arith.addf %196, %195 : vector<8x256xf32>
    %198 = arith.mulf %187, %197 : vector<8x256xf32>
    %199 = vector.extract_strided_slice %184 {offsets = [0, 256], sizes = [8, 256], strides = [1, 1]} : vector<8x512xf32> to vector<8x256xf32>
    %200 = arith.mulf %198, %199 : vector<8x256xf32>
    %c0_63 = arith.constant 0 : index
    %c0_64 = arith.constant 0 : index
    %c0_65 = arith.constant 0 : index
    %201 = vector.load %arg9[%c0_63, %c0_64, %c0_65] : memref<1x256x128xbf16, #tpu.memory_space<vmem>>, vector<1x256x128xbf16>
    %202 = vector.shape_cast %201 : vector<1x256x128xbf16> to vector<256x128xbf16>
    %203 = arith.truncf %200 : vector<8x256xf32> to vector<8x256xbf16>
    %cst_66 = arith.constant dense<0.000000e+00> : vector<8x128xf32>
    %204 = tpu.matmul %203, %202, %cst_66 {dimension_numbers = #tpu.dot_dimension_numbers<[1], [0], [0], [1], [0, 0, 1, 1], [], []>} : vector<8x256xbf16>, vector<256x128xbf16>, vector<8x128xf32> -> vector<8x128xf32>
    %205 = arith.addf %164, %204 : vector<8x128xf32>
    %c0_67 = arith.constant 0 : index
    %c0_68 = arith.constant 0 : index
    %206 = vector.load %arg12[%c0_67, %c0_68] : memref<8x128xf32, #tpu.memory_space<vmem>>, vector<8x128xf32>
    tpu.vector_store %arg12[%c0_67, %c0_68], %205 {strides = array<i32>} : memref<8x128xf32, #tpu.memory_space<vmem>>, vector<8x128xf32>,
    %c1_i32 = arith.constant 1 : i32
    %207 = arith.cmpi eq, %arg0, %c1_i32 : i32
    %208 = arith.extui %207 : i1 to i32
    %c0_i32_69 = arith.constant 0 : i32
    %209 = arith.cmpi ne, %208, %c0_i32_69 : i32
    scf.if %209 {
      %c0_70 = arith.constant 0 : index
      %c0_71 = arith.constant 0 : index
      %210 = vector.load %arg10[%c0_70, %c0_71] : memref<1x128xf32, #tpu.memory_space<vmem>>, vector<1x128xf32>
      %211 = arith.mulf %205, %205 : vector<8x128xf32>
      %cst_72 = arith.constant dense<0.000000e+00> : vector<8xf32>
      %212 = vector.multi_reduction <add>, %211, %cst_72 [1] : vector<8x128xf32> to vector<8xf32>
      %213 = vector.shape_cast %212 : vector<8xf32> to vector<8x1xf32>
      %cst_73 = arith.constant 1.280000e+02 : f32
      %214 = vector.broadcast %cst_73 : f32 to vector<8x1xf32>
      %215 = arith.divf %213, %214 : vector<8x1xf32>
      %cst_74 = arith.constant 9.99999997E-7 : f32
      %216 = vector.broadcast %cst_74 : f32 to vector<8x1xf32>
      %217 = arith.addf %215, %216 : vector<8x1xf32>
      %218 = math.rsqrt %217 : vector<8x1xf32>
      %219 = vector.broadcast %218 : vector<8x1xf32> to vector<8x128xf32>
      %220 = arith.mulf %205, %219 : vector<8x128xf32>
      %cst_75 = arith.constant 1.000000e+00 : f32
      %221 = vector.broadcast %cst_75 : f32 to vector<1x128xf32>
      %222 = arith.addf %221, %210 : vector<1x128xf32>
      %223 = vector.broadcast %222 : vector<1x128xf32> to vector<8x128xf32>
      %224 = arith.mulf %220, %223 : vector<8x128xf32>
      %c0_76 = arith.constant 0 : index
      %c0_77 = arith.constant 0 : index
      %225 = vector.load %arg11[%c0_76, %c0_77] : memref<8x128xf32, #tpu.memory_space<vmem>>, vector<8x128xf32>
      tpu.vector_store %arg11[%c0_76, %c0_77], %224 {strides = array<i32>} : memref<8x128xf32, #tpu.memory_space<vmem>>, vector<8x128xf32>,
    } else {
    }
    return
  }
  func.func @transform_0(%arg0: i32) -> (i32, i32) {
    %c0_i32 = arith.constant 0 : i32
    %c0_i32_0 = arith.constant 0 : i32
    %c0_i32_1 = arith.constant 0 : i32
    return %c0_i32, %c0_i32_0 : i32, i32
  }
  func.func @transform_1(%arg0: i32) -> (i32, i32) {
    %c0_i32 = arith.constant 0 : i32
    %c0_i32_0 = arith.constant 0 : i32
    %c0_i32_1 = arith.constant 0 : i32
    return %c0_i32, %c0_i32_0 : i32, i32
  }
  func.func @transform_2(%arg0: i32) -> (i32, i32) {
    %c0_i32 = arith.constant 0 : i32
    %c0_i32_0 = arith.constant 0 : i32
    %c0_i32_1 = arith.constant 0 : i32
    return %c0_i32, %c0_i32_0 : i32, i32
  }
  func.func @transform_3(%arg0: i32) -> (i32, i32, i32) {
    %c0_i32 = arith.constant 0 : i32
    %c0_i32_0 = arith.constant 0 : i32
    %c0_i32_1 = arith.constant 0 : i32
    return %arg0, %c0_i32, %c0_i32_0 : i32, i32, i32
  }
  func.func @transform_4(%arg0: i32) -> (i32, i32, i32) {
    %c0_i32 = arith.constant 0 : i32
    %c0_i32_0 = arith.constant 0 : i32
    %c0_i32_1 = arith.constant 0 : i32
    return %arg0, %c0_i32, %c0_i32_0 : i32, i32, i32
  }
  func.func @transform_5(%arg0: i32) -> (i32, i32, i32) {
    %c0_i32 = arith.constant 0 : i32
    %c0_i32_0 = arith.constant 0 : i32
    %c0_i32_1 = arith.constant 0 : i32
    return %arg0, %c0_i32, %c0_i32_0 : i32, i32, i32
  }
  func.func @transform_6(%arg0: i32) -> (i32, i32, i32) {
    %c0_i32 = arith.constant 0 : i32
    %c0_i32_0 = arith.constant 0 : i32
    %c0_i32_1 = arith.constant 0 : i32
    return %arg0, %c0_i32, %c0_i32_0 : i32, i32, i32
  }
  func.func @transform_7(%arg0: i32) -> (i32, i32, i32) {
    %c0_i32 = arith.constant 0 : i32
    %c0_i32_0 = arith.constant 0 : i32
    %c0_i32_1 = arith.constant 0 : i32
    return %arg0, %c0_i32, %c0_i32_0 : i32, i32, i32
  }
  func.func @transform_8(%arg0: i32) -> (i32, i32, i32) {
    %c0_i32 = arith.constant 0 : i32
    %c0_i32_0 = arith.constant 0 : i32
    %c0_i32_1 = arith.constant 0 : i32
    return %arg0, %c0_i32, %c0_i32_0 : i32, i32, i32
  }
  func.func @transform_9(%arg0: i32) -> (i32, i32) {
    %c0_i32 = arith.constant 0 : i32
    %c0_i32_0 = arith.constant 0 : i32
    %c0_i32_1 = arith.constant 0 : i32
    return %c0_i32, %c0_i32_0 : i32, i32
  }
  func.func @transform_10(%arg0: i32) -> (i32, i32) {
    %c0_i32 = arith.constant 0 : i32
    %c0_i32_0 = arith.constant 0 : i32
    %c0_i32_1 = arith.constant 0 : i32
    return %c0_i32, %c0_i32_0 : i32, i32
  }
}

</mosaic_0001>

<bundles_post_ra>
// kernel: paligemma_forward.3
= control target key start
LH: loop header
LB: loop body
LE: loop exit
PB: predicated region body
PF: predicated region fallthrough
CT: control target
= control target key end

     0   :  { %s3755_s0 = inlined_call_operand.hbm [shape: bf16[8,128], index: 0, kind: input, shape index: {}]   ;;  %s3756_s1 = inlined_call_operand.hbm [shape: f32[8,32], index: 1, kind: input, shape index: {}]   ;;  %s3757_s2 = inlined_call_operand.hbm [shape: f32[8,32], index: 2, kind: input, shape index: {}]   ;;  %s3758_s3 = inlined_call_operand.hbm [shape: f32[2,1,128], index: 3, kind: input, shape index: {}]   ;;  %s3759_s4 = inlined_call_operand.hbm [shape: bf16[2,128,256], index: 4, kind: input, shape index: {}]   ;;  %s3760_s5 = inlined_call_operand.hbm [shape: bf16[2,128,128], index: 5, kind: input, shape index: {}]   ;;  %s3761_s6 = inlined_call_operand.hbm [shape: f32[2,1,128], index: 6, kind: input, shape index: {}]   ;;  %s3762_s7 = inlined_call_operand.hbm [shape: bf16[2,128,512], index: 7, kind: input, shape index: {}]   ;;  %s3763_s8 = inlined_call_operand.hbm [shape: bf16[2,256,128], index: 8, kind: input, shape index: {}]   ;;  %s3764_s9 = inlined_call_operand.hbm [shape: f32[1,128], index: 9, kind: input, shape index: {}]   ;;  %s3765_s10 = inlined_call_operand.hbm [shape: f32[8,128], index: 10, kind: output, shape index: {}]  }
   0x1   :  { %3789 = sst [smem:[#allocation33_spill]] %s3756_s1 }
   0x2   :  { %3790 = sst [smem:[#allocation34_spill]] %s3758_s3 }
   0x3   :  { %3791 = sst [smem:[#allocation35_spill]] %s3760_s5 }
   0x4   :  { %3792 = sst [smem:[#allocation36_spill]] %s3762_s7 }
   0x5   :  { %3793 = sst [smem:[#allocation37_spill]] %s3765_s10 }
   0x6   :  { %15 = vsyncpa [#allocation4], 0 }
   0x7   :  { %16 = vsyncpa [#allocation7], 0 }
   0x8   :  { %17 = vsyncpa [#allocation10], 0 }
   0x9   :  { %19 = vsyncpa [#allocation10 + $0x1], 0 }
   0xa   :  { %20 = vsyncpa [#allocation13], 0 }
   0xb   :  { %22 = vsyncpa [#allocation13 + $0x1], 0 }
   0xc   :  { %23 = vsyncpa [#allocation16], 0 }
   0xd   :  { %25 = vsyncpa [#allocation16 + $0x1], 0 }
   0xe   :  { %26 = vsyncpa [#allocation19], 0 }
   0xf   :  { %27 = vsyncpa [#allocation5], 0  ;;  %s3073_s13 = smov 0   ;;  %s3075_s14 = smov 0  }
  0x10   :  { %s3077_s15 = smov 0   ;;  %s3079_s16 = smov 0  }
  0x11 LB: > { %3794 = sst [smem:[#allocation28_spill]] %s2980_s14  ;;  %s3092_s17 = sadd.s32 4294967295, %s2988_s16   ;;  %s2988_s16 = sphi %s3079_s16, %s3834_s16   ;;  %s2984_s15 = sphi %s3077_s15, %s3837_s15   ;;  %s2980_s14 = sphi %s3075_s14, %s3836_s14   ;;  %s2976_s13 = sphi %s3073_s13, %s3835_s13  }
  0x12   : > { %3795 = sst [smem:[#allocation29_spill]] %s2984_s15  ;;  %p116_p0 = scmp.ne.s32.totalorder %s2980_s14, %s2976_s13 }
  0x13   : > { %p3766_p1 = scmp.eq.s32.totalorder %s3092_s17, 0  ;;  %p2127_p2 = scmp.ge.s32.totalorder %s2988_s16, 1 }
  0x14   : > { %p299_p3 = scmp.lt.s32.totalorder %s2988_s16, 3  ;;  %s2990_s20 = smov [#allocation6]  }
  0x15   : > { %p3101_p5 = por %p3766_p1, %p116_p0  ;;  %s323_s21 = sshll.u32 %s2990_s20, 4  ;;  %s324_s21 = int_to_ptr.vmem [resolvable:$true] %s323_s21 }
  0x16   : > { %p3105_p6 = pnand %p2127_p2, %p299_p3  ;;  %s3112_s22 = sadd.s32 1, %s2988_s16  }
  0x17   : > { %s3796_s18 = scalar_select %p3101_p5, 1, 0 }
  0x18   : > { %s3798_s19 = scalar_select %p3105_p6, 1, 0 }
  0x19   : > { %3797 = sst [smem:[#allocation30_spill]] %s3796_s18  ;;  %p2393_p7 = pneg %p3105_p6 }
  0x1a   : > { %3799 = sst [smem:[#allocation31_spill]] %s3112_s22  ;;  %s100_s24 = ssub.s32 %s2988_s16, %s3112_s22 }
  0x1b   : > { %p3116_p8 = pnand %p2393_p7, %p3766_p1  ;;  %p3122_p9 = scmp.eq.s32.totalorder %s100_s24, 0 }
  0x1c   : > { %s103_s26 = sadd.s32 1, %s2984_s15  ;;  %s3802_s1 = sld [smem:[#allocation33_spill]] }
  0x1d   : > { %s3800_s23 = scalar_select %p3116_p8, 1, 0 }
  0x1e   : > { %s3801_s25 = scalar_select %p3122_p9, 1, 0 }
  0x1f   : > { %p3137_p12 = pneg %p3116_p8 }
  0x21   : > { %s3803_s12 = scalar_select %p3137_p12, 1, 0 }
  0x22   : > { %s2612_s29 = scalar_lea.hbm %s3802_s1, 128 }
  0x23   : > { %p2613_p11 = scmp.ne.s32.totalorder %s3802_s1, %s2612_s29  ;;  %p2619_p2 = scmp.lt.u32.totalorder %s2612_s29, %s3802_s1 }
  0x25   : > { %p2615_p13 = pnand %p3137_p12, %p2613_p11 }
  0x27   : > { %p2616_p0 = pneg %p2615_p13 }
  0x29   : > { %p2621_p3 = pnand %p2619_p2, %p2616_p0 }
  0x2b   : > { %2624 = shalt.err (!%p2621_p3)
}
  0x2c   : > { %s2625_s24 = scalar_lea.vmem %s324_s21, 128  ;;  %p2633_p10 = scmp.lt.s32.totalorder %s324_s21, %s324_s21 }
  0x2d   : > { %p2626_p7 = scmp.ne.s32.totalorder %s324_s21, %s2625_s24  ;;  %p2634_p5 = scmp.lt.s32.totalorder %s2625_s24, %s2625_s24 }
  0x2f   : > { %p2628_p4 = pnand %p2626_p7, %p3137_p12  ;;  %p2635_p6 = por %p2634_p5, %p2633_p10 }
  0x31   : > { %p2629_p1 = pneg %p2628_p4 }
  0x33   : > { %p2636_p9 = pnand %p2635_p6, %p2629_p1 }
  0x35   : > { %2639 = shalt.err (!%p2636_p9)
}
  0x36   : > { %2399 = dma.hbm_to_vmem [thread:$0]  (!%p3116_p8), %s3802_s1, 128, %s324_s21, [#allocation7]  }
  0x37   : > { %p3804_p4 = scmp.ne.s32.totalorder %s3801_s25, 0  ;;  %p111_p1 = scmp.eq.s32.totalorder %s2988_s16, 0 }
  0x38   : > { %p2429_p5 = scmp.lt.s32.totalorder %s2988_s16, 2  ;;  %s3161_s30 = sand.u32 1, %s2988_s16  }
  0x39   : > { %s3156_s29 = scalar_select %p3804_p4, %s2984_s15, %s103_s26  }
  0x3a   : > { %s3164_s11 = sand.u32 1, %s2984_s15   ;;  %p3806_p6 = scmp.ne.s32.totalorder %s2984_s15, %s2980_s14 }
  0x3b   : > { %3805 = sst [smem:[#allocation32_spill]] %s3156_s29  ;;  %s2133_s13 = sshll.u32 %s2988_s16, 4 }
  0x3c   : > { %p112_p9 = por %p111_p1, %p3806_p6  ;;  %s3807_s3 = sld [smem:[#allocation34_spill]] }
  0x3d   : > { %s359_s21 = scalar_lea.vmem [#allocation9], %s3164_s11  ;;  %s3185_s29 = scalar_lea.hbm %s3761_s6, %s2133_s13 }
  0x3e   : > { %s366_s25 = sshll.u32 %s359_s21, 4  ;;  %p3178_p10 = pnand %p2429_p5, %p112_p9  ;;  %s3176_s25 = int_to_ptr.vmem [resolvable:$true] %s366_s25 }
  0x3f   : > { %s3779_s20 = scalar_lea.sflag [#allocation10], %s3161_s30 }
  0x40   : > { %s3808_s26 = scalar_select %p3178_p10, 1, 0 }
  0x41   : > { %p3192_p13 = pneg %p3178_p10 }
  0x42   : > { %s3173_s27 = scalar_lea.hbm %s3807_s3, %s2133_s13  ;;  %s2645_s10 = scalar_lea.hbm %s3807_s3, 32 }
  0x43   : > { %s2640_s24 = scalar_lea.hbm %s3173_s27, 16  ;;  %p2646_p3 = scmp.lt.u32.totalorder %s3173_s27, %s3807_s3 }
  0x44   : > { %p2641_p11 = scmp.ne.s32.totalorder %s3173_s27, %s2640_s24  ;;  %p2647_p7 = scmp.lt.u32.totalorder %s2645_s10, %s2640_s24 }
  0x45   : > { %s3809_s15 = scalar_select %p3192_p13, 1, 0 }
  0x46   : > { %p2643_p0 = pnand %p3192_p13, %p2641_p11  ;;  %p2648_p4 = por %p2647_p7, %p2646_p3 }
  0x47   : > { %p2649_p1 = scmp.lt.u32.totalorder %s2640_s24, %s3173_s27 }
  0x48   : > { %p2644_p2 = pneg %p2643_p0 }
  0x49   : > { %p2650_p5 = por %p2649_p1, %p2648_p4 }
  0x4b   : > { %p2651_p6 = pnand %p2650_p5, %p2644_p2 }
  0x4d   : > { %2654 = shalt.err (!%p2651_p6)
}
  0x4e   : > { %s2655_s13 = scalar_lea.vmem %s3176_s25, 16  ;;  %s2991_s22 = smov [#allocation9]  }
  0x4f   : > { %p2656_p9 = scmp.ne.s32.totalorder %s3176_s25, %s2655_s13  ;;  %s2660_s21 = sshll.u32 %s2991_s22, 4  ;;  %s2661_s21 = int_to_ptr.vmem [resolvable:$false] %s2660_s21 }
  0x50   : > { %s2662_s1 = scalar_lea.vmem %s2661_s21, 32  ;;  %p2663_p8 = scmp.lt.s32.totalorder %s3176_s25, %s2661_s21 }
  0x51   : > { %p2658_p11 = pnand %p2656_p9, %p3192_p13  ;;  %p2664_p12 = scmp.lt.s32.totalorder %s2662_s1, %s2655_s13 }
  0x53   : > { %p2659_p0 = pneg %p2658_p11  ;;  %p2665_p3 = por %p2664_p12, %p2663_p8 }
  0x55   : > { %p2666_p7 = pnand %p2665_p3, %p2659_p0 }
  0x57   : > { %2669 = shalt.err (!%p2666_p7)
}
  0x58   : > { %2409 = dma.hbm_to_vmem [thread:$0]  (!%p3178_p10), %s3173_s27, 16, %s3176_s25, %s3779_s20  }
  0x59   : > { %s2137_s10 = sshll.u32 %s3164_s11, 6  ;;  %s2243_s24 = sshll.u32 %s2988_s16, 10 }
  0x5a   : > { %s3810_s5 = sld [smem:[#allocation35_spill]]  ;;  %s398_s21 = scalar_lea.vmem [#allocation12], %s2137_s10 }
  0x5b   : > { %s405_s1 = sshll.u32 %s398_s21, 4  ;;  %s3783_s3 = scalar_lea.sflag [#allocation13], %s3161_s30  ;;  %s3224_s1 = int_to_ptr.vmem [resolvable:$true] %s405_s1 }
  0x60   : > { %s3222_s13 = scalar_lea.hbm %s3810_s5, %s2243_s24  ;;  %s2675_s28 = scalar_lea.hbm %s3810_s5, 2048 }
  0x61   : > { %s2670_s18 = scalar_lea.hbm %s3222_s13, 1024  ;;  %p2676_p4 = scmp.lt.u32.totalorder %s3222_s13, %s3810_s5 }
  0x62   : > { %p2671_p8 = scmp.ne.s32.totalorder %s3222_s13, %s2670_s18  ;;  %p2677_p1 = scmp.lt.u32.totalorder %s2675_s28, %s2670_s18 }
  0x63   : > { %p2679_p6 = scmp.lt.u32.totalorder %s2670_s18, %s3222_s13 }
  0x64   : > { %p2673_p12 = pnand %p2671_p8, %p3192_p13  ;;  %p2678_p5 = por %p2677_p1, %p2676_p4 }
  0x66   : > { %p2674_p2 = pneg %p2673_p12  ;;  %p2680_p9 = por %p2679_p6, %p2678_p5 }
  0x68   : > { %p2681_p11 = pnand %p2680_p9, %p2674_p2 }
  0x6a   : > { %2684 = shalt.err (!%p2681_p11)
}
  0x6b   : > { %s2685_s10 = scalar_lea.vmem %s3224_s1, 1024  ;;  %s2992_s21 = smov [#allocation12]  }
  0x6c   : > { %p2686_p0 = scmp.ne.s32.totalorder %s3224_s1, %s2685_s10  ;;  %s2690_s27 = sshll.u32 %s2992_s21, 4  ;;  %s2691_s27 = int_to_ptr.vmem [resolvable:$false] %s2690_s27 }
  0x6d   : > { %s2692_s25 = scalar_lea.vmem %s2691_s27, 2048  ;;  %p2693_p8 = scmp.lt.s32.totalorder %s3224_s1, %s2691_s27 }
  0x6e   : > { %p2688_p3 = pnand %p2686_p0, %p3192_p13  ;;  %p2694_p12 = scmp.lt.s32.totalorder %s2692_s25, %s2685_s10 }
  0x70   : > { %p2689_p7 = pneg %p2688_p3  ;;  %p2695_p4 = por %p2694_p12, %p2693_p8 }
  0x72   : > { %p2696_p1 = pnand %p2695_p4, %p2689_p7 }
  0x74   : > { %2699 = shalt.err (!%p2696_p1)
}
  0x75   : > { %s3781_s18 = smov 64   ;;  %s3782_s28 = smov 4  }
  0x76   : > { %2415 = dma.hbm_to_vmem [thread:$0]  (!%p3178_p10), %s3222_s13, 1024, %s3224_s1, %s3783_s3, %s3781_s18, %s3781_s18, %s3782_s28  }
  0x77   : > { %s2141_s24 = sshll.u32 %s3164_s11, 8  ;;  %s2244_s22 = sshll.u32 %s2988_s16, 12 }
  0x78   : > { %s3811_s7 = sld [smem:[#allocation36_spill]]  ;;  %s436_s25 = scalar_lea.vmem [#allocation15], %s2141_s24 }
  0x79   : > { %s443_s20 = sshll.u32 %s436_s25, 4  ;;  %s3788_s5 = scalar_lea.sflag [#allocation16], %s3161_s30  ;;  %s3260_s20 = int_to_ptr.vmem [resolvable:$true] %s443_s20 }
  0x7e   : > { %s3258_s27 = scalar_lea.hbm %s3811_s7, %s2244_s22  ;;  %s2705_s10 = scalar_lea.hbm %s3811_s7, 8192 }
  0x7f   : > { %s2700_s14 = scalar_lea.hbm %s3258_s27, 4096  ;;  %p2706_p9 = scmp.lt.u32.totalorder %s3258_s27, %s3811_s7 }
  0x80   : > { %p2701_p2 = scmp.ne.s32.totalorder %s3258_s27, %s2700_s14  ;;  %p2707_p11 = scmp.lt.u32.totalorder %s2705_s10, %s2700_s14 }
  0x81   : > { %p2709_p3 = scmp.lt.u32.totalorder %s2700_s14, %s3258_s27 }
  0x82   : > { %p2703_p5 = pnand %p2701_p2, %p3192_p13  ;;  %p2708_p0 = por %p2707_p11, %p2706_p9 }
  0x84   : > { %p2704_p6 = pneg %p2703_p5  ;;  %p2710_p7 = por %p2709_p3, %p2708_p0 }
  0x86   : > { %p2711_p8 = pnand %p2710_p7, %p2704_p6 }
  0x88   : > { %2714 = shalt.err (!%p2711_p8)
}
  0x89   : > { %s2715_s24 = scalar_lea.vmem %s3260_s20, 4096  ;;  %s2995_s25 = smov [#allocation15]  }
  0x8a   : > { %p2716_p12 = scmp.ne.s32.totalorder %s3260_s20, %s2715_s24  ;;  %s2720_s13 = sshll.u32 %s2995_s25, 4  ;;  %s2721_s13 = int_to_ptr.vmem [resolvable:$false] %s2720_s13 }
  0x8b   : > { %s2722_s1 = scalar_lea.vmem %s2721_s13, 8192  ;;  %p2723_p2 = scmp.lt.s32.totalorder %s3260_s20, %s2721_s13 }
  0x8c   : > { %p2718_p4 = pnand %p2716_p12, %p3192_p13  ;;  %p2724_p5 = scmp.lt.s32.totalorder %s2722_s1, %s2715_s24 }
  0x8e   : > { %p2719_p1 = pneg %p2718_p4  ;;  %p2725_p9 = por %p2724_p5, %p2723_p2 }
  0x90   : > { %p2726_p11 = pnand %p2725_p9, %p2719_p1 }
  0x92   : > { %2729 = shalt.err (!%p2726_p11)
}
  0x93   : > { %s2996_s14 = smov 256   ;;  %s2997_s10 = smov 16  }
  0x94   : > { %2421 = dma.hbm_to_vmem [thread:$0]  (!%p3178_p10), %s3258_s27, 4096, %s3260_s20, %s3788_s5, %s2996_s14, %s2996_s14, %s2997_s10  }
  0x95   : > { %s2998_s22 = smov [#allocation3]   ;;  %s2999_s25 = smov [#allocation8]  }
  0x96   : > { %s312_s21 = sshll.u32 %s2998_s22, 4  ;;  %s334_s18 = sshll.u32 %s2999_s25, 4  ;;  %s313_s21 = int_to_ptr.vmem [resolvable:$true] %s312_s21  ;;  %s3286_s18 = int_to_ptr.vmem [resolvable:$true] %s334_s18 }
  0x97   : > { %s2730_s1 = scalar_lea.hbm %s3755_s0, 64  ;;  %p3812_p0 = scmp.ne.s32.totalorder %s3803_s12, 0 }
  0x98   : > { %p2731_p6 = scmp.ne.s32.totalorder %s3755_s0, %s2730_s1  ;;  %p2737_p8 = scmp.lt.u32.totalorder %s2730_s1, %s3755_s0 }
  0x9a   : > { %p2733_p3 = pnand %p2731_p6, %p3812_p0 }
  0x9c   : > { %p2734_p7 = pneg %p2733_p3 }
  0x9e   : > { %p2739_p12 = pnand %p2737_p8, %p2734_p7 }
  0xa0   : > { %2742 = shalt.err (!%p2739_p12)
}
  0xa1   : > { %s2743_s27 = scalar_lea.vmem %s313_s21, 64  ;;  %p2751_p5 = scmp.lt.s32.totalorder %s313_s21, %s313_s21 }
  0xa2   : > { %p2744_p4 = scmp.ne.s32.totalorder %s313_s21, %s2743_s27  ;;  %p2752_p9 = scmp.lt.s32.totalorder %s2743_s27, %s2743_s27 }
  0xa4   : > { %p2746_p1 = pnand %p2744_p4, %p3812_p0  ;;  %p2753_p11 = por %p2752_p9, %p2751_p5 }
  0xa6   : > { %p2747_p2 = pneg %p2746_p1 }
  0xa8   : > { %p2754_p10 = pnand %p2753_p11, %p2747_p2 }
  0xaa   : > { %2757 = shalt.err (!%p2754_p10)
}
  0xab   : > { %p3813_p6 = scmp.ne.s32.totalorder %s3800_s23, 0  ;;  %s2758_s10 = scalar_lea.hbm %s3757_s2, 128 }
  0xac   : > { %p2759_p3 = scmp.ne.s32.totalorder %s3757_s2, %s2758_s10  ;;  %p2765_p10 = scmp.lt.u32.totalorder %s2758_s10, %s3757_s2 }
  0xad   : > { %2396 = dma.hbm_to_vmem [thread:$0]  (!%p3813_p6), %s3755_s0, 64, %s313_s21, [#allocation4]  }
  0xae   : > { %p2761_p7 = pnand %p2759_p3, %p3812_p0 }
  0xb0   : > { %p2762_p8 = pneg %p2761_p7 }
  0xb2   : > { %p2767_p12 = pnand %p2765_p10, %p2762_p8 }
  0xb4   : > { %2770 = shalt.err (!%p2767_p12)
}
  0xb5   : > { %s2771_s21 = scalar_lea.vmem %s3286_s18, 128  ;;  %p2779_p5 = scmp.lt.s32.totalorder %s3286_s18, %s3286_s18 }
  0xb6   : > { %p2772_p4 = scmp.ne.s32.totalorder %s3286_s18, %s2771_s21  ;;  %p2780_p9 = scmp.lt.s32.totalorder %s2771_s21, %s2771_s21 }
  0xb8   : > { %p2774_p1 = pnand %p2772_p4, %p3812_p0  ;;  %p2781_p11 = por %p2780_p9, %p2779_p5 }
  0xba   : > { %p2775_p2 = pneg %p2774_p1 }
  0xbc   : > { %p2782_p3 = pnand %p2781_p11, %p2775_p2 }
  0xbe   : > { %2785 = shalt.err (!%p2782_p3)
}
  0xbf   : > { %2402 = dma.hbm_to_vmem [thread:$0]  (!%p3813_p6), %s3757_s2, 128, %s3286_s18, [#allocation7]  }
  0xc0   : > { %s2134_s27 = sshll.u32 %s3164_s11, 7  ;;  %s3000_s3 = smov [#allocation18]  }
  0xc1   : > { %s345_s28 = sshll.u32 %s3000_s3, 4  ;;  %s2242_s7 = sshll.u32 %s2988_s16, 11  ;;  %s346_s28 = int_to_ptr.vmem [resolvable:$true] %s345_s28 }
  0xc2   : > { %s2786_s22 = scalar_lea.hbm %s3764_s9, 16 }
  0xc3   : > { %p2787_p7 = scmp.ne.s32.totalorder %s3764_s9, %s2786_s22  ;;  %p2793_p12 = scmp.lt.u32.totalorder %s2786_s22, %s3764_s9 }
  0xc5   : > { %p2789_p8 = pnand %p2787_p7, %p3812_p0 }
  0xc7   : > { %p2790_p10 = pneg %p2789_p8 }
  0xc9   : > { %p2795_p4 = pnand %p2793_p12, %p2790_p10 }
  0xcb   : > { %2798 = shalt.err (!%p2795_p4)
}
  0xcc   : > { %s2799_s18 = scalar_lea.vmem %s346_s28, 16  ;;  %s2806_s1 = scalar_lea.vmem %s346_s28, 32 }
  0xcd   : > { %p2800_p1 = scmp.ne.s32.totalorder %s346_s28, %s2799_s18  ;;  %p2807_p9 = scmp.lt.s32.totalorder %s346_s28, %s346_s28 }
  0xce   : > { %p2808_p11 = scmp.lt.s32.totalorder %s2806_s1, %s2799_s18 }
  0xcf   : > { %p2802_p2 = pnand %p2800_p1, %p3812_p0 }
  0xd0   : > { %p2809_p3 = por %p2808_p11, %p2807_p9 }
  0xd1   : > { %p2803_p5 = pneg %p2802_p2 }
  0xd3   : > { %p2810_p13 = pnand %p2809_p3, %p2803_p5 }
  0xd5   : > { %2813 = shalt.err (!%p2810_p13)
}
  0xd6   : > { %2405 = dma.hbm_to_vmem [thread:$0]  (!%p3813_p6), %s3764_s9, 16, %s346_s28, [#allocation19]  }
  0xd7   : > { %s3354_s10 = scalar_lea.hbm %s3759_s4, %s2242_s7  ;;  %s377_s22 = scalar_lea.vmem [#allocation11], %s2134_s27 }
  0xd8   : > { %s384_s23 = sshll.u32 %s377_s22, 4  ;;  %s2814_s25 = scalar_lea.hbm %s3354_s10, 2048  ;;  %s3358_s23 = int_to_ptr.vmem [resolvable:$true] %s384_s23 }
  0xd9   : > { %p2815_p13 = scmp.ne.s32.totalorder %s3354_s10, %s2814_s25  ;;  %p3814_p0 = scmp.ne.s32.totalorder %s3809_s15, 0 }
  0xda   : > { %s2819_s13 = scalar_lea.hbm %s3759_s4, 4096  ;;  %p2820_p8 = scmp.lt.u32.totalorder %s3354_s10, %s3759_s4 }
  0xdb   : > { %p2817_p7 = pnand %p2815_p13, %p3814_p0  ;;  %p2821_p10 = scmp.lt.u32.totalorder %s2819_s13, %s2814_s25 }
  0xdc   : > { %p2823_p4 = scmp.lt.u32.totalorder %s2814_s25, %s3354_s10 }
  0xdd   : > { %p2818_p6 = pneg %p2817_p7  ;;  %p2822_p12 = por %p2821_p10, %p2820_p8 }
  0xdf   : > { %p2824_p1 = por %p2823_p4, %p2822_p12 }
  0xe1   : > { %p2825_p2 = pnand %p2824_p1, %p2818_p6 }
  0xe3   : > { %2828 = shalt.err (!%p2825_p2)
}
  0xe4   : > { %s2829_s1 = scalar_lea.vmem %s3358_s23, 2048  ;;  %s3001_s20 = smov [#allocation11]  }
  0xe5   : > { %p2830_p5 = scmp.ne.s32.totalorder %s3358_s23, %s2829_s1  ;;  %s2834_s3 = sshll.u32 %s3001_s20, 4  ;;  %s2835_s3 = int_to_ptr.vmem [resolvable:$false] %s2834_s3 }
  0xe6   : > { %s2836_s14 = scalar_lea.vmem %s2835_s3, 4096  ;;  %p2837_p3 = scmp.lt.s32.totalorder %s3358_s23, %s2835_s3 }
  0xe7   : > { %p2832_p9 = pnand %p2830_p5, %p3814_p0  ;;  %p2838_p13 = scmp.lt.s32.totalorder %s2836_s14, %s2829_s1 }
  0xe9   : > { %p2833_p11 = pneg %p2832_p9  ;;  %p2839_p7 = por %p2838_p13, %p2837_p3 }
  0xeb   : > { %p2840_p8 = pnand %p2839_p7, %p2833_p11 }
  0xed   : > { %2843 = shalt.err (!%p2840_p8)
}
  0xee   : > { %s3002_s12 = smov 128   ;;  %s3003_s22 = smov 8  }
  0xef   : > { %p3815_p6 = scmp.ne.s32.totalorder %s3808_s26, 0  ;;  %s3816_s25 = scalar_lea.sflag [#allocation10], %s3161_s30 }
  0xf0   : > { %s418_s28 = scalar_lea.vmem [#allocation14], %s3164_s11  ;;  %s3389_s18 = scalar_lea.hbm %s3763_s8, %s2242_s7 }
  0xf1   : > { %2412 = dma.hbm_to_vmem [thread:$0]  (!%p3815_p6), %s3354_s10, 2048, %s3358_s23, %s3816_s25, %s3002_s12, %s3002_s12, %s3003_s22  }
  0xf2   : > { %s425_s24 = sshll.u32 %s418_s28, 4  ;;  %s2844_s1 = scalar_lea.hbm %s3185_s29, 16  ;;  %s426_s24 = int_to_ptr.vmem [resolvable:$true] %s425_s24 }
  0xf3   : > { %p2845_p10 = scmp.ne.s32.totalorder %s3185_s29, %s2844_s1  ;;  %s2849_s14 = scalar_lea.hbm %s3761_s6, 32 }
  0xf4   : > { %p2850_p1 = scmp.lt.u32.totalorder %s3185_s29, %s3761_s6  ;;  %p2851_p2 = scmp.lt.u32.totalorder %s2849_s14, %s2844_s1 }
  0xf5   : > { %p2847_p12 = pnand %p2845_p10, %p3814_p0  ;;  %p2853_p9 = scmp.lt.u32.totalorder %s2844_s1, %s3185_s29 }
  0xf6   : > { %p2852_p5 = por %p2851_p2, %p2850_p1 }
  0xf7   : > { %p2848_p4 = pneg %p2847_p12 }
  0xf8   : > { %p2854_p11 = por %p2853_p9, %p2852_p5 }
  0xfa   : > { %p2855_p3 = pnand %p2854_p11, %p2848_p4 }
  0xfc   : > { %2858 = shalt.err (!%p2855_p3)
}
  0xfd   : > { %s2859_s16 = scalar_lea.vmem %s426_s24, 16  ;;  %s3004_s7 = smov [#allocation14]  }
  0xfe   : > { %p2860_p13 = scmp.ne.s32.totalorder %s426_s24, %s2859_s16  ;;  %s2864_s23 = sshll.u32 %s3004_s7, 4  ;;  %s2865_s23 = int_to_ptr.vmem [resolvable:$false] %s2864_s23 }
  0xff   : > { %s2866_s12 = scalar_lea.vmem %s2865_s23, 32  ;;  %p2867_p10 = scmp.lt.s32.totalorder %s426_s24, %s2865_s23 }
 0x100   : > { %p2862_p7 = pnand %p2860_p13, %p3814_p0  ;;  %p2868_p12 = scmp.lt.s32.totalorder %s2866_s12, %s2859_s16 }
 0x102   : > { %p2863_p8 = pneg %p2862_p7  ;;  %p2869_p6 = por %p2868_p12, %p2867_p10 }
 0x104   : > { %p2870_p1 = pnand %p2869_p6, %p2863_p8 }
 0x106   : > { %2873 = shalt.err (!%p2870_p1)
}
 0x107   : > { %p3817_p2 = scmp.ne.s32.totalorder %s3808_s26, 0  ;;  %s3818_s5 = scalar_lea.sflag [#allocation13], %s3161_s30 }
 0x108   : > { %s457_s22 = scalar_lea.vmem [#allocation17], %s2134_s27  ;;  %s2874_s28 = scalar_lea.hbm %s3389_s18, 2048 }
 0x109   : > { %2418 = dma.hbm_to_vmem [thread:$0]  (!%p3817_p2), %s3185_s29, 16, %s426_s24, %s3818_s5  }
 0x10a   : > { %s464_s25 = sshll.u32 %s457_s22, 4  ;;  %p2875_p6 = scmp.ne.s32.totalorder %s3389_s18, %s2874_s28  ;;  %s3412_s25 = int_to_ptr.vmem [resolvable:$true] %s464_s25 }
 0x10b   : > { %s2879_s1 = scalar_lea.hbm %s3763_s8, 4096  ;;  %p2880_p9 = scmp.lt.u32.totalorder %s3389_s18, %s3763_s8 }
 0x10c   : > { %p2877_p4 = pnand %p2875_p6, %p3814_p0  ;;  %p2881_p11 = scmp.lt.u32.totalorder %s2879_s1, %s2874_s28 }
 0x10d   : > { %p2883_p13 = scmp.lt.u32.totalorder %s2874_s28, %s3389_s18 }
 0x10e   : > { %p2878_p5 = pneg %p2877_p4  ;;  %p2882_p3 = por %p2881_p11, %p2880_p9 }
 0x110   : > { %p2884_p7 = por %p2883_p13, %p2882_p3 }
 0x112   : > { %p2885_p8 = pnand %p2884_p7, %p2878_p5 }
 0x114   : > { %2888 = shalt.err (!%p2885_p8)
}
 0x115   : > { %s2889_s29 = scalar_lea.vmem %s3412_s25, 2048  ;;  %s3005_s11 = smov [#allocation17]  }
 0x116   : > { %p2890_p10 = scmp.ne.s32.totalorder %s3412_s25, %s2889_s29  ;;  %s2894_s27 = sshll.u32 %s3005_s11, 4  ;;  %s2895_s27 = int_to_ptr.vmem [resolvable:$false] %s2894_s27 }
 0x117   : > { %s2896_s24 = scalar_lea.vmem %s2895_s27, 4096  ;;  %p2897_p6 = scmp.lt.s32.totalorder %s3412_s25, %s2895_s27 }
 0x118   : > { %p2892_p12 = pnand %p2890_p10, %p3814_p0  ;;  %p2898_p4 = scmp.lt.s32.totalorder %s2896_s24, %s2889_s29 }
 0x11a   : > { %p2893_p1 = pneg %p2892_p12  ;;  %p2899_p9 = por %p2898_p4, %p2897_p6 }
 0x11c   : > { %p2900_p11 = pnand %p2899_p9, %p2893_p1 }
 0x11e   : > { %2903 = shalt.err (!%p2900_p11)
}
 0x11f   : > { %s3819_s14 = smov 4   ;;  %s3820_s10 = smov 64  }
 0x120   : > { %s3821_s16 = scalar_lea.sflag [#allocation16], %s3161_s30  ;;  %p3822_p0 = scmp.ne.s32.totalorder %s3798_s19, 0 }
 0x121   : > { %2424 = dma.hbm_to_vmem [thread:$0]  (!%p3817_p2), %s3389_s18, 2048, %s3412_s25, %s3821_s16, %s3820_s10, %s3820_s10, %s3819_s14  }
 0x122   : > { %476 = sbr.rel (%p3822_p0) target bundleno = 3341 (0xd0d), region = 60  ;;  %p3823_p5 = scmp.eq.s32.totalorder (!%p3822_p0), %s3092_s17, 0 }
 0x129   : > { %2947 = dma.done.wait (%p3823_p5), [#allocation4], 64   ;;  %p3824_p3 = pmov %p3823_p5 }
 0x12b   : > { %2949 = vsyncadd (%p3824_p3), [#allocation4], 4294967232  ;;  %p3825_p13 = pmov %p3824_p3 }
 0x12c   : > { %p3826_p7 = pmov %p3824_p3 }
 0x12d   : > { %2951 = dma.done.wait (%p3825_p13), [#allocation7], 256  }
 0x12e   : > { %2953 = vsyncadd (%p3826_p7), [#allocation7], 4294967040  ;;  %s3827_s15 = sld [smem:[#allocation28_spill]]  ;;  %s3828_s30 = sld [smem:[#allocation30_spill]] }
 0x12f   : > { %s490_s26 = sand.u32 1, %s3092_s17  }
 0x130   : > { %s491_s19 = scalar_lea.sflag [#allocation10], %s490_s26 }
 0x134   : > { %s3452_s18 = sand.u32 1, %s3827_s15   ;;  %p3829_p2 = scmp.ne.s32.totalorder %s3828_s30, 0 }
 0x135   : > { %s493_s7 = scalar_lea.vmem [#allocation9], %s3452_s18 }
 0x136   : > { %2955 = dma.done.wait (%p3829_p2), %s491_s19, 2064  }
 0x137   : > { %2957 = vsyncadd (%p3829_p2), %s491_s19, 4294965232  ;;  %s2151_s23 = sshll.u32 %s3452_s18, 7  ;;  %s2152_s12 = sshll.u32 %s3452_s18, 6 }
 0x138   : > { %s3461_s5 = scalar_lea.vmem [#allocation11], %s2151_s23  ;;  %s508_s22 = scalar_lea.sflag [#allocation13], %s490_s26 }
 0x139   : > { %s3463_s25 = scalar_lea.vmem [#allocation12], %s2152_s12 }
 0x13a   : > { %2959 = dma.done.wait (%p3829_p2), %s508_s22, 1040  }
 0x13b   : > { %2961 = vsyncadd (%p3829_p2), %s508_s22, 4294966256  ;;  %s2153_s28 = sshll.u32 %s3452_s18, 8  ;;  %s519_s13 = scalar_lea.vmem [#allocation14], %s3452_s18 }
 0x13c   : > { %s525_s21 = scalar_lea.sflag [#allocation16], %s490_s26  ;;  %s3471_s1 = scalar_lea.vmem [#allocation15], %s2153_s28 }
 0x13d   : > { %2963 = dma.done.wait (%p3829_p2), %s525_s21, 6144  }
 0x13e   : > { %2965 = vsyncadd (%p3829_p2), %s525_s21, 4294961152  ;;  %s3477_s20 = scalar_lea.vmem [#allocation17], %s2151_s23  ;;  %p3830_p8 = pmov %p3824_p3 }
 0x13f   : > { %p3831_p10 = pmov %p3824_p3 }
 0x140   : > { %2967 = dma.done.wait (%p3830_p8), [#allocation19], 16  }
 0x141   : > { %2969 = vsyncadd (%p3831_p10), [#allocation19], 4294967280  ;;  %p3832_p12 = scmp.ne.s32.totalorder %s3092_s17, 0 }
 0x142   : > { %v601_v0 = vld [vmem:[#allocation3] sm:$0xf] (!%p3832_p12) }
 0x143   : > { %600 = sbr.rel (%p3832_p12) target bundleno = 330 (0x14a), region = 104  ;;  %v602_v1 = vunpack.c.l.bf16 (!%p3832_p12), %v601_v0 }
 0x145   : > { %v603_v2 = vmul.f32 (!%p3832_p12), 11.313708, %v602_v1 }
 0x147   : > { %604 = vst [vmem:[#allocation2] sm:$0xff] (!%p3832_p12), %v603_v2 }
 0x14a PF: > { %v2490_v5 = vld [vmem:[%s3461_s5 + $0x4] ss:$8 sps:$4 sm:$0xff]   ;;  %v2492_v6 = vld [vmem:[%s3461_s5] ss:$8 sps:$4 sm:$0xff]   ;;  %v2493_v7 = vld [vmem:[%s3461_s5 + $0x14] ss:$8 sps:$4 sm:$0xff]   ;;  %v617_v24 = vlaneseq }
 0x14b   : > { %720 = vmatprep.subr.bf16.mxu0 %v2490_v5  ;;  %v2495_v8 = vld [vmem:[%s3461_s5 + $0x10] ss:$8 sps:$4 sm:$0xff]   ;;  %v2496_v9 = vld [vmem:[%s3461_s5 + $0x24] ss:$8 sps:$4 sm:$0xff]   ;;  %v2498_v10 = vld [vmem:[%s3461_s5 + $0x20] ss:$8 sps:$4 sm:$0xff]  }
 0x14c   : > { %721 = vmatpush1.bf16.msra.mxu0 %v2492_v6  ;;  %v2499_v11 = vld [vmem:[%s3461_s5 + $0x34] ss:$8 sps:$4 sm:$0xff]   ;;  %v2501_v12 = vld [vmem:[%s3461_s5 + $0x30] ss:$8 sps:$4 sm:$0xff]   ;;  %v2502_v13 = vld [vmem:[%s3461_s5 + $0x44] ss:$8 sps:$4 sm:$0xff]  }
 0x14d   : > { %722 = vmatprep.subr.bf16.mxu0 %v2493_v7  ;;  %v2504_v14 = vld [vmem:[%s3461_s5 + $0x40] ss:$8 sps:$4 sm:$0xff]   ;;  %v2505_v15 = vld [vmem:[%s3461_s5 + $0x54] ss:$8 sps:$4 sm:$0xff]   ;;  %v2507_v16 = vld [vmem:[%s3461_s5 + $0x50] ss:$8 sps:$4 sm:$0xff]  }
 0x14e   : > { %v3485_v3 = vld [vmem:[#allocation2] sm:$0xff]  ;;  %v3006_v18 = vmov 0   ;;  %v2511_v20 = vld [vmem:[%s3461_s5 + $0x74] ss:$8 sps:$4 sm:$0xff]   ;;  %v2513_v21 = vld [vmem:[%s3461_s5 + $0x70] ss:$8 sps:$4 sm:$0xff]  }
 0x14f   : > { %v607_v4 = vmul.f32 %v3485_v3, %v3485_v3  ;;  %v2508_v17 = vld [vmem:[%s3461_s5 + $0x64] ss:$8 sps:$4 sm:$0xff]   ;;  %752 = vmatprep.mubr.bf16.mxu0 %v3006_v18  ;;  %v2510_v19 = vld [vmem:[%s3461_s5 + $0x60] ss:$8 sps:$4 sm:$0xff]   ;;  %v3507_v26 = vshrl.u32 %v617_v24, 7  ;;  %v3007_v35 = vmov 0.0  }
 0x150   : > { %723 = vmatpush1.bf16.msra.mxu0 %v2495_v8  ;;  %v606_v27 = vld [vmem:[%s493_s7] sm:$0x1]  ;;  %2293 = vmatprep.subr.bf16.mxu1 %v3007_v35  ;;  %s3008_s3 = smov 16   ;;  %s3009_s29 = smov 112   ;;  %vm3010_vm0 = vmmov 0   ;;  %v761_v42 = vld [vmem:[#allocation6] sm:$0xff] }
 0x151   : > { %608 = vadd.xlane.f32.xlu0 %v607_v4  ;;  %724 = vmatprep.subr.bf16.mxu0 %v2496_v9  ;;  %v615_v28 = vadd.f32 1.0, %v606_v27  ;;  %v3512_v29 = vsub.s32 0, %v3507_v26  ;;  %s3011_s11 = smov 80   ;;  %s3012_s27 = smov 48   ;;  %vm778_vm1 = vcmask 130048   ;;  %v3542_v44 = vld [vmem:[#allocation8] sm:$0xff] }
 0x152   : > { %2295 = vmatprep.mubr.msk.bf16.mxu1 %vm3010_vm0, %v3007_v35  ;;  %s3013_s24 = smov 32   ;;  %vm818_vm2 = vcmask 261120   ;;  %s3014_s14 = smov 64   ;;  %v766_v8 = vand.u32 127, %v617_v24  ;;  %vm867_vm4 = vcmask 64512   ;;  %vm886_vm5 = vcmask 1043456  }
 0x153   : > { %v620_v30 = vrot.slane %v615_v28, %v3512_v29  ;;  %s3016_s10 = smov 96   ;;  %vm1314_vm6 = vcmask 523264   ;;  %vm1316_vm7 = vcmask 785408   ;;  %p2237_p1 = scmp.ne.s32.totalorder %s3092_s17, 1 }
 0x154   : > { %725 = vmatpush1.bf16.msra.mxu0 %v2498_v10  ;;  %vm767_vm3 = vcmp.le.s32.totalorder %v766_v8, %v3507_v26  ;;  %v3015_v10 = vmov -1e+30  }
 0x155   : > { %726 = vmatprep.subr.bf16.mxu0 %v2499_v11  ;;  %v3569_v11 = vsel %vm767_vm3, 0.0, %v3015_v10 }
 0x158   : > { %727 = vmatpush1.bf16.msra.mxu0 %v2501_v12 }
 0x159   : > { %728 = vmatprep.subr.bf16.mxu0 %v2502_v13 }
 0x15c   : > { %729 = vmatpush1.bf16.msra.mxu0 %v2504_v14 }
 0x15d   : > { %730 = vmatprep.subr.bf16.mxu0 %v2505_v15 }
 0x160   : > { %731 = vmatpush1.bf16.msra.mxu0 %v2507_v16 }
 0x161   : > { %732 = vmatprep.subr.bf16.mxu0 %v2508_v17 }
 0x164   : > { %733 = vmatpush1.bf16.msra.mxu0 %v2510_v19 }
 0x165   : > { %734 = vmatprep.subr.bf16.mxu0 %v2511_v20 }
 0x168   : > { %735 = vmatpush1.bf16.msra.mxu0 %v2513_v21 }
 0x169   : > { %2317 = vmatprep.subr.bf16.mxu0 %v3007_v35 }
 0x1de   : > { %v609_v22 = vpop.xlane.xlu0 %608 }
 0x1df   : > { %v611_v23 = vmul.f32 0.0078125, %v609_v22 }
 0x1e1   : > { %v612_v25 = vadd.f32 1e-06, %v611_v23 }
 0x1e3   : > { %2586 = vrsqrt.f32 %v612_v25 }
 0x1ed   : > { %v2587_v31 = vpop.eup %2586 }
 0x1ee   : > { %v614_v32 = vmul.f32 %v2587_v31, %v3485_v3 }
 0x1f0   : > { %v622_v33 = vmul.f32 %v620_v30, %v614_v32 }
 0x1f2   : > { %v639_v34 = vpack.c.bf16 %v622_v33, %v622_v33 }
 0x1f4   : > { %753 = vmatmul.mubr.bf16.vlgmr.msra.gmra.mrb[0].mxu0 %v639_v34 }
 0x1f5   : > { %2319 = vmatprep.mubr.msk.bf16.mxu0 %vm3010_vm0, %v3007_v35 }
 0x2c7   : > { %v3518_v36 = vpop.f32.mrb[0].mxu0 }
 0x2c8   : > { %v3520_v37 = vpop.f32.mrb[1].mxu0  ;;  %v3526_v41 = vsub.f32 0.0, %v3518_v36  ;;  %v814_v55 = vmul.f32 %v761_v42, %v3518_v36 }
 0x2c9   : > { %775 = vrot.lane.b32.xlu1 %v3520_v37, %s3008_s3  ;;  %v758_v38 = vpop.f32.mrb[2].mxu0  ;;  %v769_v39 = vsub.f32 0.0, %v3520_v37  ;;  %v780_v49 = vmul.f32 %v761_v42, %v3520_v37  ;;  %v3583_v32 = vpack.c.bf16 %v3520_v37, %v3520_v37 }
 0x2ca   : > { %v759_v40 = vpop.f32.mrb[3].mxu0 }
 0x2cb   : > { %771 = vrot.lane.b32.xlu0 %v769_v39, %s3009_s29 }
 0x2cd   : > { %806 = vrot.lane.b32.xlu1 %v3526_v41, %s3009_s29 }
 0x2cf   : > { %788 = vrot.lane.b32.xlu0 %v3520_v37, %s3009_s29 }
 0x2d1   : > { %810 = vrot.lane.b32.xlu1 %v3518_v36, %s3008_s3 }
 0x2d3   : > { %930 = vrot.lane.b32.xlu0 %v3526_v41, %s3011_s11 }
 0x2d7   : > { %933 = vrot.lane.b32.xlu0 %v3518_v36, %s3009_s29 }
 0x2db   : > { %785 = vrot.lane.b32.xlu0 %v769_v39, %s3011_s11 }
 0x2df   : > { %1048 = vrot.lane.b32.xlu0 %v3526_v41, %s3012_s27 }
 0x2e3   : > { %1051 = vrot.lane.b32.xlu0 %v3518_v36, %s3011_s11 }
 0x2e7   : > { %1183 = vrot.lane.b32.xlu0 %v3518_v36, %s3012_s27 }
 0x2eb   : > { %793 = vrot.lane.b32.xlu0 %v761_v42, %s3013_s24 }
 0x33b   : > { %v776_v43 = vpop.permute.xlu1 %775 }
 0x33d   : > { %v772_v45 = vpop.permute.xlu0 %771 }
 0x33e   : > { %v779_v46 = vsel %vm778_vm1, %v772_v45, %v776_v43 }
 0x33f   : > { %v781_v47 = vmul.f32 %v779_v46, %v3542_v44  ;;  %v807_v48 = vpop.permute.xlu1 %806 }
 0x341   : > { %v789_v50 = vpop.permute.xlu0 %788  ;;  %v782_v51 = vadd.f32 %v781_v47, %v780_v49 }
 0x343   : > { %v811_v52 = vpop.permute.xlu1 %810  ;;  %v783_v53 = vpack.c.bf16 %v782_v51, %v782_v51 }
 0x344   : > { %v813_v54 = vsel %vm778_vm1, %v807_v48, %v811_v52 }
 0x345   : > { %v815_v56 = vmul.f32 %v813_v54, %v3542_v44  ;;  %v931_v57 = vpop.permute.xlu0 %930  ;;  %v3551_v58 = vsel %vm818_vm2, %v783_v53, 0 }
 0x346   : > { %2294 = vmatpush3.bf16.xpose.msra.mxu1 %v3551_v58 }
 0x347   : > { %v816_v59 = vadd.f32 %v815_v56, %v814_v55  ;;  %2299 = vmatprep.subr.bf16.mxu1 %v3007_v35 }
 0x349   : > { %v934_v60 = vpop.permute.xlu0 %933  ;;  %v817_v61 = vpack.c.bf16 %v816_v59, %v816_v59 }
 0x34a   : > { %v936_v1 = vsel %vm778_vm1, %v931_v57, %v934_v60 }
 0x34b   : > { %v938_v4 = vmul.f32 %v936_v1, %v3542_v44 }
 0x34d   : > { %2296 = vmatmul.mubr.msk.bf16.vlgmr.msra.gmra.mrb[0].mxu1 %vm818_vm2, %v817_v61  ;;  %v786_v62 = vpop.permute.xlu0 %785 }
 0x34e   : > { %v791_v63 = vsel %vm778_vm1, %v786_v62, %v789_v50  ;;  %2301 = vmatprep.mubr.msk.bf16.mxu1 %vm3010_vm0, %v3007_v35 }
 0x34f   : > { %v797_v0 = vmul.f32 %v791_v63, %v3542_v44 }
 0x351   : > { %799 = vrot.lane.b32.xlu0 %v797_v0, %s3013_s24  ;;  %v1049_v2 = vpop.permute.xlu0 %1048 }
 0x355   : > { %940 = vrot.lane.b32.xlu0 %v938_v4, %s3013_s24  ;;  %v1052_v5 = vpop.permute.xlu0 %1051 }
 0x356   : > { %v1054_v6 = vsel %vm778_vm1, %v1049_v2, %v1052_v5 }
 0x357   : > { %v1059_v7 = vmul.f32 %v1054_v6, %v3542_v44 }
 0x359   : > { %1061 = vrot.lane.b32.xlu0 %v1059_v7, %s3014_s14  ;;  %v1184_v19 = vpop.permute.xlu0 %1183 }
 0x35d   : > { %v794_v20 = vpop.permute.xlu0 %793 }
 0x35e   : > { %v937_v30 = vmul.f32 %v794_v20, %v3518_v36  ;;  %v796_v34 = vmul.f32 %v794_v20, %v3520_v37 }
 0x3c3   : > { %v800_v22 = vpop.permute.xlu0 %799 }
 0x3c4   : > { %v802_v38 = vadd.f32 %v800_v22, %v796_v34 }
 0x3c7   : > { %v941_v28 = vpop.permute.xlu0 %940 }
 0x3c8   : > { %v943_v31 = vadd.f32 %v941_v28, %v937_v30 }
 0x3ca   : > { %v944_v39 = vpack.c.bf16 %v943_v31, %v943_v31 }
 0x3cb   : > { %v1062_v43 = vpop.permute.xlu0 %1061 }
 0x420   : > { %v859_v9 = vpop.f32.mrb[0].mxu1 }
 0x421   : > { %v865_v12 = vmul.f32 0.17677669, %v859_v9  ;;  %v2297_v13 = vpop.f32.mrb[1].mxu1 }
 0x422   : > { %v862_v14 = vpop.f32.mrb[2].mxu1 }
 0x423   : > { %v2298_v15 = vpop.f32.mrb[3].mxu1  ;;  %v866_v16 = vadd.f32 %v865_v12, %v3569_v11 }
 0x425   : > { %v868_v17 = vsel %vm867_vm4, %v866_v16, -inf }
 0x426   : > { %869 = vmax.xlane.f32.xlu1 %v868_v17 }
 0x437   : > { %1180 = vrot.lane.b32.xlu1 %v3526_v41, %s3008_s3 }
 0x43b   : > { %1055 = vrot.lane.b32.xlu1 %v761_v42, %s3014_s14 }
 0x43f   : > { %1187 = vrot.lane.b32.xlu1 %v761_v42, %s3016_s10 }
 0x4b3   : > { %v870_v21 = vpop.xlane.xlu1 %869 }
 0x4b4   : > { %v871_v23 = vsub.f32 %v866_v16, %v870_v21 }
 0x4b6   : > { %v872_v24 = vmul.f32 1.442695, %v871_v23 }
 0x4b7   : > { %v1181_v25 = vpop.permute.xlu1 %1180 }
 0x4b8   : > { %2588 = vpow2.f32 %v872_v24  ;;  %v1186_v26 = vsel %vm778_vm1, %v1181_v25, %v1184_v19 }
 0x4b9   : > { %v1191_v27 = vmul.f32 %v1186_v26, %v3542_v44  ;;  %v803_v44 = vpack.c.bf16 %v802_v38, %v802_v38 }
 0x4bb   : > { %1193 = vrot.lane.b32.xlu0 %v1191_v27, %s3016_s10  ;;  %v1056_v33 = vpop.permute.xlu1 %1055 }
 0x4bc   : > { %v1058_v40 = vmul.f32 %v1056_v33, %v3518_v36 }
 0x4be   : > { %v1064_v45 = vadd.f32 %v1062_v43, %v1058_v40 }
 0x4bf   : > { %881 = vrot.lane.b32.xlu0 %v3583_v32, %s3014_s14  ;;  %v1188_v37 = vpop.permute.xlu1 %1187 }
 0x4c0   : > { %v1065_v46 = vpack.c.bf16 %v1064_v45, %v1064_v45  ;;  %v1190_v47 = vmul.f32 %v1188_v37, %v3518_v36 }
 0x4c2   : > { %v2589_v41 = vpop.eup %2588 }
 0x4c3   : > { %946 = vrot.lane.b32.xlu0 %v944_v39, %s3016_s10  ;;  %v874_v42 = vsel %vm867_vm4, %v2589_v41, 0.0 }
 0x4c4   : > { %875 = vadd.xlane.f32.xlu1 %v874_v42 }
 0x4c7   : > { %1070 = vrot.lane.b32.xlu0 %v803_v44, %s3016_s10 }
 0x4cb   : > { %1067 = vrot.lane.b32.xlu0 %v1065_v46, %s3014_s14 }
 0x52d   : > { %v1194_v48 = vpop.permute.xlu0 %1193 }
 0x52e   : > { %v1196_v49 = vadd.f32 %v1194_v48, %v1190_v47 }
 0x530   : > { %v1197_v50 = vpack.c.bf16 %v1196_v49, %v1196_v49 }
 0x531   : > { %v882_v51 = vpop.permute.xlu0 %881 }
 0x532   : > { %v888_v52 = vsel %vm886_vm5, %v882_v51, 0  ;;  %1199 = vrot.lane.b32.xlu0 %v1197_v50, %s3013_s24 }
 0x533   : > { %2300 = vmatpush3.bf16.msra.mxu1 %v888_v52 }
 0x534   : > { %2305 = vmatprep.subr.bf16.mxu1 %v3007_v35 }
 0x535   : > { %v947_v53 = vpop.permute.xlu0 %946 }
 0x539   : > { %v1071_v54 = vpop.permute.xlu0 %1070 }
 0x53a   : > { %v1076_v55 = vsel %vm818_vm2, %v1071_v54, 0 }
 0x53b   : > { %2318 = vmatpush3.bf16.xpose.msra.mxu0 %v1076_v55 }
 0x53c   : > { %2329 = vmatprep.subr.bf16.mxu0 %v3007_v35 }
 0x53d   : > { %v1068_v36 = vpop.permute.xlu0 %1067 }
 0x542   : > { %2320 = vmatmul.mubr.msk.bf16.vlgmr.msra.gmra.mrb[4].mxu0 %vm818_vm2, %v1068_v36  ;;  %v2514_v36 = vld [vmem:[%s3463_s25] sm:$0xff]  }
 0x543   : > { %2330 = vmatpush3.bf16.xpose.msra.mxu0 %v1076_v55  ;;  %2331 = vmatprep.mubr.msk.bf16.mxu0 %vm3010_vm0, %v3007_v35 }
 0x544   : > { %2341 = vmatprep.subr.bf16.mxu0 %v3007_v35 }
 0x551   : > { %v876_v56 = vpop.xlane.xlu1 %875 }
 0x552   : > { %2590 = vrcp.f32 %v876_v56  ;;  %v2515_v56 = vld [vmem:[%s3463_s25 + $0x8] sm:$0xff]  }
 0x55c   : > { %v2591_v57 = vpop.eup %2590 }
 0x55d   : > { %v878_v59 = vmul.f32 %v2591_v57, %v2589_v41 }
 0x55f   : > { %v879_v60 = vpack.c.bf16 %v878_v59, %v878_v59 }
 0x561   : > { %2302 = vmatmul.mubr.msk.bf16.vlgmr.msra.gmra.mrb[4].mxu1 %vm867_vm4, %v879_v60 }
 0x562   : > { %2306 = vmatpush3.bf16.xpose.msra.mxu1 %v3551_v58  ;;  %2307 = vmatprep.mubr.msk.bf16.mxu1 %vm3010_vm0, %v3007_v35 }
 0x563   : > { %2311 = vmatprep.subr.bf16.mxu1 %v3007_v35 }
 0x569   : > { %2308 = vmatmul.mubr.msk.bf16.vlgmr.msra.gmra.mrb[8].mxu1 %vm818_vm2, %v947_v53 }
 0x56a   : > { %2312 = vmatpush3.bf16.msra.mxu1 %v888_v52  ;;  %2313 = vmatprep.mubr.msk.bf16.mxu1 %vm3010_vm0, %v3007_v35 }
 0x56b   : > { %2323 = vmatprep.subr.bf16.mxu1 %v3007_v35 }
 0x5a4   : > { %v1200_v61 = vpop.permute.xlu0 %1199 }
 0x5a5   : > { %2332 = vmatmul.mubr.msk.bf16.vlgmr.msra.gmra.mrb[8].mxu0 %vm818_vm2, %v1200_v61  ;;  %v2516_v61 = vld [vmem:[%s3463_s25 + $0x10] sm:$0xff]  }
 0x5a6   : > { %2357 = vmatprep.mubr.msk.bf16.mxu0 %vm3010_vm0, %v3007_v35  ;;  %2342 = vmatpush3.bf16.msra.mxu0 %v2514_v36  ;;  %v2564_v36 = vld [vmem:[%s3471_s1 + $0xe0] ss:$16 sps:$4 sm:$0xff]  }
 0x5a7   : > { %2343 = vmatprep.subr.bf16.mxu0 %v3007_v35 }
 0x5aa   : > { %2344 = vmatpush3.bf16.msra.mxu0 %v2515_v56  ;;  %v2567_v56 = vld [vmem:[%s3471_s1 + $0xe8] ss:$16 sps:$4 sm:$0xff]  }
 0x5ab   : > { %2345 = vmatprep.subr.bf16.mxu0 %v3007_v35 }
 0x5ae   : > { %2346 = vmatpush3.bf16.msra.mxu0 %v2516_v61  ;;  %v1424_v61 = vld [vmem:[%s519_s13] sm:$0x1] }
 0x5af   : > { %2347 = vmatprep.subr.bf16.mxu0 %v3007_v35 }
 0x615   : > { %v1112_v58 = vpop.f32.mrb[4].mxu0 }
 0x616   : > { %v1118_v62 = vmul.f32 0.17677669, %v1112_v58  ;;  %v2321_v63 = vpop.f32.mrb[5].mxu0 }
 0x617   : > { %v1115_v0 = vpop.f32.mrb[6].mxu0 }
 0x618   : > { %v2322_v1 = vpop.f32.mrb[7].mxu0  ;;  %v1119_v2 = vadd.f32 %v1118_v62, %v3569_v11  ;;  %v2517_v62 = vld [vmem:[%s3463_s25 + $0x18] sm:$0xff]  }
 0x619   : > { %2348 = vmatpush3.bf16.msra.mxu0 %v2517_v62 }
 0x61a   : > { %v1120_v4 = vsel %vm867_vm4, %v1119_v2, -inf  ;;  %2349 = vmatprep.subr.bf16.mxu0 %v3007_v35 }
 0x61b   : > { %1121 = vmax.xlane.f32.xlu1 %v1120_v4 }
 0x634   : > { %v3617_v5 = vpop.f32.mrb[4].mxu1 }
 0x635   : > { %v2303_v6 = vpop.f32.mrb[5].mxu1 }
 0x636   : > { %v927_v7 = vpop.f32.mrb[6].mxu1  ;;  %v2519_v6 = vld [vmem:[%s3463_s25 + $0x28] sm:$0xff]  }
 0x637   : > { %v2304_v8 = vpop.f32.mrb[7].mxu1  ;;  %v2520_v7 = vld [vmem:[%s3463_s25 + $0x30] sm:$0xff]  }
 0x638   : > { %v2521_v8 = vld [vmem:[%s3463_s25 + $0x38] sm:$0xff]  }
 0x63c   : > { %v985_v9 = vpop.f32.mrb[8].mxu1 }
 0x63d   : > { %v991_v10 = vmul.f32 0.17677669, %v985_v9  ;;  %v2309_v12 = vpop.f32.mrb[9].mxu1 }
 0x63e   : > { %v988_v13 = vpop.f32.mrb[10].mxu1 }
 0x63f   : > { %v2310_v14 = vpop.f32.mrb[11].mxu1  ;;  %v992_v15 = vadd.f32 %v991_v10, %v3569_v11 }
 0x641   : > { %v993_v16 = vsel %vm867_vm4, %v992_v15, -inf }
 0x642   : > { %994 = vmax.xlane.f32.xlu0 %v993_v16 }
 0x678   : > { %v1238_v17 = vpop.f32.mrb[8].mxu0 }
 0x679   : > { %v1244_v19 = vmul.f32 0.17677669, %v1238_v17  ;;  %v2333_v20 = vpop.f32.mrb[9].mxu0 }
 0x67a   : > { %v1241_v21 = vpop.f32.mrb[10].mxu0 }
 0x67b   : > { %v2334_v22 = vpop.f32.mrb[11].mxu0  ;;  %v1245_v23 = vadd.f32 %v1244_v19, %v3569_v11  ;;  %v2522_v21 = vld [vmem:[%s3471_s1] ss:$16 sps:$4 sm:$0xff]  }
 0x67c   : > { %v2524_v22 = vld [vmem:[%s3471_s1 + $0x4] ss:$16 sps:$4 sm:$0xff]  }
 0x67d   : > { %v1246_v24 = vsel %vm867_vm4, %v1245_v23, -inf }
 0x67e   : > { %1247 = vmax.xlane.f32.xlu1 %v1246_v24  ;;  %v2527_v24 = vld [vmem:[%s3471_s1 + $0xc] ss:$16 sps:$4 sm:$0xff]  }
 0x6a8   : > { %v1122_v25 = vpop.xlane.xlu1 %1121 }
 0x6a9   : > { %v1123_v26 = vsub.f32 %v1119_v2, %v1122_v25  ;;  %v2518_v2 = vld [vmem:[%s3463_s25 + $0x20] sm:$0xff]  }
 0x6aa   : > { %2350 = vmatpush3.bf16.msra.mxu0 %v2518_v2  ;;  %v2530_v25 = vld [vmem:[%s3471_s1 + $0x24] ss:$16 sps:$4 sm:$0xff]  }
 0x6ab   : > { %v1124_v27 = vmul.f32 1.442695, %v1123_v26  ;;  %2351 = vmatprep.subr.bf16.mxu0 %v3007_v35  ;;  %v2528_v26 = vld [vmem:[%s3471_s1 + $0x20] ss:$16 sps:$4 sm:$0xff]  }
 0x6ad   : > { %2592 = vpow2.f32 %v1124_v27  ;;  %v2531_v27 = vld [vmem:[%s3471_s1 + $0x28] ss:$16 sps:$4 sm:$0xff]  }
 0x6ae   : > { %2352 = vmatpush3.bf16.msra.mxu0 %v2519_v6  ;;  %v2571_v6 = vld [vmem:[%s3477_s20] sm:$0xff]  }
 0x6af   : > { %2353 = vmatprep.subr.bf16.mxu0 %v3007_v35 }
 0x6b2   : > { %2354 = vmatpush3.bf16.msra.mxu0 %v2520_v7  ;;  %v2572_v7 = vld [vmem:[%s3477_s20 + $0x48] sm:$0xff]  }
 0x6b3   : > { %2355 = vmatprep.subr.bf16.mxu0 %v3007_v35 }
 0x6b6   : > { %2356 = vmatpush3.bf16.msra.mxu0 %v2521_v8  ;;  %v2573_v8 = vld [vmem:[%s3477_s20 + $0x8] sm:$0xff]  }
 0x6b7   : > { %v2593_v28 = vpop.eup %2592  ;;  %1674 = vmatprep.subr.bf16.mxu0 %v2527_v24 }
 0x6b8   : > { %v1126_v30 = vsel %vm867_vm4, %v2593_v28, 0.0 }
 0x6b9   : > { %1127 = vadd.xlane.f32.xlu1 %v1126_v30  ;;  %v2539_v30 = vld [vmem:[%s3471_s1 + $0x4c] ss:$16 sps:$4 sm:$0xff]  }
 0x6cf   : > { %v995_v31 = vpop.xlane.xlu0 %994 }
 0x6d0   : > { %v996_v33 = vsub.f32 %v992_v15, %v995_v31  ;;  %v2537_v31 = vld [vmem:[%s3471_s1 + $0x48] ss:$16 sps:$4 sm:$0xff]  }
 0x6d2   : > { %v997_v34 = vmul.f32 1.442695, %v996_v33 }
 0x6d4   : > { %2594 = vpow2.f32 %v997_v34 }
 0x6de   : > { %v2595_v38 = vpop.eup %2594 }
 0x6df   : > { %v999_v39 = vsel %vm867_vm4, %v2595_v38, 0.0 }
 0x6e0   : > { %1000 = vadd.xlane.f32.xlu1 %v999_v39 }
 0x6f1   : > { %1132 = vrot.lane.b32.xlu1 %v3583_v32, %s3013_s24 }
 0x70b   : > { %v1248_v11 = vpop.xlane.xlu1 %1247 }
 0x70c   : > { %v1249_v40 = vsub.f32 %v1245_v23, %v1248_v11  ;;  %v2525_v23 = vld [vmem:[%s3471_s1 + $0x8] ss:$16 sps:$4 sm:$0xff]  }
 0x70e   : > { %v1250_v41 = vmul.f32 1.442695, %v1249_v40 }
 0x710   : > { %2596 = vpow2.f32 %v1250_v41  ;;  %v2542_v41 = vld [vmem:[%s3471_s1 + $0x64] ss:$16 sps:$4 sm:$0xff]  }
 0x71a   : > { %v2597_v42 = vpop.eup %2596 }
 0x71b   : > { %v1252_v43 = vsel %vm867_vm4, %v2597_v42, 0.0 }
 0x71c   : > { %1253 = vadd.xlane.f32.xlu0 %v1252_v43  ;;  %v2540_v43 = vld [vmem:[%s3471_s1 + $0x60] ss:$16 sps:$4 sm:$0xff]  }
 0x746   : > { %v1128_v44 = vpop.xlane.xlu1 %1127 }
 0x76d   : > { %v1001_v45 = vpop.xlane.xlu1 %1000 }
 0x76e   : > { %2598 = vrcp.f32 %v1001_v45  ;;  %v2548_v45 = vld [vmem:[%s3471_s1 + $0x84] ss:$16 sps:$4 sm:$0xff]  }
 0x76f   : > { %2600 = vrcp.f32 %v1128_v44  ;;  %v2543_v44 = vld [vmem:[%s3471_s1 + $0x68] ss:$16 sps:$4 sm:$0xff]  }
 0x771   : > { %v1133_v47 = vpop.permute.xlu1 %1132 }
 0x772   : > { %v1138_v50 = vsel %vm886_vm5, %v1133_v47, 0  ;;  %v2554_v47 = vld [vmem:[%s3471_s1 + $0xa4] ss:$16 sps:$4 sm:$0xff]  }
 0x778   : > { %v2599_v46 = vpop.eup %2598 }
 0x779   : > { %v1003_v37 = vmul.f32 %v2599_v46, %v2595_v38  ;;  %v2601_v49 = vpop.eup %2600  ;;  %v2549_v46 = vld [vmem:[%s3471_s1 + $0x88] ss:$16 sps:$4 sm:$0xff]  }
 0x77a   : > { %v1130_v32 = vmul.f32 %v2601_v49, %v2593_v28  ;;  %v2536_v28 = vld [vmem:[%s3471_s1 + $0x44] ss:$16 sps:$4 sm:$0xff]   ;;  %v2552_v49 = vld [vmem:[%s3471_s1 + $0xa0] ss:$16 sps:$4 sm:$0xff]  }
 0x77b   : > { %v1004_v48 = vpack.c.bf16 %v1003_v37, %v1003_v37  ;;  %v2551_v37 = vld [vmem:[%s3471_s1 + $0x8c] ss:$16 sps:$4 sm:$0xff]  }
 0x77c   : > { %v1131_v51 = vpack.c.bf16 %v1130_v32, %v1130_v32  ;;  %v2560_v32 = vld [vmem:[%s3471_s1 + $0xc4] ss:$16 sps:$4 sm:$0xff]  }
 0x77d   : > { %2314 = vmatmul.mubr.msk.bf16.vlgmr.msra.gmra.mrb[12].mxu1 %vm867_vm4, %v1004_v48  ;;  %v2557_v48 = vld [vmem:[%s3471_s1 + $0xac] ss:$16 sps:$4 sm:$0xff]  }
 0x77e   : > { %2324 = vmatpush3.bf16.msra.mxu1 %v1138_v50  ;;  %2325 = vmatprep.mubr.msk.bf16.mxu1 %vm3010_vm0, %v3007_v35 }
 0x77f   : > { %2335 = vmatprep.subr.bf16.mxu1 %v3007_v35 }
 0x785   : > { %2326 = vmatmul.mubr.msk.bf16.vlgmr.msra.gmra.mrb[16].mxu1 %vm867_vm4, %v1131_v51  ;;  %v2563_v51 = vld [vmem:[%s3471_s1 + $0xcc] ss:$16 sps:$4 sm:$0xff]  }
 0x786   : > { %2336 = vmatpush3.bf16.msra.mxu1 %v1138_v50  ;;  %2337 = vmatprep.mubr.msk.bf16.mxu1 %vm3010_vm0, %v3007_v35  ;;  %v2555_v50 = vld [vmem:[%s3471_s1 + $0xa8] ss:$16 sps:$4 sm:$0xff]  }
 0x787   : > { %1633 = vmatprep.subr.bf16.mxu1 %v2524_v22 }
 0x7a9   : > { %v1254_v52 = vpop.xlane.xlu0 %1253 }
 0x7aa   : > { %2602 = vrcp.f32 %v1254_v52  ;;  %v2558_v52 = vld [vmem:[%s3471_s1 + $0xc0] ss:$16 sps:$4 sm:$0xff]  }
 0x7b4   : > { %v2603_v53 = vpop.eup %2602 }
 0x7b5   : > { %v1256_v54 = vmul.f32 %v2603_v53, %v2597_v42  ;;  %v2545_v42 = vld [vmem:[%s3471_s1 + $0x6c] ss:$16 sps:$4 sm:$0xff]   ;;  %v2561_v53 = vld [vmem:[%s3471_s1 + $0xc8] ss:$16 sps:$4 sm:$0xff]  }
 0x7b7   : > { %v1257_v55 = vpack.c.bf16 %v1256_v54, %v1256_v54  ;;  %v2566_v54 = vld [vmem:[%s3471_s1 + $0xe4] ss:$16 sps:$4 sm:$0xff]  }
 0x7b9   : > { %2338 = vmatmul.mubr.msk.bf16.vlgmr.msra.gmra.mrb[20].mxu1 %vm867_vm4, %v1257_v55  ;;  %v2569_v55 = vld [vmem:[%s3471_s1 + $0xec] ss:$16 sps:$4 sm:$0xff]  }
 0x7ba   : > { %1665 = vmatprep.mubr.bf16.mxu1 %v3006_v18  ;;  %1634 = vmatpush1.bf16.msra.mxu1 %v2522_v21  ;;  %v2585_v21 = vld [vmem:[%s3477_s20 + $0x38] sm:$0xff]  }
 0x7bb   : > { %1635 = vmatprep.subr.bf16.mxu1 %v2530_v25 }
 0x7be   : > { %1636 = vmatpush1.bf16.msra.mxu1 %v2528_v26 }
 0x7bf   : > { %1637 = vmatprep.subr.bf16.mxu1 %v2536_v28 }
 0x850   : > { %v1042_v57 = vpop.f32.mrb[12].mxu1 }
 0x851   : > { %1302 = vrot.lane.b32.xlu0 %v1042_v57, %s3013_s24  ;;  %v2315_v59 = vpop.f32.mrb[13].mxu1 }
 0x852   : > { %v1045_v60 = vpop.f32.mrb[14].mxu1 }
 0x853   : > { %v2316_v58 = vpop.f32.mrb[15].mxu1 }
 0x854   : > { %v1432_v58 = vadd.f32 1.0, %v1424_v61 }
 0x856   : > { %v1437_v62 = vrot.slane %v1432_v58, %v3512_v29  ;;  %v1911_v58 = vld [vmem:[#allocation18] sm:$0x1] (!%p2237_p1) }
 0x858   : > { %v1174_v63 = vpop.f32.mrb[16].mxu1 }
 0x859   : > { %1306 = vrot.lane.b32.xlu1 %v1174_v63, %s3014_s14  ;;  %v2327_v0 = vpop.f32.mrb[17].mxu1 }
 0x85a   : > { %v1177_v1 = vpop.f32.mrb[18].mxu1 }
 0x85b   : > { %v2328_v4 = vpop.f32.mrb[19].mxu1 }
 0x85c   : > { %v2570_v4 = vld [vmem:[%s3477_s20 + $0x40] sm:$0xff]  }
 0x88c   : > { %v1295_v9 = vpop.f32.mrb[20].mxu1 }
 0x88d   : > { %1310 = vrot.lane.b32.xlu1 %v1295_v9, %s3016_s10  ;;  %v2339_v10 = vpop.f32.mrb[21].mxu1  ;;  %v2574_v9 = vld [vmem:[%s3477_s20 + $0x50] sm:$0xff]  }
 0x88e   : > { %v1298_v12 = vpop.f32.mrb[22].mxu1  ;;  %v2575_v10 = vld [vmem:[%s3477_s20 + $0x10] sm:$0xff]  }
 0x88f   : > { %v2340_v13 = vpop.f32.mrb[23].mxu1  ;;  %v2576_v12 = vld [vmem:[%s3477_s20 + $0x58] sm:$0xff]  }
 0x890   : > { %v2577_v13 = vld [vmem:[%s3477_s20 + $0x18] sm:$0xff]  }
 0x8c3   : > { %v1303_v14 = vpop.permute.xlu0 %1302 }
 0x8c4   : > { %v1313_v35 = vsel %vm818_vm2, %v3617_v5, %v1303_v14  ;;  %v2533_v5 = vld [vmem:[%s3471_s1 + $0x2c] ss:$16 sps:$4 sm:$0xff]   ;;  %v2578_v14 = vld [vmem:[%s3477_s20 + $0x60] sm:$0xff]  }
 0x8cb   : > { %v1307_v15 = vpop.permute.xlu1 %1306 }
 0x8cc   : > { %v1315_v16 = vsel %vm1314_vm6, %v1313_v35, %v1307_v15  ;;  %v2579_v15 = vld [vmem:[%s3477_s20 + $0x20] sm:$0xff]   ;;  %v2580_v35 = vld [vmem:[%s3477_s20 + $0x68] sm:$0xff]  }
 0x8ff   : > { %v1311_v17 = vpop.permute.xlu1 %1310 }
 0x900   : > { %v1317_v19 = vsel %vm1316_vm7, %v1315_v16, %v1311_v17  ;;  %v2581_v16 = vld [vmem:[%s3477_s20 + $0x28] sm:$0xff]   ;;  %v2582_v17 = vld [vmem:[%s3477_s20 + $0x70] sm:$0xff]  }
 0x901   : > { %v1334_v20 = vpack.c.bf16 %v1317_v19, %v1317_v19  ;;  %v2583_v19 = vld [vmem:[%s3477_s20 + $0x30] sm:$0xff]  }
 0x903   : > { %2358 = vmatmul.mubr.bf16.vlgmr.msra.gmra.mrb[12].mxu0 %v1334_v20  ;;  %v2584_v20 = vld [vmem:[%s3477_s20 + $0x78] sm:$0xff]  }
 0x904   : > { %1706 = vmatprep.mubr.bf16.mxu0 %v3006_v18  ;;  %1675 = vmatpush1.bf16.msra.mxu0 %v2525_v23  ;;  %v2534_v18 = vld [vmem:[%s3471_s1 + $0x40] ss:$16 sps:$4 sm:$0xff]  }
 0x905   : > { %1676 = vmatprep.subr.bf16.mxu0 %v2533_v5  ;;  %1638 = vmatpush1.bf16.msra.mxu1 %v2534_v18 }
 0x906   : > { %1639 = vmatprep.subr.bf16.mxu1 %v2542_v41 }
 0x908   : > { %1677 = vmatpush1.bf16.msra.mxu0 %v2531_v27 }
 0x909   : > { %1678 = vmatprep.subr.bf16.mxu0 %v2539_v30  ;;  %1640 = vmatpush1.bf16.msra.mxu1 %v2540_v43 }
 0x90a   : > { %1641 = vmatprep.subr.bf16.mxu1 %v2548_v45 }
 0x90c   : > { %1679 = vmatpush1.bf16.msra.mxu0 %v2537_v31 }
 0x90d   : > { %1680 = vmatprep.subr.bf16.mxu0 %v2545_v42 }
 0x910   : > { %1681 = vmatpush1.bf16.msra.mxu0 %v2543_v44 }
 0x911   : > { %1682 = vmatprep.subr.bf16.mxu0 %v2551_v37 }
 0x914   : > { %1683 = vmatpush1.bf16.msra.mxu0 %v2549_v46 }
 0x915   : > { %1684 = vmatprep.subr.bf16.mxu0 %v2557_v48 }
 0x918   : > { %1685 = vmatpush1.bf16.msra.mxu0 %v2555_v50 }
 0x919   : > { %1686 = vmatprep.subr.bf16.mxu0 %v2563_v51 }
 0x91c   : > { %1687 = vmatpush1.bf16.msra.mxu0 %v2561_v53 }
 0x91d   : > { %1688 = vmatprep.subr.bf16.mxu0 %v2569_v55 }
 0x920   : > { %1689 = vmatpush1.bf16.msra.mxu0 %v2567_v56 }
 0x9d6   : > { %v1417_v33 = vpop.f32.mrb[12].mxu0 }
 0x9d7   : > { %v3672_v34 = vadd.f32 %v1417_v33, %v3485_v3  ;;  %v2359_v38 = vpop.f32.mrb[13].mxu0  ;;  %v2546_v3 = vld [vmem:[%s3471_s1 + $0x80] ss:$16 sps:$4 sm:$0xff]  }
 0x9d8   : > { %v1420_v39 = vpop.f32.mrb[14].mxu0  ;;  %1642 = vmatpush1.bf16.msra.mxu1 %v2546_v3 }
 0x9d9   : > { %v2360_v11 = vpop.f32.mrb[15].mxu0  ;;  %v1425_v40 = vmul.f32 %v3672_v34, %v3672_v34  ;;  %1643 = vmatprep.subr.bf16.mxu1 %v2554_v47 }
 0x9db   : > { %1426 = vadd.xlane.f32.xlu1 %v1425_v40 }
 0x9dc   : > { %1644 = vmatpush1.bf16.msra.mxu1 %v2552_v49 }
 0x9dd   : > { %1645 = vmatprep.subr.bf16.mxu1 %v2560_v32 }
 0x9e0   : > { %1646 = vmatpush1.bf16.msra.mxu1 %v2558_v52 }
 0x9e1   : > { %1647 = vmatprep.subr.bf16.mxu1 %v2566_v54 }
 0x9e4   : > { %1648 = vmatpush1.bf16.msra.mxu1 %v2564_v36 }
 0x9e5   : > { %2271 = vmatprep.subr.bf16.mxu1 %v2570_v4 }
 0xa68   : > { %v1427_v57 = vpop.xlane.xlu1 %1426 }
 0xa69   : > { %v1428_v59 = vmul.f32 0.0078125, %v1427_v57 }
 0xa6b   : > { %v1429_v60 = vadd.f32 1e-06, %v1428_v59 }
 0xa6d   : > { %2604 = vrsqrt.f32 %v1429_v60 }
 0xa77   : > { %v2605_v63 = vpop.eup %2604 }
 0xa78   : > { %v1431_v0 = vmul.f32 %v2605_v63, %v3672_v34 }
 0xa7a   : > { %v1439_v1 = vmul.f32 %v1437_v62, %v1431_v0  ;;  %v1919_v62 = vadd.f32 (!%p2237_p1), 1.0, %v1911_v58 }
 0xa7c   : > { %v1472_v2 = vpack.c.bf16 %v1439_v1, %v1439_v1  ;;  %v1924_v63 = vrot.slane (!%p2237_p1), %v1919_v62, %v3512_v29 }
 0xa7e   : > { %1666 = vmatmul.mubr.bf16.vlgmr.msra.gmra.mrb[24].mxu1 %v1472_v2  ;;  %1707 = vmatmul.mubr.bf16.vlgmr.msra.gmra.mrb[16].mxu0 %v1472_v2 }
 0xa7f   : > { %2272 = vmatpush3.bf16.msra.mxu1 %v2571_v6 }
 0xa80   : > { %2273 = vmatprep.subr.bf16.mxu1 %v2572_v7 }
 0xa83   : > { %2274 = vmatpush3.bf16.msra.mxu1 %v2573_v8 }
 0xa84   : > { %2275 = vmatprep.subr.bf16.mxu1 %v2574_v9 }
 0xa87   : > { %2276 = vmatpush3.bf16.msra.mxu1 %v2575_v10 }
 0xa88   : > { %2277 = vmatprep.subr.bf16.mxu1 %v2576_v12 }
 0xa8b   : > { %2278 = vmatpush3.bf16.msra.mxu1 %v2577_v13 }
 0xa8c   : > { %2279 = vmatprep.subr.bf16.mxu1 %v2578_v14 }
 0xa8f   : > { %2280 = vmatpush3.bf16.msra.mxu1 %v2579_v15 }
 0xa90   : > { %2281 = vmatprep.subr.bf16.mxu1 %v2580_v35 }
 0xa93   : > { %2282 = vmatpush3.bf16.msra.mxu1 %v2581_v16 }
 0xa94   : > { %2283 = vmatprep.subr.bf16.mxu1 %v2582_v17 }
 0xa97   : > { %2284 = vmatpush3.bf16.msra.mxu1 %v2583_v19 }
 0xa98   : > { %2285 = vmatprep.subr.bf16.mxu1 %v2584_v20 }
 0xa9b   : > { %2286 = vmatpush3.bf16.msra.mxu1 %v2585_v21 }
 0xb51   : > { %v1667_v22 = vpop.f32.mrb[24].mxu1  ;;  %v1708_v23 = vpop.f32.mrb[16].mxu0 }
 0xb52   : > { %v1717_v24 = vmul.f32 0.044715, %v1667_v22  ;;  %v1669_v25 = vpop.f32.mrb[25].mxu1  ;;  %v1710_v5 = vpop.f32.mrb[17].mxu0  ;;  %v1715_v3 = vmul.f32 0.5, %v1667_v22 }
 0xb53   : > { %v1718_v26 = vmul.f32 0.044715, %v1669_v25  ;;  %v1671_v27 = vpop.f32.mrb[26].mxu1  ;;  %v1712_v28 = vpop.f32.mrb[18].mxu0  ;;  %v1716_v46 = vmul.f32 0.5, %v1669_v25 }
 0xb54   : > { %v1719_v30 = vmul.f32 %v1717_v24, %v1667_v22  ;;  %v1672_v18 = vpop.f32.mrb[27].mxu1  ;;  %v1713_v31 = vpop.f32.mrb[19].mxu0 }
 0xb55   : > { %v1720_v33 = vmul.f32 %v1718_v26, %v1669_v25 }
 0xb56   : > { %v1721_v38 = vmul.f32 %v1719_v30, %v1667_v22 }
 0xb57   : > { %v1722_v39 = vmul.f32 %v1720_v33, %v1669_v25 }
 0xb58   : > { %v1723_v11 = vadd.f32 %v1721_v38, %v1667_v22 }
 0xb59   : > { %v1724_v40 = vadd.f32 %v1722_v39, %v1669_v25 }
 0xb5a   : > { %v1725_v41 = vmul.f32 0.7978846, %v1723_v11 }
 0xb5b   : > { %v1726_v42 = vmul.f32 0.7978846, %v1724_v40 }
 0xb5c   : > { %2606 = vtanh.f32 %v1725_v41 }
 0xb5d   : > { %2608 = vtanh.f32 %v1726_v42 }
 0xb66   : > { %v2607_v43 = vpop.eup %2606 }
 0xb67   : > { %v2609_v44 = vpop.eup %2608  ;;  %v1729_v45 = vadd.f32 1.0, %v2607_v43 }
 0xb68   : > { %v1730_v37 = vadd.f32 1.0, %v2609_v44 }
 0xb69   : > { %v1731_v47 = vmul.f32 %v1729_v45, %v1715_v3 }
 0xb6a   : > { %v1732_v48 = vmul.f32 %v1730_v37, %v1716_v46 }
 0xb6b   : > { %v1733_v49 = vmul.f32 %v1731_v47, %v1708_v23 }
 0xb6c   : > { %v1734_v50 = vmul.f32 %v1732_v48, %v1710_v5 }
 0xb6d   : > { %v1767_v51 = vpack.c.bf16 %v1733_v49, %v1733_v49 }
 0xb6e   : > { %v1768_v32 = vpack.c.bf16 %v1734_v50, %v1734_v50 }
 0xb70   : > { %1897 = vmatprep.mubr.bf16.mxu1 %v1768_v32 }
 0xb71   : > { %1898 = vmatmul.mubr.bf16.vlgmr.msra.gmra.mrb[28].mxu1 %v1767_v51 }
 0xc44   : > { %v2287_v52 = vpop.f32.mrb[28].mxu1  ;;  %1910 = sbr.rel (%p2237_p1) target bundleno = 3310 (0xcee), region = 108 }
 0xc45   : > { %v2288_v53 = vpop.f32.mrb[29].mxu1 }
 0xc46   : > { %v2289_v54 = vadd.f32 %v2288_v53, %v2287_v52  ;;  %v2290_v55 = vpop.f32.mrb[30].mxu1 }
 0xc47   : > { %v2291_v36 = vpop.f32.mrb[31].mxu1 }
 0xc48   : > { %v1905_v56 = vadd.f32 %v2289_v54, %v3672_v34 }
 0xc4a   : > { %1906 = vst [vmem:[#allocation2] sm:$0xff] %v1905_v56  ;;  %v1912_v57 = vmul.f32 (!%p2237_p1), %v1905_v56, %v1905_v56 }
 0xc4c   : > { %1913 = vadd.xlane.f32.xlu0 %v1912_v57 }
 0xcd9   : > { %v1914_v59 = vpop.xlane.xlu0 %1913 }
 0xcda   : > { %v1915_v60 = vmul.f32 0.0078125, %v1914_v59 }
 0xcdc   : > { %v1916_v61 = vadd.f32 1e-06, %v1915_v60 }
 0xcde   : > { %2610 = vrsqrt.f32 %v1916_v61 }
 0xce8   : > { %v2611_v0 = vpop.eup %2610 }
 0xce9   : > { %v1918_v1 = vmul.f32 %v2611_v0, %v1905_v56 }
 0xceb   : > { %v1926_v2 = vmul.f32 %v1924_v63, %v1918_v1 }
 0xced   : > { %1927 = vst [vmem:[#allocation20] sm:$0xff] %v1926_v2 }
 0xcee PF: > { %p2434_p6 = scmp.eq.s32.totalorder %s3092_s17, 1  ;;  %s3017_s16 = smov [#allocation20]  }
 0xcef   : > { %s1935_s15 = sshll.u32 %s3017_s16, 4  ;;  %s1936_s15 = int_to_ptr.vmem [resolvable:$true] %s1935_s15 }
 0xcf0   : > { %s2904_s30 = scalar_lea.vmem %s1936_s15, 128  ;;  %p2911_p0 = scmp.lt.s32.totalorder %s1936_s15, %s1936_s15 }
 0xcf1   : > { %p2905_p4 = scmp.ne.s32.totalorder %s1936_s15, %s2904_s30  ;;  %p2912_p5 = scmp.lt.s32.totalorder %s2904_s30, %s2904_s30 }
 0xcf3   : > { %p2906_p9 = pnand %p2905_p4, %p2434_p6  ;;  %p2913_p3 = por %p2912_p5, %p2911_p0 }
 0xcf5   : > { %p2907_p11 = pneg %p2906_p9 }
 0xcf7   : > { %p2914_p13 = pnand %p2913_p3, %p2907_p11 }
 0xcf9   : > { %2917 = shalt.err (!%p2914_p13)
}
 0xcfa   : > { %s3833_s19 = sld [smem:[#allocation37_spill]] }
 0xd00   : > { %s2918_s7 = scalar_lea.hbm %s3833_s19, 128 }
 0xd01   : > { %p2919_p7 = scmp.ne.s32.totalorder %s3833_s19, %s2918_s7  ;;  %p2924_p10 = scmp.lt.u32.totalorder %s2918_s7, %s3833_s19 }
 0xd03   : > { %p2920_p2 = pnand %p2919_p7, %p2434_p6 }
 0xd05   : > { %p2921_p8 = pneg %p2920_p2 }
 0xd07   : > { %p2926_p12 = pnand %p2924_p10, %p2921_p8 }
 0xd09   : > { %2929 = shalt.err (!%p2926_p12)
}
 0xd0a   : > { %2390 = dma.vmem_to_hbm [thread:$0]  (%p2434_p6), %s1936_s15, 128, %s3833_s19, [#allocation5]  }
 0xd0b   : > { %2971 = dma.done.wait (%p2434_p6), [#allocation5], 128  }
 0xd0c   : > { %2973 = vsyncadd (%p2434_p6), [#allocation5], 4294967168 }
 0xd0d PF: > { %s3834_s16 = sld [smem:[#allocation31_spill]]  ;;  %s3835_s13 = sld [smem:[#allocation28_spill]] }
 0xd0e   : > { %s3836_s14 = sld [smem:[#allocation29_spill]]  ;;  %s3837_s15 = sld [smem:[#allocation32_spill]] }
 0xd13   : > { %p30_p1 = scmp.ge.s32.totalorder %s3834_s16, 4  }
 0xd15   :  { %32 = sbr.rel (!%p30_p1) target bundleno = 17 (0x11), region = 181 }
 0xd1c   :  { %1948 = vsyncpa [#allocation4], 1 }
 0xd1d   :  { %1950 = vsyncpa [#allocation4 + $0x1], 1 }
 0xd1e   :  { %1951 = vsyncpa [#allocation7], 1 }
 0xd1f   :  { %1952 = vsyncpa [#allocation10], 1 }
 0xd20   :  { %1954 = vsyncpa [#allocation10 + $0x1], 1 }
 0xd21   :  { %1955 = vsyncpa [#allocation13], 1 }
 0xd22   :  { %1957 = vsyncpa [#allocation13 + $0x1], 1 }
 0xd23   :  { %1958 = vsyncpa [#allocation16], 1 }
 0xd24   :  { %1960 = vsyncpa [#allocation16 + $0x1], 1 }
 0xd25   :  { %1961 = vsyncpa [#allocation19], 1 }
 0xd26   :  { %1962 = vsyncpa [#allocation5], 1 }
 0xd27   :  { %1964 = vsyncpa [#allocation5 + $0x1], 1 }

// kernel: paligemma_forward.2
= control target key start
LH: loop header
LB: loop body
LE: loop exit
PB: predicated region body
PF: predicated region fallthrough
CT: control target
= control target key end

     0   :  { %s5435_s0 = inlined_call_operand.hbm [shape: f32[1,4,192], index: 0, kind: input, shape index: {}]   ;;  %s5436_s1 = inlined_call_operand.hbm [shape: bf16[192,128], index: 1, kind: input, shape index: {}]   ;;  %s5437_s2 = inlined_call_operand.hbm [shape: f32[1,128], index: 2, kind: input, shape index: {}]   ;;  %s5438_s3 = inlined_call_operand.hbm [shape: f32[4,128], index: 3, kind: input, shape index: {}]   ;;  %s5439_s4 = inlined_call_operand.hbm [shape: f32[2,1,128], index: 4, kind: input, shape index: {}]   ;;  %s5440_s5 = inlined_call_operand.hbm [shape: f32[2,1,128], index: 5, kind: input, shape index: {}]   ;;  %s5441_s6 = inlined_call_operand.hbm [shape: bf16[2,128,384], index: 6, kind: input, shape index: {}]   ;;  %s5442_s7 = inlined_call_operand.hbm [shape: f32[2,1,384], index: 7, kind: input, shape index: {}]   ;;  %s5443_s8 = inlined_call_operand.hbm [shape: bf16[2,128,128], index: 8, kind: input, shape index: {}]   ;;  %s5444_s9 = inlined_call_operand.hbm [shape: f32[2,1,128], index: 9, kind: input, shape index: {}]   ;;  %s5445_s10 = inlined_call_operand.hbm [shape: f32[2,1,128], index: 10, kind: input, shape index: {}]   ;;  %s5446_s11 = inlined_call_operand.hbm [shape: f32[2,1,128], index: 11, kind: input, shape index: {}]   ;;  %s5447_s12 = inlined_call_operand.hbm [shape: bf16[2,128,256], index: 12, kind: input, shape index: {}]   ;;  %s5448_s13 = inlined_call_operand.hbm [shape: f32[2,1,256], index: 13, kind: input, shape index: {}]   ;;  %s5449_s14 = inlined_call_operand.hbm [shape: bf16[2,256,128], index: 14, kind: input, shape index: {}]   ;;  %s5450_s15 = inlined_call_operand.hbm [shape: f32[2,1,128], index: 15, kind: input, shape index: {}]   ;;  %s5451_s16 = inlined_call_operand.hbm [shape: f32[1,128], index: 16, kind: input, shape index: {}]   ;;  %s5452_s17 = inlined_call_operand.hbm [shape: f32[1,128], index: 17, kind: input, shape index: {}]   ;;  %s5453_s18 = inlined_call_operand.hbm [shape: bf16[128,128], index: 18, kind: input, shape index: {}]   ;;  %s5454_s19 = inlined_call_operand.hbm [shape: f32[1,128], index: 19, kind: input, shape index: {}]   ;;  %s5455_s20 = inlined_call_operand.hbm [shape: bf16[1,4,128], index: 20, kind: output, shape index: {}]  }
   0x1   :  { %5502 = sst [smem:[#allocation46_spill]] %s5435_s0 }
   0x2   :  { %5503 = sst [smem:[#allocation47_spill]] %s5436_s1 }
   0x3   :  { %5504 = sst [smem:[#allocation48_spill]] %s5437_s2 }
   0x4   :  { %5505 = sst [smem:[#allocation49_spill]] %s5438_s3 }
   0x5   :  { %5506 = sst [smem:[#allocation50_spill]] %s5439_s4 }
   0x6   :  { %5507 = sst [smem:[#allocation51_spill]] %s5440_s5 }
   0x7   :  { %5508 = sst [smem:[#allocation52_spill]] %s5441_s6 }
   0x8   :  { %5509 = sst [smem:[#allocation53_spill]] %s5442_s7 }
   0x9   :  { %5510 = sst [smem:[#allocation54_spill]] %s5443_s8 }
   0xa   :  { %5511 = sst [smem:[#allocation55_spill]] %s5444_s9 }
   0xb   :  { %5512 = sst [smem:[#allocation56_spill]] %s5445_s10 }
   0xc   :  { %5513 = sst [smem:[#allocation57_spill]] %s5446_s11 }
   0xd   :  { %5514 = sst [smem:[#allocation58_spill]] %s5449_s14 }
   0xe   :  { %5515 = sst [smem:[#allocation59_spill]] %s5450_s15 }
   0xf   :  { %5516 = sst [smem:[#allocation60_spill]] %s5451_s16 }
  0x10   :  { %5517 = sst [smem:[#allocation61_spill]] %s5452_s17 }
  0x11   :  { %5518 = sst [smem:[#allocation62_spill]] %s5453_s18 }
  0x12   :  { %5519 = sst [smem:[#allocation63_spill]] %s5454_s19 }
  0x13   :  { %5520 = sst [smem:[#allocation64_spill]] %s5455_s20 }
  0x14   :  { %25 = vsyncpa [#allocation4], 0 }
  0x15   :  { %26 = vsyncpa [#allocation7], 0 }
  0x16   :  { %27 = vsyncpa [#allocation10], 0 }
  0x17   :  { %28 = vsyncpa [#allocation26], 0 }
  0x18   :  { %29 = vsyncpa [#allocation5], 0  ;;  %s4541_s1 = smov 0   ;;  %s4543_s22 = smov 0  }
  0x19   :  { %s4545_s23 = smov 0   ;;  %s4547_s24 = smov 0  }
  0x1a   :  { %s4549_s2 = smov 0   ;;  %s4551_s25 = smov 0  }
  0x1b LB: > { %5521 = sst [smem:[#allocation37_spill]] %s4382_s22  ;;  %s4570_s3 = sadd.s32 4294967295, %s4398_s25   ;;  %s4398_s25 = sphi %s4551_s25, %s35_s25   ;;  %s4394_s2 = sphi %s4549_s2, %s5606_s2   ;;  %s4390_s24 = sphi %s4547_s24, %s5605_s24   ;;  %s4386_s23 = sphi %s4545_s23, %s5603_s23   ;;  %s4382_s22 = sphi %s4543_s22, %s5602_s22   ;;  %s4378_s1 = sphi %s4541_s1, %s5601_s1  }
  0x1c   : > { %5522 = sst [smem:[#allocation38_spill]] %s4386_s23  ;;  %p156_p0 = scmp.ne.s32.totalorder %s4382_s22, %s4378_s1 }
  0x1d   : > { %5523 = sst [smem:[#allocation39_spill]] %s4390_s24  ;;  %p5470_p1 = scmp.eq.s32.totalorder %s4570_s3, 0 }
  0x1e   : > { %5524 = sst [smem:[#allocation40_spill]] %s4398_s25  ;;  %p3035_p2 = scmp.ge.s32.totalorder %s4398_s25, 1 }
  0x1f   : > { %5525 = sst [smem:[#allocation41_spill]] %s4570_s3  ;;  %p563_p3 = scmp.lt.s32.totalorder %s4398_s25, 3 }
  0x20   : > { %p4578_p4 = por %p5470_p1, %p156_p0  ;;  %s4400_s28 = smov [#allocation3]  }
  0x21   : > { %p4582_p5 = pnand %p3035_p2, %p563_p3  ;;  %s579_s4 = sshll.u32 %s4400_s28, 4  ;;  %s580_s4 = int_to_ptr.vmem [resolvable:$true] %s579_s4 }
  0x22   : > { %s5526_s26 = scalar_select %p4578_p4, 1, 0 }
  0x23   : > { %s5528_s27 = scalar_select %p4582_p5, 1, 0 }
  0x24   : > { %5527 = sst [smem:[#allocation42_spill]] %s5526_s26  ;;  %p3430_p6 = pneg %p4582_p5 }
  0x25   : > { %5529 = sst [smem:[#allocation43_spill]] %s5528_s27  ;;  %s44_s30 = sadd.s32 1, %s4394_s2 }
  0x26   : > { %p4590_p7 = pnand %p3430_p6, %p5470_p1  ;;  %p4596_p8 = scmp.ge.s32.totalorder %s44_s30, 2 }
  0x27   : > { %s5532_s24 = sld [smem:[#allocation46_spill]] }
  0x28   : > { %s5530_s29 = scalar_select %p4590_p7, 1, 0 }
  0x29   : > { %s5531_s21 = scalar_select %p4596_p8, 1, 0 }
  0x2a   : > { %p4608_p10 = pneg %p4590_p7 }
  0x2c   : > { %s5534_s3 = scalar_select %p4608_p10, 1, 0 }
  0x2d   : > { %s5533_s26 = smov %s5532_s24  ;;  %s3710_s15 = scalar_lea.hbm %s5532_s24, 128 }
  0x2e   : > { %p3711_p9 = scmp.ne.s32.totalorder %s5533_s26, %s3710_s15  ;;  %p3717_p13 = scmp.lt.u32.totalorder %s3710_s15, %s5533_s26 }
  0x30   : > { %p3713_p11 = pnand %p4608_p10, %p3711_p9 }
  0x32   : > { %p3714_p12 = pneg %p3713_p11 }
  0x34   : > { %p3719_p0 = pnand %p3717_p13, %p3714_p12 }
  0x36   : > { %3722 = shalt.err (!%p3719_p0)
}
  0x37   : > { %s3723_s20 = scalar_lea.vmem %s580_s4, 128  ;;  %p3731_p1 = scmp.lt.s32.totalorder %s580_s4, %s580_s4 }
  0x38   : > { %p3724_p2 = scmp.ne.s32.totalorder %s580_s4, %s3723_s20  ;;  %p3732_p4 = scmp.lt.s32.totalorder %s3723_s20, %s3723_s20 }
  0x3a   : > { %p3726_p3 = pnand %p3724_p2, %p4608_p10  ;;  %p3733_p5 = por %p3732_p4, %p3731_p1 }
  0x3c   : > { %p3727_p6 = pneg %p3726_p3 }
  0x3e   : > { %p3734_p8 = pnand %p3733_p5, %p3727_p6 }
  0x40   : > { %3737 = shalt.err (!%p3734_p8)
}
  0x41   : > { %3433 = dma.hbm_to_vmem [thread:$0]  (!%p4590_p7), %s5533_s26, 128, %s580_s4, [#allocation4]  }
  0x42   : > { %p5535_p1 = scmp.ne.s32.totalorder %s5531_s21, 0  ;;  %p150_p4 = scmp.ne.s32.totalorder %s4386_s23, %s4382_s22 }
  0x43   : > { %p151_p5 = scmp.eq.s32.totalorder %s4398_s25, 0  ;;  %p3500_p8 = scmp.lt.s32.totalorder %s4398_s25, 2 }
  0x44   : > { %s5608_s30 = smov (%p5535_p1, %s44_s30), 0  ;;  %s671_s27 = sand.u32 1, %s4398_s25  }
  0x45   : > { %5536 = sst [smem:[#allocation44_spill]] %s5608_s30  ;;  %s140_s15 = ssub.s32 %s4394_s2, %s5608_s30 }
  0x46   : > { %p141_p9 = scmp.eq.s32.totalorder %s140_s15, 0  ;;  %p152_p11 = por %p151_p5, %p150_p4 }
  0x47   : > { %s4636_s0 = sand.u32 1, %s4386_s23   ;;  %s5537_s1 = sadd.s32 1, %s4386_s23 }
  0x48   : > { %s4641_s28 = scalar_select %p141_p9, %s4386_s23, %s5537_s1  }
  0x49   : > { %s4644_s20 = sshll.u32 %s4394_s2, 4  ;;  %s674_s4 = scalar_lea.vmem [#allocation11], %s4636_s0 }
  0x4a   : > { %5538 = sst [smem:[#allocation45_spill]] %s4641_s28  ;;  %s681_s21 = sshll.u32 %s674_s4, 4  ;;  %s4653_s21 = int_to_ptr.vmem [resolvable:$true] %s681_s21 }
  0x4b   : > { %s5539_s26 = sld [smem:[#allocation50_spill]]  ;;  %p4655_p12 = pnand %p3500_p8, %p152_p11 }
  0x4c   : > { %s5541_s5 = sld [smem:[#allocation51_spill]]  ;;  %s691_s23 = scalar_lea.vmem [#allocation12], %s4636_s0 }
  0x4d   : > { %s5540_s15 = scalar_select %p4655_p12, 1, 0 }
  0x4e   : > { %s698_s19 = sshll.u32 %s691_s23, 4  ;;  %s4668_s24 = scalar_lea.sflag [#allocation4], %s671_s27  ;;  %s4666_s19 = int_to_ptr.vmem [resolvable:$true] %s698_s19 }
  0x4f   : > { %p4674_p0 = pneg %p4655_p12 }
  0x51   : > { %s4651_s30 = scalar_lea.hbm %s5539_s26, %s4644_s20  ;;  %s3743_s17 = scalar_lea.hbm %s5539_s26, 32 }
  0x52   : > { %s4663_s4 = scalar_lea.hbm %s5541_s5, %s4644_s20  ;;  %s3738_s25 = scalar_lea.hbm %s4651_s30, 16 }
  0x53   : > { %p3739_p13 = scmp.ne.s32.totalorder %s4651_s30, %s3738_s25  ;;  %p3744_p6 = scmp.lt.u32.totalorder %s4651_s30, %s5539_s26 }
  0x54   : > { %s5542_s22 = scalar_select %p4674_p0, 1, 0 }
  0x55   : > { %p3741_p2 = pnand %p4674_p0, %p3739_p13  ;;  %p3745_p1 = scmp.lt.u32.totalorder %s3743_s17, %s3738_s25 }
  0x56   : > { %p3747_p5 = scmp.lt.u32.totalorder %s3738_s25, %s4651_s30 }
  0x57   : > { %p3742_p3 = pneg %p3741_p2  ;;  %p3746_p4 = por %p3745_p1, %p3744_p6 }
  0x59   : > { %p3748_p8 = por %p3747_p5, %p3746_p4 }
  0x5b   : > { %p3749_p9 = pnand %p3748_p8, %p3742_p3 }
  0x5d   : > { %3752 = shalt.err (!%p3749_p9)
}
  0x5e   : > { %s3753_s27 = scalar_lea.vmem %s4653_s21, 16  ;;  %s4401_s28 = smov [#allocation11]  }
  0x5f   : > { %p3754_p11 = scmp.ne.s32.totalorder %s4653_s21, %s3753_s27  ;;  %s3758_s1 = sshll.u32 %s4401_s28, 4  ;;  %s3759_s1 = int_to_ptr.vmem [resolvable:$false] %s3758_s1 }
  0x60   : > { %s3760_s16 = scalar_lea.vmem %s3759_s1, 32  ;;  %p3761_p7 = scmp.lt.s32.totalorder %s4653_s21, %s3759_s1 }
  0x61   : > { %p3756_p13 = pnand %p3754_p11, %p4674_p0  ;;  %p3762_p10 = scmp.lt.s32.totalorder %s3760_s16, %s3753_s27 }
  0x63   : > { %p3757_p2 = pneg %p3756_p13  ;;  %p3763_p6 = por %p3762_p10, %p3761_p7 }
  0x65   : > { %p3764_p1 = pnand %p3763_p6, %p3757_p2 }
  0x67   : > { %3767 = shalt.err (!%p3764_p1)
}
  0x68   : > { %3458 = dma.hbm_to_vmem [thread:$0]  (!%p4655_p12), %s4651_s30, 16, %s4653_s21, %s4668_s24  }
  0x69   : > { %s3768_s17 = scalar_lea.hbm %s4663_s4, 16  ;;  %s3773_s27 = scalar_lea.hbm %s5541_s5, 32 }
  0x6a   : > { %p3769_p3 = scmp.ne.s32.totalorder %s4663_s4, %s3768_s17  ;;  %p3774_p7 = scmp.lt.u32.totalorder %s4663_s4, %s5541_s5 }
  0x6b   : > { %p3775_p10 = scmp.lt.u32.totalorder %s3773_s27, %s3768_s17  ;;  %p3777_p9 = scmp.lt.u32.totalorder %s3768_s17, %s4663_s4 }
  0x6c   : > { %p3771_p4 = pnand %p3769_p3, %p4674_p0 }
  0x6d   : > { %p3776_p8 = por %p3775_p10, %p3774_p7 }
  0x6e   : > { %p3772_p5 = pneg %p3771_p4 }
  0x6f   : > { %p3778_p11 = por %p3777_p9, %p3776_p8 }
  0x71   : > { %p3779_p13 = pnand %p3778_p11, %p3772_p5 }
  0x73   : > { %3782 = shalt.err (!%p3779_p13)
}
  0x74   : > { %s3783_s30 = scalar_lea.vmem %s4666_s19, 16  ;;  %s4402_s21 = smov [#allocation12]  }
  0x75   : > { %p3784_p2 = scmp.ne.s32.totalorder %s4666_s19, %s3783_s30  ;;  %s3788_s16 = sshll.u32 %s4402_s21, 4  ;;  %s3789_s16 = int_to_ptr.vmem [resolvable:$false] %s3788_s16 }
  0x76   : > { %s3790_s25 = scalar_lea.vmem %s3789_s16, 32  ;;  %p3791_p3 = scmp.lt.s32.totalorder %s4666_s19, %s3789_s16 }
  0x77   : > { %p3786_p6 = pnand %p3784_p2, %p4674_p0  ;;  %p3792_p4 = scmp.lt.s32.totalorder %s3790_s25, %s3783_s30 }
  0x79   : > { %p3787_p1 = pneg %p3786_p6  ;;  %p3793_p7 = por %p3792_p4, %p3791_p3 }
  0x7b   : > { %p3794_p10 = pnand %p3793_p7, %p3787_p1 }
  0x7d   : > { %3797 = shalt.err (!%p3794_p10)
}
  0x7e   : > { %3461 = dma.hbm_to_vmem [thread:$0]  (!%p4655_p12), %s4663_s4, 16, %s4666_s19, %s4668_s24  }
  0x7f   : > { %s3364_s17 = smul.u32 192, %s4636_s0  ;;  %s5543_s6 = sld [smem:[#allocation52_spill]] }
  0x80   : > { %s3365_s23 = smul.u32 3072, %s4394_s2 }
  0x81   : > { %s709_s21 = scalar_lea.vmem [#allocation13], %s3364_s17 }
  0x82   : > { %s716_s16 = sshll.u32 %s709_s21, 4  ;;  %s4728_s16 = int_to_ptr.vmem [resolvable:$true] %s716_s16 }
  0x85   : > { %s4726_s30 = scalar_lea.hbm %s5543_s6, %s3365_s23  ;;  %s3803_s27 = scalar_lea.hbm %s5543_s6, 6144 }
  0x86   : > { %s3798_s25 = scalar_lea.hbm %s4726_s30, 3072  ;;  %p3804_p11 = scmp.lt.u32.totalorder %s4726_s30, %s5543_s6 }
  0x87   : > { %p3799_p5 = scmp.ne.s32.totalorder %s4726_s30, %s3798_s25  ;;  %p3805_p13 = scmp.lt.u32.totalorder %s3803_s27, %s3798_s25 }
  0x88   : > { %p3807_p6 = scmp.lt.u32.totalorder %s3798_s25, %s4726_s30 }
  0x89   : > { %p3801_p8 = pnand %p3799_p5, %p4674_p0  ;;  %p3806_p2 = por %p3805_p13, %p3804_p11 }
  0x8b   : > { %p3802_p9 = pneg %p3801_p8  ;;  %p3808_p1 = por %p3807_p6, %p3806_p2 }
  0x8d   : > { %p3809_p3 = pnand %p3808_p1, %p3802_p9 }
  0x8f   : > { %3812 = shalt.err (!%p3809_p3)
}
  0x90   : > { %s3813_s17 = scalar_lea.vmem %s4728_s16, 3072  ;;  %s4403_s1 = smov [#allocation13]  }
  0x91   : > { %p3814_p4 = scmp.ne.s32.totalorder %s4728_s16, %s3813_s17  ;;  %s3818_s21 = sshll.u32 %s4403_s1, 4  ;;  %s3819_s21 = int_to_ptr.vmem [resolvable:$false] %s3818_s21 }
  0x92   : > { %s3820_s4 = scalar_lea.vmem %s3819_s21, 6144  ;;  %p3821_p5 = scmp.lt.s32.totalorder %s4728_s16, %s3819_s21 }
  0x93   : > { %p3816_p7 = pnand %p3814_p4, %p4674_p0  ;;  %p3822_p8 = scmp.lt.s32.totalorder %s3820_s4, %s3813_s17 }
  0x95   : > { %p3817_p10 = pneg %p3816_p7  ;;  %p3823_p11 = por %p3822_p8, %p3821_p5 }
  0x97   : > { %p3824_p13 = pnand %p3823_p11, %p3817_p10 }
  0x99   : > { %3827 = shalt.err (!%p3824_p13)
}
  0x9a   : > { %s4404_s27 = smov 192   ;;  %s4405_s25 = smov 12  }
  0x9b   : > { %3464 = dma.hbm_to_vmem [thread:$0]  (!%p4655_p12), %s4726_s30, 3072, %s4728_s16, %s4668_s24, %s4404_s27, %s4404_s27, %s4405_s25  }
  0x9c   : > { %s3367_s19 = smul.u32 48, %s4394_s2  ;;  %s5545_s7 = sld [smem:[#allocation53_spill]] }
  0x9d   : > { %s5544_s28 = smul.u32 3, %s4636_s0 }
  0x9f   : > { %s730_s23 = scalar_lea.vmem [#allocation14], %s5544_s28 }
  0xa0   : > { %s738_s1 = sshll.u32 %s730_s23, 4  ;;  %s739_s1 = int_to_ptr.vmem [resolvable:$true] %s738_s1 }
  0xa2   : > { %s736_s4 = scalar_lea.hbm %s5545_s7, %s3367_s19  ;;  %s3833_s18 = scalar_lea.hbm %s5545_s7, 96 }
  0xa3   : > { %s3828_s5 = scalar_lea.hbm %s736_s4, 48  ;;  %p3834_p1 = scmp.lt.u32.totalorder %s736_s4, %s5545_s7 }
  0xa4   : > { %p3829_p9 = scmp.ne.s32.totalorder %s736_s4, %s3828_s5  ;;  %p3835_p3 = scmp.lt.u32.totalorder %s3833_s18, %s3828_s5 }
  0xa5   : > { %p3837_p7 = scmp.lt.u32.totalorder %s3828_s5, %s736_s4 }
  0xa6   : > { %p3831_p2 = pnand %p3829_p9, %p4674_p0  ;;  %p3836_p4 = por %p3835_p3, %p3834_p1 }
  0xa8   : > { %p3832_p6 = pneg %p3831_p2  ;;  %p3838_p10 = por %p3837_p7, %p3836_p4 }
  0xaa   : > { %p3839_p5 = pnand %p3838_p10, %p3832_p6 }
  0xac   : > { %3842 = shalt.err (!%p3839_p5)
}
  0xad   : > { %s3843_s16 = scalar_lea.vmem %s739_s1, 48  ;;  %s4406_s27 = smov [#allocation14]  }
  0xae   : > { %p3844_p8 = scmp.ne.s32.totalorder %s739_s1, %s3843_s16  ;;  %s3848_s25 = sshll.u32 %s4406_s27, 4  ;;  %s3849_s25 = int_to_ptr.vmem [resolvable:$false] %s3848_s25 }
  0xaf   : > { %s3850_s6 = scalar_lea.vmem %s3849_s25, 96  ;;  %p3851_p9 = scmp.lt.s32.totalorder %s739_s1, %s3849_s25 }
  0xb0   : > { %p3846_p11 = pnand %p3844_p8, %p4674_p0  ;;  %p3852_p2 = scmp.lt.s32.totalorder %s3850_s6, %s3843_s16 }
  0xb2   : > { %p3847_p13 = pneg %p3846_p11  ;;  %p3853_p12 = por %p3852_p2, %p3851_p9 }
  0xb4   : > { %p3854_p1 = pnand %p3853_p12, %p3847_p13 }
  0xb6   : > { %3857 = shalt.err (!%p3854_p1)
}
  0xb7   : > { %p5546_p3 = scmp.ne.s32.totalorder %s5540_s15, 0  ;;  %s3049_s5 = sshll.u32 %s4636_s0, 6 }
  0xb8   : > { %s3187_s14 = sshll.u32 %s4394_s2, 10  ;;  %s5547_s8 = sld [smem:[#allocation54_spill]] }
  0xb9   : > { %3467 = dma.hbm_to_vmem [thread:$0]  (!%p5546_p3), %s736_s4, 48, %s739_s1, %s4668_s24  }
  0xba   : > { %s749_s28 = scalar_lea.vmem [#allocation15], %s3049_s5  ;;  %s5548_s9 = sld [smem:[#allocation55_spill]] }
  0xbb   : > { %s756_s23 = sshll.u32 %s749_s28, 4  ;;  %s4778_s23 = int_to_ptr.vmem [resolvable:$true] %s756_s23 }
  0xbe   : > { %s4776_s19 = scalar_lea.hbm %s5547_s8, %s3187_s14  ;;  %s3863_s27 = scalar_lea.hbm %s5547_s8, 2048 }
  0xbf   : > { %s3858_s1 = scalar_lea.hbm %s4776_s19, 1024  ;;  %p3864_p7 = scmp.lt.u32.totalorder %s4776_s19, %s5547_s8 }
  0xc0   : > { %s4784_s30 = scalar_lea.hbm %s5548_s9, %s4644_s20  ;;  %p3859_p12 = scmp.ne.s32.totalorder %s4776_s19, %s3858_s1 }
  0xc1   : > { %p3865_p10 = scmp.lt.u32.totalorder %s3863_s27, %s3858_s1  ;;  %p3867_p8 = scmp.lt.u32.totalorder %s3858_s1, %s4776_s19 }
  0xc2   : > { %p3861_p6 = pnand %p3859_p12, %p4674_p0 }
  0xc3   : > { %p3866_p5 = por %p3865_p10, %p3864_p7 }
  0xc4   : > { %p3862_p4 = pneg %p3861_p6 }
  0xc5   : > { %p3868_p11 = por %p3867_p8, %p3866_p5 }
  0xc7   : > { %p3869_p13 = pnand %p3868_p11, %p3862_p4 }
  0xc9   : > { %3872 = shalt.err (!%p3869_p13)
}
  0xca   : > { %s3873_s5 = scalar_lea.vmem %s4778_s23, 1024  ;;  %s4407_s14 = smov [#allocation15]  }
  0xcb   : > { %p3874_p9 = scmp.ne.s32.totalorder %s4778_s23, %s3873_s5  ;;  %s3878_s18 = sshll.u32 %s4407_s14, 4  ;;  %s3879_s18 = int_to_ptr.vmem [resolvable:$false] %s3878_s18 }
  0xcc   : > { %s3880_s26 = scalar_lea.vmem %s3879_s18, 2048  ;;  %p3881_p12 = scmp.lt.s32.totalorder %s4778_s23, %s3879_s18 }
  0xcd   : > { %p3876_p2 = pnand %p3874_p9, %p4674_p0  ;;  %p3882_p6 = scmp.lt.s32.totalorder %s3880_s26, %s3873_s5 }
  0xcf   : > { %p3877_p1 = pneg %p3876_p2  ;;  %p3883_p7 = por %p3882_p6, %p3881_p12 }
  0xd1   : > { %p3884_p10 = pnand %p3883_p7, %p3877_p1 }
  0xd3   : > { %3887 = shalt.err (!%p3884_p10)
}
  0xd4   : > { %s5492_s28 = smov 64   ;;  %s5494_s17 = smov 4  }
  0xd5   : > { %3470 = dma.hbm_to_vmem [thread:$0]  (!%p5546_p3), %s4776_s19, 1024, %s4778_s23, %s4668_s24, %s5492_s28, %s5492_s28, %s5494_s17  }
  0xd6   : > { %s769_s21 = scalar_lea.vmem [#allocation16], %s4636_s0  ;;  %s5549_s10 = sld [smem:[#allocation56_spill]] }
  0xd7   : > { %s776_s1 = sshll.u32 %s769_s21, 4  ;;  %s3888_s25 = scalar_lea.hbm %s4784_s30, 16  ;;  %s777_s1 = int_to_ptr.vmem [resolvable:$true] %s776_s1 }
  0xd8   : > { %p3889_p4 = scmp.ne.s32.totalorder %s4784_s30, %s3888_s25  ;;  %s3893_s14 = scalar_lea.hbm %s5548_s9, 32 }
  0xd9   : > { %p3894_p11 = scmp.lt.u32.totalorder %s4784_s30, %s5548_s9  ;;  %p3895_p13 = scmp.lt.u32.totalorder %s3893_s14, %s3888_s25 }
  0xda   : > { %p3891_p5 = pnand %p3889_p4, %p4674_p0  ;;  %p3897_p2 = scmp.lt.u32.totalorder %s3888_s25, %s4784_s30 }
  0xdb   : > { %p3896_p9 = por %p3895_p13, %p3894_p11 }
  0xdc   : > { %s4816_s27 = scalar_lea.hbm %s5549_s10, %s4644_s20  ;;  %p3892_p8 = pneg %p3891_p5 }
  0xdd   : > { %p3898_p1 = por %p3897_p2, %p3896_p9 }
  0xdf   : > { %p3899_p12 = pnand %p3898_p1, %p3892_p8 }
  0xe1   : > { %3902 = shalt.err (!%p3899_p12)
}
  0xe2   : > { %s3903_s19 = scalar_lea.vmem %s777_s1, 16  ;;  %s4410_s23 = smov [#allocation16]  }
  0xe3   : > { %p3904_p6 = scmp.ne.s32.totalorder %s777_s1, %s3903_s19  ;;  %s3908_s21 = sshll.u32 %s4410_s23, 4  ;;  %s3909_s21 = int_to_ptr.vmem [resolvable:$false] %s3908_s21 }
  0xe4   : > { %s3910_s4 = scalar_lea.vmem %s3909_s21, 32  ;;  %p3911_p4 = scmp.lt.s32.totalorder %s777_s1, %s3909_s21 }
  0xe5   : > { %p3906_p7 = pnand %p3904_p6, %p4674_p0  ;;  %p3912_p5 = scmp.lt.s32.totalorder %s3910_s4, %s3903_s19 }
  0xe7   : > { %p3907_p10 = pneg %p3906_p7  ;;  %p3913_p3 = por %p3912_p5, %p3911_p4 }
  0xe9   : > { %p3914_p11 = pnand %p3913_p3, %p3907_p10 }
  0xeb   : > { %3917 = shalt.err (!%p3914_p11)
}
  0xec   : > { %p5550_p13 = scmp.ne.s32.totalorder %s5540_s15, 0  ;;  %s786_s16 = scalar_lea.vmem [#allocation17], %s4636_s0 }
  0xed   : > { %s793_s25 = sshll.u32 %s786_s16, 4  ;;  %s5551_s11 = sld [smem:[#allocation57_spill]]  ;;  %s794_s25 = int_to_ptr.vmem [resolvable:$true] %s793_s25 }
  0xee   : > { %3473 = dma.hbm_to_vmem [thread:$0]  (!%p5550_p13), %s4784_s30, 16, %s777_s1, %s4668_s24  }
  0xef   : > { %s3918_s18 = scalar_lea.hbm %s4816_s27, 16  ;;  %s3923_s23 = scalar_lea.hbm %s5549_s10, 32 }
  0xf0   : > { %p3919_p3 = scmp.ne.s32.totalorder %s4816_s27, %s3918_s18  ;;  %p3924_p2 = scmp.lt.u32.totalorder %s4816_s27, %s5549_s10 }
  0xf1   : > { %p3925_p1 = scmp.lt.u32.totalorder %s3923_s23, %s3918_s18  ;;  %p3927_p6 = scmp.lt.u32.totalorder %s3918_s18, %s4816_s27 }
  0xf2   : > { %p3921_p8 = pnand %p3919_p3, %p4674_p0 }
  0xf3   : > { %s4841_s14 = scalar_lea.hbm %s5551_s11, %s4644_s20  ;;  %p3926_p12 = por %p3925_p1, %p3924_p2 }
  0xf4   : > { %p3922_p9 = pneg %p3921_p8 }
  0xf5   : > { %p3928_p7 = por %p3927_p6, %p3926_p12 }
  0xf7   : > { %p3929_p10 = pnand %p3928_p7, %p3922_p9 }
  0xf9   : > { %3932 = shalt.err (!%p3929_p10)
}
  0xfa   : > { %s3933_s30 = scalar_lea.vmem %s794_s25, 16  ;;  %s4411_s1 = smov [#allocation17]  }
  0xfb   : > { %p3934_p4 = scmp.ne.s32.totalorder %s794_s25, %s3933_s30  ;;  %s3938_s16 = sshll.u32 %s4411_s1, 4  ;;  %s3939_s16 = int_to_ptr.vmem [resolvable:$false] %s3938_s16 }
  0xfc   : > { %s3940_s6 = scalar_lea.vmem %s3939_s16, 32  ;;  %p3941_p3 = scmp.lt.s32.totalorder %s794_s25, %s3939_s16 }
  0xfd   : > { %p3936_p5 = pnand %p3934_p4, %p4674_p0  ;;  %p3942_p8 = scmp.lt.s32.totalorder %s3940_s6, %s3933_s30 }
  0xff   : > { %p3937_p11 = pneg %p3936_p5  ;;  %p3943_p13 = por %p3942_p8, %p3941_p3 }
 0x101   : > { %p3944_p1 = pnand %p3943_p13, %p3937_p11 }
 0x103   : > { %3947 = shalt.err (!%p3944_p1)
}
 0x104   : > { %p5552_p2 = scmp.ne.s32.totalorder %s5540_s15, 0  ;;  %s803_s5 = scalar_lea.vmem [#allocation18], %s4636_s0 }
 0x105   : > { %s810_s18 = sshll.u32 %s803_s5, 4  ;;  %s5490_s26 = sshll.u32 %s4636_s0, 7  ;;  %s811_s18 = int_to_ptr.vmem [resolvable:$true] %s810_s18 }
 0x106   : > { %3476 = dma.hbm_to_vmem [thread:$0]  (!%p5552_p2), %s4816_s27, 16, %s794_s25, %s4668_s24  }
 0x107   : > { %s3948_s19 = scalar_lea.hbm %s4841_s14, 16  ;;  %s3953_s4 = scalar_lea.hbm %s5551_s11, 32 }
 0x108   : > { %p3949_p9 = scmp.ne.s32.totalorder %s4841_s14, %s3948_s19  ;;  %p3954_p6 = scmp.lt.u32.totalorder %s4841_s14, %s5551_s11 }
 0x109   : > { %p3955_p7 = scmp.lt.u32.totalorder %s3953_s4, %s3948_s19  ;;  %p3957_p4 = scmp.lt.u32.totalorder %s3948_s19, %s4841_s14 }
 0x10a   : > { %p3951_p13 = pnand %p3949_p9, %p4674_p0 }
 0x10b   : > { %p3956_p10 = por %p3955_p7, %p3954_p6 }
 0x10c   : > { %p3952_p12 = pneg %p3951_p13 }
 0x10d   : > { %p3958_p5 = por %p3957_p4, %p3956_p10 }
 0x10f   : > { %p3959_p11 = pnand %p3958_p5, %p3952_p12 }
 0x111   : > { %3962 = shalt.err (!%p3959_p11)
}
 0x112   : > { %s3963_s27 = scalar_lea.vmem %s811_s18, 16  ;;  %s4412_s25 = smov [#allocation18]  }
 0x113   : > { %p3964_p3 = scmp.ne.s32.totalorder %s811_s18, %s3963_s27  ;;  %s3968_s16 = sshll.u32 %s4412_s25, 4  ;;  %s3969_s16 = int_to_ptr.vmem [resolvable:$false] %s3968_s16 }
 0x114   : > { %s3970_s6 = scalar_lea.vmem %s3969_s16, 32  ;;  %p3971_p9 = scmp.lt.s32.totalorder %s811_s18, %s3969_s16 }
 0x115   : > { %p3966_p8 = pnand %p3964_p3, %p4674_p0  ;;  %p3972_p13 = scmp.lt.s32.totalorder %s3970_s6, %s3963_s27 }
 0x117   : > { %p3967_p1 = pneg %p3966_p8  ;;  %p3973_p2 = por %p3972_p13, %p3971_p9 }
 0x119   : > { %p3974_p6 = pnand %p3973_p2, %p3967_p1 }
 0x11b   : > { %3977 = shalt.err (!%p3974_p6)
}
 0x11c   : > { %p5553_p7 = scmp.ne.s32.totalorder %s5540_s15, 0  ;;  %s5491_s5 = sshll.u32 %s4394_s2, 11 }
 0x11d   : > { %s821_s19 = scalar_lea.vmem [#allocation19], %s5490_s26  ;;  %s4889_s30 = scalar_lea.hbm %s5447_s12, %s5491_s5 }
 0x11e   : > { %3479 = dma.hbm_to_vmem [thread:$0]  (!%p5553_p7), %s4841_s14, 16, %s811_s18, %s4668_s24  }
 0x11f   : > { %s828_s23 = sshll.u32 %s821_s19, 4  ;;  %s3978_s1 = scalar_lea.hbm %s4889_s30, 2048  ;;  %s4891_s23 = int_to_ptr.vmem [resolvable:$true] %s828_s23 }
 0x120   : > { %p3979_p2 = scmp.ne.s32.totalorder %s4889_s30, %s3978_s1  ;;  %s3983_s27 = scalar_lea.hbm %s5447_s12, 4096 }
 0x121   : > { %p3984_p4 = scmp.lt.u32.totalorder %s4889_s30, %s5447_s12  ;;  %p3985_p5 = scmp.lt.u32.totalorder %s3983_s27, %s3978_s1 }
 0x122   : > { %p3981_p12 = pnand %p3979_p2, %p4674_p0  ;;  %p3987_p3 = scmp.lt.u32.totalorder %s3978_s1, %s4889_s30 }
 0x123   : > { %p3986_p11 = por %p3985_p5, %p3984_p4 }
 0x124   : > { %p3982_p10 = pneg %p3981_p12 }
 0x125   : > { %p3988_p8 = por %p3987_p3, %p3986_p11 }
 0x127   : > { %p3989_p1 = pnand %p3988_p8, %p3982_p10 }
 0x129   : > { %3992 = shalt.err (!%p3989_p1)
}
 0x12a   : > { %s3993_s6 = scalar_lea.vmem %s4891_s23, 2048  ;;  %s4413_s19 = smov [#allocation19]  }
 0x12b   : > { %p3994_p9 = scmp.ne.s32.totalorder %s4891_s23, %s3993_s6  ;;  %s3998_s21 = sshll.u32 %s4413_s19, 4  ;;  %s3999_s21 = int_to_ptr.vmem [resolvable:$false] %s3998_s21 }
 0x12c   : > { %s4000_s4 = scalar_lea.vmem %s3999_s21, 4096  ;;  %p4001_p2 = scmp.lt.s32.totalorder %s4891_s23, %s3999_s21 }
 0x12d   : > { %p3996_p13 = pnand %p3994_p9, %p4674_p0  ;;  %p4002_p12 = scmp.lt.s32.totalorder %s4000_s4, %s3993_s6 }
 0x12f   : > { %p3997_p6 = pneg %p3996_p13  ;;  %p4003_p4 = por %p4002_p12, %p4001_p2 }
 0x131   : > { %p4004_p5 = pnand %p4003_p4, %p3997_p6 }
 0x133   : > { %4007 = shalt.err (!%p4004_p5)
}
 0x134   : > { %s4414_s1 = smov 128   ;;  %s4415_s14 = smov 8  }
 0x135   : > { %3482 = dma.hbm_to_vmem [thread:$0]  (!%p5553_p7), %s4889_s30, 2048, %s4891_s23, %s4668_s24, %s4414_s1, %s4414_s1, %s4415_s14  }
 0x136   : > { %s3058_s18 = sshll.u32 %s4636_s0, 1  ;;  %s4416_s27 = smov [#allocation6]  }
 0x137   : > { %s589_s25 = sshll.u32 %s4416_s27, 4  ;;  %s3189_s16 = sshll.u32 %s4394_s2, 5  ;;  %s590_s25 = int_to_ptr.vmem [resolvable:$true] %s589_s25 }
 0x138   : > { %s5554_s21 = sld [smem:[#allocation47_spill]]  ;;  %p5555_p11 = scmp.ne.s32.totalorder %s5534_s3, 0 }
 0x13e   : > { %s4008_s4 = scalar_lea.hbm %s5554_s21, 1536 }
 0x13f   : > { %p4009_p10 = scmp.ne.s32.totalorder %s5554_s21, %s4008_s4  ;;  %p4015_p1 = scmp.lt.u32.totalorder %s4008_s4, %s5554_s21 }
 0x141   : > { %p4011_p3 = pnand %p4009_p10, %p5555_p11 }
 0x143   : > { %p4012_p8 = pneg %p4011_p3 }
 0x145   : > { %p4017_p9 = pnand %p4015_p1, %p4012_p8 }
 0x147   : > { %4020 = shalt.err (!%p4017_p9)
}
 0x148   : > { %s4021_s23 = scalar_lea.vmem %s590_s25, 1536  ;;  %p4029_p12 = scmp.lt.s32.totalorder %s590_s25, %s590_s25 }
 0x149   : > { %p4022_p13 = scmp.ne.s32.totalorder %s590_s25, %s4021_s23  ;;  %p4030_p4 = scmp.lt.s32.totalorder %s4021_s23, %s4021_s23 }
 0x14b   : > { %p4024_p6 = pnand %p4022_p13, %p5555_p11  ;;  %p4031_p5 = por %p4030_p4, %p4029_p12 }
 0x14d   : > { %p4025_p2 = pneg %p4024_p6 }
 0x14f   : > { %p4032_p7 = pnand %p4031_p5, %p4025_p2 }
 0x151   : > { %4035 = shalt.err (!%p4032_p7)
}
 0x152   : > { %p5556_p10 = scmp.ne.s32.totalorder %s5530_s29, 0  ;;  %s5557_s26 = smov 4  }
 0x153   : > { %s5558_s5 = smov 64   ;;  %s4941_s14 = scalar_lea.hbm %s5448_s13, %s3189_s16 }
 0x154   : > { %3436 = dma.hbm_to_vmem [thread:$0]  (!%p5556_p10), %s5554_s21, 1536, %s590_s25, [#allocation7], %s5558_s5, %s5558_s5, %s5557_s26  }
 0x155   : > { %s842_s27 = scalar_lea.vmem [#allocation20], %s3058_s18  ;;  %s4036_s19 = scalar_lea.hbm %s4941_s14, 32 }
 0x156   : > { %s850_s6 = sshll.u32 %s842_s27, 4  ;;  %p4037_p7 = scmp.ne.s32.totalorder %s4941_s14, %s4036_s19  ;;  %s851_s6 = int_to_ptr.vmem [resolvable:$true] %s850_s6 }
 0x157   : > { %s4041_s25 = scalar_lea.hbm %s5448_s13, 64  ;;  %p4042_p1 = scmp.lt.u32.totalorder %s4941_s14, %s5448_s13 }
 0x158   : > { %p4039_p3 = pnand %p4037_p7, %p4674_p0  ;;  %p4043_p9 = scmp.lt.u32.totalorder %s4041_s25, %s4036_s19 }
 0x159   : > { %p4045_p6 = scmp.lt.u32.totalorder %s4036_s19, %s4941_s14 }
 0x15a   : > { %p4040_p8 = pneg %p4039_p3  ;;  %p4044_p13 = por %p4043_p9, %p4042_p1 }
 0x15c   : > { %p4046_p2 = por %p4045_p6, %p4044_p13 }
 0x15e   : > { %p4047_p12 = pnand %p4046_p2, %p4040_p8 }
 0x160   : > { %4050 = shalt.err (!%p4047_p12)
}
 0x161   : > { %s4051_s18 = scalar_lea.vmem %s851_s6, 32  ;;  %s4417_s16 = smov [#allocation20]  }
 0x162   : > { %p4052_p4 = scmp.ne.s32.totalorder %s851_s6, %s4051_s18  ;;  %s4056_s30 = sshll.u32 %s4417_s16, 4  ;;  %s4057_s30 = int_to_ptr.vmem [resolvable:$false] %s4056_s30 }
 0x163   : > { %s4058_s1 = scalar_lea.vmem %s4057_s30, 64  ;;  %p4059_p3 = scmp.lt.s32.totalorder %s851_s6, %s4057_s30 }
 0x164   : > { %p4054_p5 = pnand %p4052_p4, %p4674_p0  ;;  %p4060_p10 = scmp.lt.s32.totalorder %s4058_s1, %s4051_s18 }
 0x166   : > { %p4055_p7 = pneg %p4054_p5  ;;  %p4061_p11 = por %p4060_p10, %p4059_p3 }
 0x168   : > { %p4062_p1 = pnand %p4061_p11, %p4055_p7 }
 0x16a   : > { %4065 = shalt.err (!%p4062_p1)
}
 0x16b   : > { %p5559_p9 = scmp.ne.s32.totalorder %s5540_s15, 0  ;;  %s4418_s27 = smov [#allocation8]  }
 0x16c   : > { %s603_s19 = sshll.u32 %s4418_s27, 4  ;;  %s4419_s4 = smov [#allocation9]   ;;  %s604_s19 = int_to_ptr.vmem [resolvable:$true] %s603_s19 }
 0x16d   : > { %3485 = dma.hbm_to_vmem [thread:$0]  (!%p5559_p9), %s4941_s14, 32, %s851_s6, %s4668_s24  }
 0x16e   : > { %s614_s23 = sshll.u32 %s4419_s4, 4  ;;  %s5560_s17 = sld [smem:[#allocation48_spill]]  ;;  %s615_s23 = int_to_ptr.vmem [resolvable:$true] %s614_s23 }
 0x16f   : > { %p5561_p10 = scmp.ne.s32.totalorder %s5534_s3, 0 }
 0x174   : > { %s4066_s16 = scalar_lea.hbm %s5560_s17, 16 }
 0x175   : > { %p4067_p11 = scmp.ne.s32.totalorder %s5560_s17, %s4066_s16  ;;  %p4073_p6 = scmp.lt.u32.totalorder %s4066_s16, %s5560_s17 }
 0x177   : > { %p4069_p8 = pnand %p4067_p11, %p5561_p10 }
 0x179   : > { %p4070_p13 = pneg %p4069_p8 }
 0x17b   : > { %p4075_p2 = pnand %p4073_p6, %p4070_p13 }
 0x17d   : > { %4078 = shalt.err (!%p4075_p2)
}
 0x17e   : > { %s4079_s14 = scalar_lea.vmem %s604_s19, 16  ;;  %s4086_s6 = scalar_lea.vmem %s604_s19, 32 }
 0x17f   : > { %p4080_p12 = scmp.ne.s32.totalorder %s604_s19, %s4079_s14  ;;  %p4087_p7 = scmp.lt.s32.totalorder %s604_s19, %s604_s19 }
 0x180   : > { %p4088_p3 = scmp.lt.s32.totalorder %s4086_s6, %s4079_s14 }
 0x181   : > { %p4082_p4 = pnand %p4080_p12, %p5561_p10 }
 0x182   : > { %p4089_p1 = por %p4088_p3, %p4087_p7 }
 0x183   : > { %p4083_p5 = pneg %p4082_p4 }
 0x185   : > { %p4090_p9 = pnand %p4089_p1, %p4083_p5 }
 0x187   : > { %4093 = shalt.err (!%p4090_p9)
}
 0x188   : > { %p5562_p11 = scmp.ne.s32.totalorder %s5530_s29, 0  ;;  %s5563_s28 = sld [smem:[#allocation49_spill]] }
 0x18a   : > { %3439 = dma.hbm_to_vmem [thread:$0]  (!%p5562_p11), %s5560_s17, 16, %s604_s19, [#allocation7]  }
 0x18e   : > { %s4094_s16 = scalar_lea.hbm %s5563_s28, 64 }
 0x18f   : > { %p4095_p8 = scmp.ne.s32.totalorder %s5563_s28, %s4094_s16  ;;  %p4101_p9 = scmp.lt.u32.totalorder %s4094_s16, %s5563_s28 }
 0x191   : > { %p4097_p13 = pnand %p4095_p8, %p5561_p10 }
 0x193   : > { %p4098_p6 = pneg %p4097_p13 }
 0x195   : > { %p4103_p2 = pnand %p4101_p9, %p4098_p6 }
 0x197   : > { %4106 = shalt.err (!%p4103_p2)
}
 0x198   : > { %s4107_s6 = scalar_lea.vmem %s615_s23, 64  ;;  %p4115_p7 = scmp.lt.s32.totalorder %s615_s23, %s615_s23 }
 0x199   : > { %p4108_p12 = scmp.ne.s32.totalorder %s615_s23, %s4107_s6  ;;  %p4116_p3 = scmp.lt.s32.totalorder %s4107_s6, %s4107_s6 }
 0x19b   : > { %p4110_p4 = pnand %p4108_p12, %p5561_p10  ;;  %p4117_p1 = por %p4116_p3, %p4115_p7 }
 0x19d   : > { %p4111_p5 = pneg %p4110_p4 }
 0x19f   : > { %p4118_p0 = pnand %p4117_p1, %p4111_p5 }
 0x1a1   : > { %4121 = shalt.err (!%p4118_p0)
}
 0x1a2   : > { %3442 = dma.hbm_to_vmem [thread:$0]  (!%p5562_p11), %s5563_s28, 64, %s615_s23, [#allocation10]  }
 0x1a3   : > { %s4420_s4 = smov [#allocation25]   ;;  %s5564_s25 = sshll.u32 %s4394_s2, 11 }
 0x1a4   : > { %s646_s7 = sshll.u32 %s4420_s4, 4  ;;  %s5565_s18 = sld [smem:[#allocation58_spill]]  ;;  %s647_s7 = int_to_ptr.vmem [resolvable:$true] %s646_s7 }
 0x1a5   : > { %s5566_s8 = sld [smem:[#allocation62_spill]] }
 0x1aa   : > { %s5002_s1 = scalar_lea.hbm %s5565_s18, %s5564_s25 }
 0x1ab   : > { %s4122_s9 = scalar_lea.hbm %s5566_s8, 1024 }
 0x1ac   : > { %p4123_p0 = scmp.ne.s32.totalorder %s5566_s8, %s4122_s9  ;;  %p4129_p6 = scmp.lt.u32.totalorder %s4122_s9, %s5566_s8 }
 0x1ae   : > { %p4125_p8 = pnand %p4123_p0, %p5561_p10 }
 0x1b0   : > { %p4126_p13 = pneg %p4125_p8 }
 0x1b2   : > { %p4131_p9 = pnand %p4129_p6, %p4126_p13 }
 0x1b4   : > { %4134 = shalt.err (!%p4131_p9)
}
 0x1b5   : > { %s4135_s27 = scalar_lea.vmem %s647_s7, 1024  ;;  %p4143_p5 = scmp.lt.s32.totalorder %s647_s7, %s647_s7 }
 0x1b6   : > { %p4136_p2 = scmp.ne.s32.totalorder %s647_s7, %s4135_s27  ;;  %p4144_p7 = scmp.lt.s32.totalorder %s4135_s27, %s4135_s27 }
 0x1b8   : > { %p4138_p12 = pnand %p4136_p2, %p5561_p10  ;;  %p4145_p3 = por %p4144_p7, %p4143_p5 }
 0x1ba   : > { %p4139_p4 = pneg %p4138_p12 }
 0x1bc   : > { %p4146_p1 = pnand %p4145_p3, %p4139_p4 }
 0x1be   : > { %4149 = shalt.err (!%p4146_p1)
}
 0x1bf   : > { %3451 = dma.hbm_to_vmem [thread:$0]  (!%p5562_p11), %s5566_s8, 1024, %s647_s7, [#allocation26], %s5558_s5, %s5558_s5, %s5557_s26  }
 0x1c0   : > { %s5567_s11 = sshll.u32 %s4636_s0, 7  ;;  %s4421_s16 = smov [#allocation23]  }
 0x1c1   : > { %s861_s4 = scalar_lea.vmem [#allocation21], %s5567_s11  ;;  %s5029_s30 = sshll.u32 %s4421_s16, 4  ;;  %s626_s30 = int_to_ptr.vmem [resolvable:$true] %s5029_s30 }
 0x1c2   : > { %s868_s25 = sshll.u32 %s861_s4, 4  ;;  %s4150_s14 = scalar_lea.hbm %s5002_s1, 2048  ;;  %s5027_s25 = int_to_ptr.vmem [resolvable:$true] %s868_s25 }
 0x1c3   : > { %p4151_p0 = scmp.ne.s32.totalorder %s5002_s1, %s4150_s14  ;;  %p5568_p8 = scmp.ne.s32.totalorder %s5542_s22, 0 }
 0x1c4   : > { %s4155_s19 = scalar_lea.hbm %s5565_s18, 4096  ;;  %p4156_p9 = scmp.lt.u32.totalorder %s5002_s1, %s5565_s18 }
 0x1c5   : > { %p4153_p13 = pnand %p4151_p0, %p5568_p8  ;;  %p4157_p2 = scmp.lt.u32.totalorder %s4155_s19, %s4150_s14 }
 0x1c6   : > { %p4159_p4 = scmp.lt.u32.totalorder %s4150_s14, %s5002_s1 }
 0x1c7   : > { %p4154_p6 = pneg %p4153_p13  ;;  %p4158_p12 = por %p4157_p2, %p4156_p9 }
 0x1c9   : > { %p4160_p5 = por %p4159_p4, %p4158_p12 }
 0x1cb   : > { %p4161_p7 = pnand %p4160_p5, %p4154_p6 }
 0x1cd   : > { %4164 = shalt.err (!%p4161_p7)
}
 0x1ce   : > { %s4165_s7 = scalar_lea.vmem %s5027_s25, 2048  ;;  %s4422_s9 = smov [#allocation21]  }
 0x1cf   : > { %p4166_p3 = scmp.ne.s32.totalorder %s5027_s25, %s4165_s7  ;;  %s4170_s11 = sshll.u32 %s4422_s9, 4  ;;  %s4171_s11 = int_to_ptr.vmem [resolvable:$false] %s4170_s11 }
 0x1d0   : > { %s4172_s4 = scalar_lea.vmem %s4171_s11, 4096  ;;  %p4173_p13 = scmp.lt.s32.totalorder %s5027_s25, %s4171_s11 }
 0x1d1   : > { %p4168_p1 = pnand %p4166_p3, %p5568_p8  ;;  %p4174_p11 = scmp.lt.s32.totalorder %s4172_s4, %s4165_s7 }
 0x1d3   : > { %p4169_p0 = pneg %p4168_p1  ;;  %p4175_p9 = por %p4174_p11, %p4173_p13 }
 0x1d5   : > { %p4176_p2 = pnand %p4175_p9, %p4169_p0 }
 0x1d7   : > { %4179 = shalt.err (!%p4176_p2)
}
 0x1d8   : > { %p5569_p6 = scmp.ne.s32.totalorder %s5540_s15, 0  ;;  %s5570_s6 = sld [smem:[#allocation60_spill]] }
 0x1da   : > { %3488 = dma.hbm_to_vmem [thread:$0]  (!%p5569_p6), %s5002_s1, 2048, %s5027_s25, %s4668_s24, %s5558_s5, %s5558_s5, %s5557_s26  }
 0x1de   : > { %s4180_s23 = scalar_lea.hbm %s5570_s6, 16 }
 0x1df   : > { %p4181_p11 = scmp.ne.s32.totalorder %s5570_s6, %s4180_s23  ;;  %p4187_p5 = scmp.lt.u32.totalorder %s4180_s23, %s5570_s6 }
 0x1e1   : > { %p4183_p12 = pnand %p4181_p11, %p5561_p10 }
 0x1e3   : > { %p4184_p4 = pneg %p4183_p12 }
 0x1e5   : > { %p4189_p7 = pnand %p4187_p5, %p4184_p4 }
 0x1e7   : > { %4192 = shalt.err (!%p4189_p7)
}
 0x1e8   : > { %s4193_s9 = scalar_lea.vmem %s626_s30, 16  ;;  %s4200_s26 = scalar_lea.vmem %s626_s30, 32 }
 0x1e9   : > { %p4194_p3 = scmp.ne.s32.totalorder %s626_s30, %s4193_s9  ;;  %p4201_p13 = scmp.lt.s32.totalorder %s626_s30, %s626_s30 }
 0x1ea   : > { %p4202_p9 = scmp.lt.s32.totalorder %s4200_s26, %s4193_s9 }
 0x1eb   : > { %p4196_p1 = pnand %p4194_p3, %p5561_p10 }
 0x1ec   : > { %p4203_p2 = por %p4202_p9, %p4201_p13 }
 0x1ed   : > { %p4197_p0 = pneg %p4196_p1 }
 0x1ef   : > { %p4204_p6 = pnand %p4203_p2, %p4197_p0 }
 0x1f1   : > { %4207 = shalt.err (!%p4204_p6)
}
 0x1f2   : > { %p5571_p11 = scmp.ne.s32.totalorder %s5530_s29, 0  ;;  %s4423_s25 = smov [#allocation24]  }
 0x1f3   : > { %s636_s11 = sshll.u32 %s4423_s25, 4  ;;  %s4424_s4 = smov [#allocation27]   ;;  %s637_s11 = int_to_ptr.vmem [resolvable:$true] %s636_s11 }
 0x1f4   : > { %3445 = dma.hbm_to_vmem [thread:$0]  (!%p5571_p11), %s5570_s6, 16, %s626_s30, [#allocation7]  }
 0x1f5   : > { %s660_s16 = sshll.u32 %s4424_s4, 4  ;;  %s5572_s19 = sld [smem:[#allocation61_spill]]  ;;  %s661_s16 = int_to_ptr.vmem [resolvable:$true] %s660_s16 }
 0x1fb   : > { %s4208_s27 = scalar_lea.hbm %s5572_s19, 16 }
 0x1fc   : > { %p4209_p6 = scmp.ne.s32.totalorder %s5572_s19, %s4208_s27  ;;  %p4215_p5 = scmp.lt.u32.totalorder %s4208_s27, %s5572_s19 }
 0x1fe   : > { %p4211_p12 = pnand %p4209_p6, %p5561_p10 }
 0x200   : > { %p4212_p4 = pneg %p4211_p12 }
 0x202   : > { %p4217_p7 = pnand %p4215_p5, %p4212_p4 }
 0x204   : > { %4220 = shalt.err (!%p4217_p7)
}
 0x205   : > { %s4221_s30 = scalar_lea.vmem %s637_s11, 16  ;;  %s4228_s5 = scalar_lea.vmem %s637_s11, 32 }
 0x206   : > { %p4222_p3 = scmp.ne.s32.totalorder %s637_s11, %s4221_s30  ;;  %p4229_p13 = scmp.lt.s32.totalorder %s637_s11, %s637_s11 }
 0x207   : > { %p4230_p9 = scmp.lt.s32.totalorder %s4228_s5, %s4221_s30 }
 0x208   : > { %p4224_p1 = pnand %p4222_p3, %p5561_p10 }
 0x209   : > { %p4231_p2 = por %p4230_p9, %p4229_p13 }
 0x20a   : > { %p4225_p0 = pneg %p4224_p1 }
 0x20c   : > { %p4232_p8 = pnand %p4231_p2, %p4225_p0 }
 0x20e   : > { %4235 = shalt.err (!%p4232_p8)
}
 0x20f   : > { %3448 = dma.hbm_to_vmem [thread:$0]  (!%p5571_p11), %s5572_s19, 16, %s637_s11, [#allocation10]  }
 0x210   : > { %s5573_s23 = sld [smem:[#allocation63_spill]] }
 0x216   : > { %s5574_s27 = smov %s5573_s23  ;;  %s4236_s10 = scalar_lea.hbm %s5573_s23, 16 }
 0x217   : > { %p4237_p6 = scmp.ne.s32.totalorder %s5574_s27, %s4236_s10  ;;  %p4243_p8 = scmp.lt.u32.totalorder %s4236_s10, %s5574_s27 }
 0x219   : > { %p4239_p12 = pnand %p4237_p6, %p5561_p10 }
 0x21b   : > { %p4240_p4 = pneg %p4239_p12 }
 0x21d   : > { %p4245_p5 = pnand %p4243_p8, %p4240_p4 }
 0x21f   : > { %4248 = shalt.err (!%p4245_p5)
}
 0x220   : > { %s4249_s5 = scalar_lea.vmem %s661_s16, 16  ;;  %s4256_s11 = scalar_lea.vmem %s661_s16, 32 }
 0x221   : > { %p4250_p7 = scmp.ne.s32.totalorder %s661_s16, %s4249_s5  ;;  %p4257_p0 = scmp.lt.s32.totalorder %s661_s16, %s661_s16 }
 0x222   : > { %p4258_p13 = scmp.lt.s32.totalorder %s4256_s11, %s4249_s5 }
 0x223   : > { %p4252_p3 = pnand %p4250_p7, %p5561_p10 }
 0x224   : > { %p4259_p9 = por %p4258_p13, %p4257_p0 }
 0x225   : > { %p4253_p1 = pneg %p4252_p3 }
 0x227   : > { %p4260_p2 = pnand %p4259_p9, %p4253_p1 }
 0x229   : > { %4263 = shalt.err (!%p4260_p2)
}
 0x22a   : > { %3454 = dma.hbm_to_vmem [thread:$0]  (!%p5571_p11), %s5574_s27, 16, %s661_s16, [#allocation26]  }
 0x22b   : > { %s5575_s3 = sld [smem:[#allocation59_spill]]  ;;  %s881_s10 = scalar_lea.vmem [#allocation22], %s4636_s0 }
 0x22c   : > { %s888_s7 = sshll.u32 %s881_s10, 4  ;;  %p5576_p6 = scmp.ne.s32.totalorder %s5542_s22, 0  ;;  %s889_s7 = int_to_ptr.vmem [resolvable:$true] %s888_s7 }
 0x231   : > { %s5115_s23 = scalar_lea.hbm %s5575_s3, %s4644_s20  ;;  %s4269_s16 = scalar_lea.hbm %s5575_s3, 32 }
 0x232   : > { %s4264_s29 = scalar_lea.hbm %s5115_s23, 16  ;;  %p4270_p11 = scmp.lt.u32.totalorder %s5115_s23, %s5575_s3 }
 0x233   : > { %p4265_p10 = scmp.ne.s32.totalorder %s5115_s23, %s4264_s29  ;;  %p4271_p8 = scmp.lt.u32.totalorder %s4269_s16, %s4264_s29 }
 0x234   : > { %p4273_p7 = scmp.lt.u32.totalorder %s4264_s29, %s5115_s23 }
 0x235   : > { %p4267_p12 = pnand %p4265_p10, %p5576_p6  ;;  %p4272_p5 = por %p4271_p8, %p4270_p11 }
 0x237   : > { %p4268_p4 = pneg %p4267_p12  ;;  %p4274_p3 = por %p4273_p7, %p4272_p5 }
 0x239   : > { %p4275_p1 = pnand %p4274_p3, %p4268_p4 }
 0x23b   : > { %4278 = shalt.err (!%p4275_p1)
}
 0x23c   : > { %s4279_s0 = scalar_lea.vmem %s889_s7, 16  ;;  %s4425_s20 = smov [#allocation22]  }
 0x23d   : > { %p4280_p0 = scmp.ne.s32.totalorder %s889_s7, %s4279_s0  ;;  %s4284_s11 = sshll.u32 %s4425_s20, 4  ;;  %s4285_s11 = int_to_ptr.vmem [resolvable:$false] %s4284_s11 }
 0x23e   : > { %s4286_s1 = scalar_lea.vmem %s4285_s11, 32  ;;  %p4287_p2 = scmp.lt.s32.totalorder %s889_s7, %s4285_s11 }
 0x23f   : > { %p4282_p13 = pnand %p4280_p0, %p5576_p6  ;;  %p4288_p10 = scmp.lt.s32.totalorder %s4286_s1, %s4279_s0 }
 0x241   : > { %p4283_p9 = pneg %p4282_p13  ;;  %p4289_p12 = por %p4288_p10, %p4287_p2 }
 0x243   : > { %p4290_p8 = pnand %p4289_p12, %p4283_p9 }
 0x245   : > { %4293 = shalt.err (!%p4290_p8)
}
 0x246   : > { %p5577_p11 = scmp.ne.s32.totalorder %s5540_s15, 0  ;;  %s5578_s25 = sld [smem:[#allocation43_spill]] }
 0x248   : > { %3491 = dma.hbm_to_vmem [thread:$0]  (!%p5577_p11), %s5115_s23, 16, %s889_s7, %s4668_s24  }
 0x24c   : > { %p5579_p4 = scmp.ne.s32.totalorder %s5578_s25, 0 }
 0x24d   : > { %s5580_s22 = sld [smem:[#allocation41_spill]] (!%p5579_p4) }
 0x24e   : > { %897 = sbr.rel (%p5579_p4) target bundleno = 4426 (0x114a), region = 100 }
 0x253   : > { %p5581_p6 = scmp.eq.s32.totalorder (!%p5579_p4), %s5580_s22, 0 }
 0x255   : > { %4345 = dma.done.wait (%p5581_p6), [#allocation4], 128   ;;  %p5582_p5 = pmov %p5581_p6 }
 0x257   : > { %4347 = vsyncadd (%p5582_p5), [#allocation4], 4294967168  ;;  %p5583_p7 = pmov %p5582_p5 }
 0x258   : > { %p5584_p3 = pmov %p5582_p5 }
 0x259   : > { %4349 = dma.done.wait (%p5583_p7), [#allocation7], 1552  }
 0x25a   : > { %4351 = vsyncadd (%p5584_p3), [#allocation7], 4294965744  ;;  %p5585_p1 = pmov %p5584_p3 }
 0x25c   : > { %4353 = dma.done.wait (%p5585_p1), [#allocation10], 64   ;;  %p5586_p0 = pmov %p5585_p1 }
 0x25d   : > { %s5587_s15 = sld [smem:[#allocation37_spill]]  ;;  %s5588_s24 = sld [smem:[#allocation42_spill]] }
 0x25e   : > { %4355 = vsyncadd (%p5586_p0), [#allocation10], 4294967232  ;;  %s915_s4 = sand.u32 1, %s5580_s22  }
 0x25f   : > { %s916_s23 = scalar_lea.sflag [#allocation4], %s915_s4 }
 0x263   : > { %s5152_s14 = sand.u32 1, %s5587_s15   ;;  %p5589_p13 = scmp.ne.s32.totalorder %s5588_s24, 0 }
 0x264   : > { %s918_s10 = scalar_lea.vmem [#allocation11], %s5152_s14 }
 0x265   : > { %4357 = dma.done.wait (%p5589_p13), %s916_s23, 8368  }
 0x266   : > { %4359 = vsyncadd (%p5589_p13), %s916_s23, 4294958928  ;;  %s3368_s7 = smul.u32 192, %s5152_s14  ;;  %s3070_s9 = sshll.u32 %s5152_s14, 6 }
 0x267   : > { %s3369_s29 = smul.u32 3, %s5152_s14  ;;  %s3071_s26 = sshll.u32 %s5152_s14, 7 }
 0x268   : > { %s3072_s16 = sshll.u32 %s5152_s14, 1  ;;  %s926_s30 = scalar_lea.vmem [#allocation12], %s5152_s14 }
 0x269   : > { %s5165_s5 = scalar_lea.vmem [#allocation13], %s3368_s7  ;;  %s5167_s0 = scalar_lea.vmem [#allocation14], %s3369_s29 }
 0x26a   : > { %s5169_s20 = scalar_lea.vmem [#allocation15], %s3070_s9  ;;  %s961_s11 = scalar_lea.vmem [#allocation16], %s5152_s14 }
 0x26b   : > { %s969_s1 = scalar_lea.vmem [#allocation17], %s5152_s14  ;;  %s977_s25 = scalar_lea.vmem [#allocation18], %s5152_s14 }
 0x26c   : > { %s5174_s15 = scalar_lea.vmem [#allocation19], %s3071_s26  ;;  %s5176_s24 = scalar_lea.vmem [#allocation20], %s3072_s16 }
 0x26d   : > { %s5178_s4 = scalar_lea.vmem [#allocation21], %s3071_s26  ;;  %s1012_s23 = scalar_lea.vmem [#allocation22], %s5152_s14 }
 0x26e   : > { %p5590_p9 = pmov %p5586_p0 }
 0x26f   : > { %p5591_p2 = pmov %p5586_p0 }
 0x270   : > { %4361 = dma.done.wait (%p5590_p9), [#allocation7], 16  }
 0x271   : > { %4363 = vsyncadd (%p5591_p2), [#allocation7], 4294967280  ;;  %p5592_p10 = pmov %p5586_p0 }
 0x272   : > { %p5593_p12 = pmov %p5586_p0 }
 0x273   : > { %4365 = dma.done.wait (%p5592_p10), [#allocation10], 16  }
 0x274   : > { %4367 = vsyncadd (%p5593_p12), [#allocation10], 4294967280  ;;  %p5594_p8 = pmov %p5586_p0 }
 0x275   : > { %p5595_p11 = pmov %p5586_p0 }
 0x276   : > { %4369 = dma.done.wait (%p5594_p8), [#allocation26], 1040  }
 0x277   : > { %4371 = vsyncadd (%p5595_p11), [#allocation26], 4294966256  ;;  %s5596_s7 = sld [smem:[#allocation39_spill]] }
 0x27d   : > { %p3078_p4 = scmp.ne.s32.totalorder %s5596_s7, 0 }
 0x27e   : > { %v3583_v0 = vld [vmem:[#allocation6] sm:$0xff] (!%p3078_p4)   ;;  %v4426_v1 = vmov (!%p3078_p4), 0   ;;  %v3584_v2 = vld [vmem:[#allocation6 + $0x8] sm:$0xff] (!%p3078_p4)   ;;  %v3585_v3 = vld [vmem:[#allocation6 + $0x10] sm:$0xff] (!%p3078_p4)   ;;  %vm1243_vm0 = vcmask (!%p3078_p4), 523264  }
 0x27f   : > { %1133 = sbr.rel (%p3078_p4) target bundleno = 904 (0x388), region = 184  ;;  %1247 = vmatprep.subr.bf16.mxu0 (!%p3078_p4), %v4426_v1  ;;  %v3586_v4 = vld [vmem:[#allocation6 + $0x18] sm:$0xff] (!%p3078_p4)   ;;  %v3587_v7 = vld [vmem:[#allocation6 + $0x20] sm:$0xff] (!%p3078_p4)   ;;  %v3588_v9 = vld [vmem:[#allocation6 + $0x28] sm:$0xff] (!%p3078_p4)  }
 0x280   : > { %1248 = vmatpush1.bf16.msra.mxu0 (!%p3078_p4), %v3583_v0  ;;  %v1134_v5 = vld [vmem:[#allocation3] sm:$0xff] (!%p3078_p4)  ;;  %v3589_v10 = vld [vmem:[#allocation6 + $0x30] sm:$0xff] (!%p3078_p4)   ;;  %v3591_v12 = vld [vmem:[#allocation6 + $0x40] sm:$0xff] (!%p3078_p4)  }
 0x281   : > { %1249 = vmatprep.subr.bf16.mxu0 (!%p3078_p4), %v4426_v1  ;;  %v1160_v6 = vcombine.high (!%p3078_p4), %v1134_v5, %v1134_v5  ;;  %v3590_v11 = vld [vmem:[#allocation6 + $0x38] sm:$0xff] (!%p3078_p4)   ;;  %v3592_v13 = vld [vmem:[#allocation6 + $0x48] sm:$0xff] (!%p3078_p4)   ;;  %v3593_v14 = vld [vmem:[#allocation6 + $0x50] sm:$0xff] (!%p3078_p4)   ;;  %v1162_v16 = vpack.c.bf16 (!%p3078_p4), %v1134_v5, %v1134_v5 }
 0x282   : > { %v3594_v15 = vld [vmem:[#allocation6 + $0x58] sm:$0xff] (!%p3078_p4)   ;;  %v3079_v17 = vld [vmem:[#allocation8] ss:$0 sm:$0xff] (!%p3078_p4)  ;;  %v1287_v19 = vld [vmem:[#allocation9] sm:$0xf] (!%p3078_p4) }
 0x283   : > { %v1163_v8 = vpack.c.bf16 (!%p3078_p4), %v1160_v6, %v1160_v6 }
 0x284   : > { %1250 = vmatpush1.bf16.msra.mxu0 (!%p3078_p4), %v3584_v2 }
 0x285   : > { %1251 = vmatprep.subr.bf16.mxu0 (!%p3078_p4), %v4426_v1  ;;  %3092 = vmatprep.mubr.msk.bf16.mxu0 (!%p3078_p4), %vm1243_vm0, %v1163_v8 }
 0x288   : > { %1252 = vmatpush1.bf16.msra.mxu0 %v3585_v3 }
 0x289   : > { %1253 = vmatprep.subr.bf16.mxu0 %v4426_v1 }
 0x28c   : > { %1254 = vmatpush1.bf16.msra.mxu0 %v3586_v4 }
 0x28d   : > { %1255 = vmatprep.subr.bf16.mxu0 %v4426_v1 }
 0x290   : > { %1256 = vmatpush1.bf16.msra.mxu0 %v3587_v7 }
 0x291   : > { %1257 = vmatprep.subr.bf16.mxu0 %v4426_v1 }
 0x294   : > { %1258 = vmatpush1.bf16.msra.mxu0 %v3588_v9 }
 0x295   : > { %1259 = vmatprep.subr.bf16.mxu0 %v4426_v1 }
 0x298   : > { %1260 = vmatpush1.bf16.msra.mxu0 %v3589_v10 }
 0x299   : > { %1261 = vmatprep.subr.bf16.mxu0 %v4426_v1 }
 0x29c   : > { %1262 = vmatpush1.bf16.msra.mxu0 %v3590_v11 }
 0x29d   : > { %1263 = vmatprep.subr.bf16.mxu0 %v4426_v1 }
 0x2a0   : > { %1264 = vmatpush1.bf16.msra.mxu0 %v3591_v12 }
 0x2a1   : > { %1265 = vmatprep.subr.bf16.mxu0 %v4426_v1 }
 0x2a4   : > { %1266 = vmatpush1.bf16.msra.mxu0 %v3592_v13 }
 0x2a5   : > { %1267 = vmatprep.subr.bf16.mxu0 %v4426_v1 }
 0x2a8   : > { %1268 = vmatpush1.bf16.msra.mxu0 %v3593_v14 }
 0x2a9   : > { %1269 = vmatprep.subr.bf16.mxu0 %v4426_v1 }
 0x2ac   : > { %1270 = vmatpush1.bf16.msra.mxu0 %v3594_v15 }
 0x2af   : > { %1280 = vmatmul.mubr.bf16.vlgmr.msra.gmra.mrb[0].mxu0 %v1162_v16 }
 0x382   : > { %v1281_v18 = vpop.f32.mrb[0].mxu0 }
 0x383   : > { %v1282_v20 = vadd.f32 %v3079_v17, %v1281_v18  ;;  %v1283_v21 = vpop.f32.mrb[1].mxu0 }
 0x384   : > { %v1284_v22 = vpop.f32.mrb[2].mxu0 }
 0x385   : > { %v1288_v23 = vadd.f32 %v1287_v19, %v1282_v20  ;;  %v1285_v24 = vpop.f32.mrb[3].mxu0 }
 0x387   : > { %1289 = vst [vmem:[#allocation2] sm:$0xf] %v1288_v23 }
 0x388 PF: > { %vm1293_vm1 = vcmask 1043456   ;;  %v3596_v27 = vld [vmem:[%s5165_s5 + $0x4] ss:$12 sps:$4 sm:$0xff]   ;;  %v3598_v28 = vld [vmem:[%s5165_s5] ss:$12 sps:$4 sm:$0xff]   ;;  %v4427_v29 = vmov 0.0   ;;  %v1357_v4 = vlaneseq }
 0x389   : > { %3256 = vmatprep.subr.bf16.mxu1 %v4427_v29  ;;  %v3599_v30 = vld [vmem:[%s5165_s5 + $0x8] ss:$12 sps:$4 sm:$0xff]   ;;  %v3602_v32 = vld [vmem:[%s5165_s5 + $0x18] ss:$12 sps:$4 sm:$0xff]   ;;  %1500 = vmatprep.subr.bf16.mxu0 %v3596_v27  ;;  %v3603_v33 = vld [vmem:[%s5165_s5 + $0x20] ss:$12 sps:$4 sm:$0xff]  }
 0x38a   : > { %v3600_v31 = vld [vmem:[%s5165_s5 + $0x1c] ss:$12 sps:$4 sm:$0xff]   ;;  %v3604_v34 = vld [vmem:[%s5165_s5 + $0x34] ss:$12 sps:$4 sm:$0xff]   ;;  %1501 = vmatpush1.bf16.msra.mxu0 %v3598_v28  ;;  %3257 = vmatpush3.bf16.msra.mxu1 %v3599_v30  ;;  %v3607_v41 = vld [vmem:[%s5165_s5 + $0x38] ss:$12 sps:$4 sm:$0xff]  }
 0x38b   : > { %1502 = vmatprep.subr.bf16.mxu0 %v3600_v31  ;;  %3258 = vmatprep.subr.bf16.mxu1 %v4427_v29  ;;  %v3606_v40 = vld [vmem:[%s5165_s5 + $0x30] ss:$12 sps:$4 sm:$0xff]   ;;  %v3608_v42 = vld [vmem:[%s5165_s5 + $0x4c] ss:$12 sps:$4 sm:$0xff]   ;;  %v3610_v43 = vld [vmem:[%s5165_s5 + $0x48] ss:$12 sps:$4 sm:$0xff]  }
 0x38c   : > { %v3611_v44 = vld [vmem:[%s5165_s5 + $0x50] ss:$12 sps:$4 sm:$0xff]   ;;  %v3614_v46 = vld [vmem:[%s5165_s5 + $0x60] ss:$12 sps:$4 sm:$0xff]   ;;  %v3615_v47 = vld [vmem:[%s5165_s5 + $0x68] ss:$12 sps:$4 sm:$0xff]  }
 0x38d   : > { %v3612_v45 = vld [vmem:[%s5165_s5 + $0x64] ss:$12 sps:$4 sm:$0xff]   ;;  %v3616_v48 = vld [vmem:[%s5165_s5 + $0x7c] ss:$12 sps:$4 sm:$0xff]   ;;  %v3619_v50 = vld [vmem:[%s5165_s5 + $0x80] ss:$12 sps:$4 sm:$0xff]  }
 0x38e   : > { %v5194_v25 = vld [vmem:[#allocation2] sm:$0xf]  ;;  %1503 = vmatpush1.bf16.msra.mxu0 %v3602_v32  ;;  %3259 = vmatpush3.bf16.msra.mxu1 %v3603_v33  ;;  %v3618_v49 = vld [vmem:[%s5165_s5 + $0x78] ss:$12 sps:$4 sm:$0xff]   ;;  %v3620_v51 = vld [vmem:[%s5165_s5 + $0x94] ss:$12 sps:$4 sm:$0xff]  }
 0x38f   : > { %v1294_v26 = vsel %vm1293_vm1, %v5194_v25, 0.0  ;;  %1504 = vmatprep.subr.bf16.mxu0 %v3604_v34  ;;  %3260 = vmatprep.subr.bf16.mxu1 %v4427_v29  ;;  %v4428_v52 = vmov 0   ;;  %vm4429_vm2 = vmmov 0   ;;  %v3622_v53 = vld [vmem:[%s5165_s5 + $0x90] ss:$12 sps:$4 sm:$0xff]   ;;  %v5245_v5 = vshrl.u32 %v1357_v4, 7 }
 0x390   : > { %1295 = vadd.xlane.f32.xlu0 %v1294_v26  ;;  %1532 = vmatprep.mubr.bf16.mxu0 %v4428_v52  ;;  %v3623_v54 = vld [vmem:[%s5165_s5 + $0x98] ss:$12 sps:$4 sm:$0xff]   ;;  %v3626_v56 = vld [vmem:[%s5165_s5 + $0xa8] ss:$12 sps:$4 sm:$0xff]   ;;  %v3627_v57 = vld [vmem:[%s5165_s5 + $0xb0] ss:$12 sps:$4 sm:$0xff]  }
 0x391   : > { %3272 = vmatprep.mubr.msk.bf16.mxu1 %vm4429_vm2, %v4427_v29  ;;  %v3624_v55 = vld [vmem:[%s5165_s5 + $0xac] ss:$12 sps:$4 sm:$0xff]   ;;  %v3093_v62 = vld [vmem:[%s918_s10] ss:$0 sm:$0xff]  ;;  %v1363_v6 = vsub.s32 1, %v5245_v5  ;;  %v1367_v8 = vsub.s32 2, %v5245_v5 }
 0x392   : > { %1505 = vmatpush1.bf16.msra.mxu0 %v3606_v40  ;;  %3261 = vmatpush3.bf16.msra.mxu1 %v3607_v41  ;;  %v3094_v0 = vld [vmem:[%s926_s30] ss:$0 sm:$0xff]  ;;  %v1355_v7 = vld [vmem:[%s5167_s0] sm:$0x7]  ;;  %v1359_v10 = vsub.s32 0, %v5245_v5  ;;  %vm1584_vm3 = vcmask 261120  }
 0x393   : > { %3262 = vmatprep.subr.bf16.mxu1 %v4427_v29  ;;  %1506 = vmatprep.subr.bf16.mxu0 %v3608_v42  ;;  %v1364_v9 = vrot.slane %v1355_v7, %v1363_v6  ;;  %v1368_v15 = vrot.slane %v1355_v7, %v1367_v8  ;;  %s4430_s22 = smov 96   ;;  %s4431_s10 = smov 32   ;;  %vm1649_vm4 = vcmask 1041408   ;;  %vm1632_vm5 = vcmask 27648  }
 0x394   : > { %v1360_v21 = vrot.slane %v1355_v7, %v1359_v10  ;;  %s4432_s29 = smov 64   ;;  %vm1645_vm6 = vcmask 31744   ;;  %vm2042_vm7 = vcmask 523264   ;;  %vm2044_vm8 = vcmask 785408   ;;  %s5597_s9 = sld [smem:[#allocation39_spill]] }
 0x396   : > { %1507 = vmatpush1.bf16.msra.mxu0 %v3610_v43  ;;  %3263 = vmatpush3.bf16.msra.mxu1 %v3611_v44 }
 0x397   : > { %3264 = vmatprep.subr.bf16.mxu1 %v4427_v29  ;;  %1508 = vmatprep.subr.bf16.mxu0 %v3612_v45 }
 0x39a   : > { %1509 = vmatpush1.bf16.msra.mxu0 %v3614_v46  ;;  %3265 = vmatpush3.bf16.msra.mxu1 %v3615_v47  ;;  %p3171_p6 = scmp.ne.s32.totalorder %s5597_s9, 1 }
 0x39b   : > { %1510 = vmatprep.subr.bf16.mxu0 %v3616_v48  ;;  %3266 = vmatprep.subr.bf16.mxu1 %v4427_v29  ;;  %vm4434_vm9 = vmmov (!%p3171_p6), 0  }
 0x39e   : > { %1511 = vmatpush1.bf16.msra.mxu0 %v3618_v49  ;;  %3267 = vmatpush3.bf16.msra.mxu1 %v3619_v50 }
 0x39f   : > { %1512 = vmatprep.subr.bf16.mxu0 %v3620_v51  ;;  %3268 = vmatprep.subr.bf16.mxu1 %v4427_v29 }
 0x3a2   : > { %1513 = vmatpush1.bf16.msra.mxu0 %v3622_v53  ;;  %3269 = vmatpush3.bf16.msra.mxu1 %v3623_v54 }
 0x3a3   : > { %1514 = vmatprep.subr.bf16.mxu0 %v3624_v55  ;;  %3270 = vmatprep.subr.bf16.mxu1 %v4427_v29 }
 0x3a6   : > { %1515 = vmatpush1.bf16.msra.mxu0 %v3626_v56  ;;  %3271 = vmatpush3.bf16.msra.mxu1 %v3627_v57 }
 0x3a7   : > { %3276 = vmatprep.subr.bf16.mxu1 %v4427_v29  ;;  %3300 = vmatprep.subr.bf16.mxu0 %v4427_v29 }
 0x41d   : > { %v1296_v35 = vpop.xlane.xlu0 %1295 }
 0x41e   : > { %v1298_v36 = vmul.f32 0.0078125, %v1296_v35 }
 0x420   : > { %v1299_v37 = vsub.f32 %v5194_v25, %v1298_v36 }
 0x422   : > { %v1300_v38 = vmul.f32 %v1299_v37, %v1299_v37 }
 0x424   : > { %v1301_v39 = vsel %vm1293_vm1, %v1300_v38, 0.0 }
 0x425   : > { %1302 = vadd.xlane.f32.xlu0 %v1301_v39 }
 0x4b2   : > { %v1303_v58 = vpop.xlane.xlu0 %1302 }
 0x4b3   : > { %v1304_v59 = vmul.f32 0.0078125, %v1303_v58 }
 0x4b5   : > { %v1305_v60 = vadd.f32 1e-06, %v1304_v59 }
 0x4b7   : > { %3676 = vrsqrt.f32 %v1305_v60 }
 0x4c1   : > { %v3677_v61 = vpop.eup %3676 }
 0x4c2   : > { %v1307_v63 = vmul.f32 %v3677_v61, %v1299_v37 }
 0x4c4   : > { %v1314_v1 = vmul.f32 %v3093_v62, %v1307_v63 }
 0x4c6   : > { %v1321_v2 = vadd.f32 %v3094_v0, %v1314_v1 }
 0x4c8   : > { %v1354_v3 = vpack.c.bf16 %v1321_v2, %v1321_v2 }
 0x4ca   : > { %1533 = vmatmul.mubr.bf16.vlgmr.msra.gmra.mrb[0].mxu0 %v1354_v3  ;;  %3273 = vmatmul.mubr.bf16.vlgmr.msra.gmra.mrb[0].mxu1 %v1354_v3 }
 0x4cb   : > { %3278 = vmatprep.mubr.msk.bf16.mxu1 %vm4429_vm2, %v4427_v29  ;;  %3302 = vmatprep.mubr.msk.bf16.mxu0 %vm4429_vm2, %v4427_v29 }
 0x59d   : > { %v1534_v11 = vpop.f32.mrb[0].mxu0  ;;  %v1575_v12 = vpop.f32.mrb[0].mxu1 }
 0x59e   : > { %v1536_v13 = vpop.f32.mrb[1].mxu0  ;;  %v3274_v14 = vpop.f32.mrb[1].mxu1  ;;  %v1576_v23 = vadd.f32 %v1575_v12, %v1368_v15  ;;  %v1535_v26 = vadd.f32 %v1534_v11, %v1360_v21 }
 0x59f   : > { %v1537_v16 = vadd.f32 %v1536_v13, %v1364_v9  ;;  %v1538_v17 = vpop.f32.mrb[2].mxu0  ;;  %v1578_v18 = vpop.f32.mrb[2].mxu1 }
 0x5a0   : > { %v1539_v19 = vpop.f32.mrb[3].mxu0  ;;  %v3275_v20 = vpop.f32.mrb[3].mxu1  ;;  %v5258_v27 = vpack.c.bf16 %v1576_v23, %v1576_v23  ;;  %v1583_v28 = vpack.c.bf16 %v1535_v26, %v1535_v26 }
 0x5a1   : > { %v1581_v22 = vpack.c.bf16 %v1537_v16, %v1537_v16 }
 0x5a2   : > { %v1651_v30 = vsel %vm1649_vm4, %v5258_v27, 0 }
 0x5a3   : > { %1697 = vrot.lane.b32.xlu0 %v1581_v22, %s4430_s22  ;;  %v1589_v24 = vsel %vm1584_vm3, %v1581_v22, 0 }
 0x5a4   : > { %3277 = vmatpush3.bf16.xpose.msra.mxu1 %v1589_v24 }
 0x5a5   : > { %3282 = vmatprep.subr.bf16.mxu1 %v4427_v29 }
 0x5a7   : > { %1920 = vrot.lane.b32.xlu0 %v1581_v22, %s4431_s10 }
 0x5ab   : > { %3279 = vmatmul.mubr.msk.bf16.vlgmr.msra.gmra.mrb[4].mxu1 %vm1584_vm3, %v1583_v28 }
 0x5ac   : > { %3283 = vmatpush3.bf16.msra.mxu1 %v1651_v30  ;;  %3284 = vmatprep.mubr.msk.bf16.mxu1 %vm4429_vm2, %v4427_v29 }
 0x5ad   : > { %3288 = vmatprep.subr.bf16.mxu1 %v4427_v29 }
 0x615   : > { %v1698_v44 = vpop.permute.xlu0 %1697 }
 0x616   : > { %v1703_v51 = vsel %vm1584_vm3, %v1698_v44, 0 }
 0x619   : > { %v1921_v49 = vpop.permute.xlu0 %1920 }
 0x61a   : > { %v1926_v54 = vsel %vm1584_vm3, %v1921_v49, 0 }
 0x67e   : > { %v1625_v31 = vpop.f32.mrb[4].mxu1 }
 0x67f   : > { %v1631_v32 = vmul.f32 0.17677669, %v1625_v31  ;;  %v3280_v33 = vpop.f32.mrb[5].mxu1 }
 0x680   : > { %v1628_v34 = vpop.f32.mrb[6].mxu1 }
 0x681   : > { %v3281_v35 = vpop.f32.mrb[7].mxu1  ;;  %v1633_v36 = vsel %vm1632_vm5, %v1631_v32, -inf }
 0x682   : > { %1634 = vmax.xlane.f32.xlu1 %v1633_v36 }
 0x70f   : > { %v1635_v37 = vpop.xlane.xlu1 %1634 }
 0x710   : > { %v1636_v38 = vsub.f32 %v1631_v32, %v1635_v37 }
 0x712   : > { %v1637_v39 = vmul.f32 1.442695, %v1636_v38 }
 0x714   : > { %3678 = vpow2.f32 %v1637_v39 }
 0x71e   : > { %v3679_v40 = vpop.eup %3678 }
 0x71f   : > { %v1639_v41 = vsel %vm1632_vm5, %v3679_v40, 0.0 }
 0x720   : > { %1640 = vadd.xlane.f32.xlu1 %v1639_v41 }
 0x731   : > { %1694 = vrot.lane.b32.xlu1 %v1583_v28, %s4430_s22 }
 0x735   : > { %1809 = vrot.lane.b32.xlu1 %v1581_v22, %s4432_s29 }
 0x739   : > { %1807 = vrot.lane.b32.xlu1 %v1583_v28, %s4432_s29 }
 0x73d   : > { %1918 = vrot.lane.b32.xlu1 %v1583_v28, %s4431_s10 }
 0x7ad   : > { %v1641_v42 = vpop.xlane.xlu1 %1640 }
 0x7ae   : > { %3680 = vrcp.f32 %v1641_v42 }
 0x7b1   : > { %v1695_v43 = vpop.permute.xlu1 %1694 }
 0x7b5   : > { %v1810_v45 = vpop.permute.xlu1 %1809 }
 0x7b6   : > { %v1815_v46 = vsel %vm1584_vm3, %v1810_v45, 0 }
 0x7b7   : > { %3301 = vmatpush3.bf16.xpose.msra.mxu0 %v1815_v46 }
 0x7b8   : > { %v3681_v47 = vpop.eup %3680  ;;  %3312 = vmatprep.subr.bf16.mxu0 %v4427_v29 }
 0x7b9   : > { %v1643_v48 = vmul.f32 %v3681_v47, %v3679_v40  ;;  %v1808_v53 = vpop.permute.xlu1 %1807 }
 0x7bb   : > { %v1644_v50 = vpack.c.bf16 %v1643_v48, %v1643_v48 }
 0x7bd   : > { %3285 = vmatmul.mubr.msk.bf16.vlgmr.msra.gmra.mrb[8].mxu1 %vm1645_vm6, %v1644_v50  ;;  %v1919_v55 = vpop.permute.xlu1 %1918 }
 0x7be   : > { %3289 = vmatpush3.bf16.xpose.msra.mxu1 %v1703_v51  ;;  %3303 = vmatmul.mubr.msk.bf16.vlgmr.msra.gmra.mrb[4].mxu0 %vm1584_vm3, %v1808_v53  ;;  %v3628_v53 = vld [vmem:[%s5169_s20] sm:$0xff]  }
 0x7bf   : > { %3313 = vmatpush3.bf16.xpose.msra.mxu0 %v1926_v54  ;;  %3290 = vmatprep.mubr.msk.bf16.mxu1 %vm4429_vm2, %v4427_v29  ;;  %v3629_v54 = vld [vmem:[%s5169_s20 + $0x8] sm:$0xff]  }
 0x7c0   : > { %3314 = vmatprep.mubr.msk.bf16.mxu0 %vm4429_vm2, %v4427_v29  ;;  %3294 = vmatprep.subr.bf16.mxu1 %v4427_v29 }
 0x7c1   : > { %3324 = vmatprep.subr.bf16.mxu0 %v4427_v29 }
 0x7c5   : > { %3291 = vmatmul.mubr.msk.bf16.vlgmr.msra.gmra.mrb[12].mxu1 %vm1584_vm3, %v1695_v43 }
 0x7c6   : > { %3315 = vmatmul.mubr.msk.bf16.vlgmr.msra.gmra.mrb[8].mxu0 %vm1584_vm3, %v1919_v55  ;;  %3296 = vmatprep.mubr.msk.bf16.mxu1 %vm4429_vm2, %v4427_v29  ;;  %v3630_v55 = vld [vmem:[%s5169_s20 + $0x10] sm:$0xff]  }
 0x7c7   : > { %3340 = vmatprep.mubr.msk.bf16.mxu0 %vm4429_vm2, %v4427_v29  ;;  %3325 = vmatpush3.bf16.msra.mxu0 %v3628_v53 }
 0x7c8   : > { %3326 = vmatprep.subr.bf16.mxu0 %v4427_v29 }
 0x7cb   : > { %3327 = vmatpush3.bf16.msra.mxu0 %v3629_v54  ;;  %v3137_v54 = vld [vmem:[%s977_s25] ss:$0 sm:$0xff] }
 0x7cc   : > { %3328 = vmatprep.subr.bf16.mxu0 %v4427_v29 }
 0x7cf   : > { %3329 = vmatpush3.bf16.msra.mxu0 %v3630_v55 }
 0x7d0   : > { %3330 = vmatprep.subr.bf16.mxu0 %v4427_v29 }
 0x890   : > { %v5291_v56 = vpop.f32.mrb[8].mxu1 }
 0x891   : > { %v3286_v57 = vpop.f32.mrb[9].mxu1  ;;  %v1851_v58 = vpop.f32.mrb[4].mxu0 }
 0x892   : > { %v1857_v59 = vmul.f32 0.17677669, %v1851_v58  ;;  %v1690_v60 = vpop.f32.mrb[10].mxu1  ;;  %v3304_v61 = vpop.f32.mrb[5].mxu0  ;;  %v3631_v57 = vld [vmem:[%s5169_s20 + $0x18] sm:$0xff]   ;;  %v3632_v58 = vld [vmem:[%s5169_s20 + $0x20] sm:$0xff]  }
 0x893   : > { %v3287_v62 = vpop.f32.mrb[11].mxu1  ;;  %v1854_v63 = vpop.f32.mrb[6].mxu0  ;;  %3331 = vmatpush3.bf16.msra.mxu0 %v3631_v57 }
 0x894   : > { %v3305_v0 = vpop.f32.mrb[7].mxu0  ;;  %v1858_v1 = vsel %vm1632_vm5, %v1857_v59, -inf  ;;  %3332 = vmatprep.subr.bf16.mxu0 %v4427_v29 }
 0x895   : > { %1859 = vmax.xlane.f32.xlu1 %v1858_v1  ;;  %v3635_v0 = vld [vmem:[%s5169_s20 + $0x38] sm:$0xff]  }
 0x897   : > { %3333 = vmatpush3.bf16.msra.mxu0 %v3632_v58 }
 0x898   : > { %v1739_v2 = vpop.f32.mrb[12].mxu1  ;;  %3334 = vmatprep.subr.bf16.mxu0 %v4427_v29 }
 0x899   : > { %v1745_v3 = vmul.f32 0.17677669, %v1739_v2  ;;  %v3292_v4 = vpop.f32.mrb[13].mxu1  ;;  %v1962_v7 = vpop.f32.mrb[8].mxu0 }
 0x89a   : > { %v1742_v8 = vpop.f32.mrb[14].mxu1  ;;  %v3316_v9 = vpop.f32.mrb[9].mxu0  ;;  %v1968_v11 = vmul.f32 0.17677669, %v1962_v7 }
 0x89b   : > { %v3293_v12 = vpop.f32.mrb[15].mxu1  ;;  %v1965_v13 = vpop.f32.mrb[10].mxu0  ;;  %v1746_v14 = vsel %vm1632_vm5, %v1745_v3, -inf }
 0x89c   : > { %v3317_v15 = vpop.f32.mrb[11].mxu0  ;;  %1747 = vmax.xlane.f32.xlu0 %v1746_v14  ;;  %v1969_v16 = vsel %vm1632_vm5, %v1968_v11, -inf }
 0x8a0   : > { %1970 = vmax.xlane.f32.xlu0 %v1969_v16 }
 0x922   : > { %v1860_v17 = vpop.xlane.xlu1 %1859 }
 0x923   : > { %v1861_v18 = vsub.f32 %v1857_v59, %v1860_v17  ;;  %v3634_v59 = vld [vmem:[%s5169_s20 + $0x30] sm:$0xff]  }
 0x925   : > { %v1862_v19 = vmul.f32 1.442695, %v1861_v18 }
 0x927   : > { %3682 = vpow2.f32 %v1862_v19  ;;  %v3135_v19 = vld [vmem:[%s961_s11] ss:$0 sm:$0xff] }
 0x929   : > { %v1748_v20 = vpop.xlane.xlu0 %1747 }
 0x92a   : > { %v1749_v21 = vsub.f32 %v1745_v3, %v1748_v20 }
 0x92c   : > { %v1750_v22 = vmul.f32 1.442695, %v1749_v21 }
 0x92d   : > { %v1971_v23 = vpop.xlane.xlu0 %1970 }
 0x92e   : > { %3684 = vpow2.f32 %v1750_v22  ;;  %v1972_v24 = vsub.f32 %v1968_v11, %v1971_v23 }
 0x930   : > { %v1973_v26 = vmul.f32 1.442695, %v1972_v24 }
 0x931   : > { %v3683_v28 = vpop.eup %3682 }
 0x932   : > { %3686 = vpow2.f32 %v1973_v26  ;;  %v1864_v30 = vsel %vm1632_vm5, %v3683_v28, 0.0  ;;  %v3636_v26 = vld [vmem:[%s5174_s15] ss:$8 sps:$4 sm:$0xff]  }
 0x933   : > { %1865 = vadd.xlane.f32.xlu0 %v1864_v30  ;;  %v3641_v30 = vld [vmem:[%s5174_s15 + $0x14] ss:$8 sps:$4 sm:$0xff]  }
 0x938   : > { %v3685_v31 = vpop.eup %3684 }
 0x939   : > { %v1752_v32 = vsel %vm1632_vm5, %v3685_v31, 0.0 }
 0x93a   : > { %1753 = vadd.xlane.f32.xlu0 %v1752_v32  ;;  %v3642_v32 = vld [vmem:[%s5174_s15 + $0x20] ss:$8 sps:$4 sm:$0xff]  }
 0x93c   : > { %v3687_v33 = vpop.eup %3686 }
 0x93d   : > { %v1975_v34 = vsel %vm1632_vm5, %v3687_v33, 0.0 }
 0x93e   : > { %1976 = vadd.xlane.f32.xlu1 %v1975_v34 }
 0x94f   : > { %1870 = vrot.lane.b32.xlu1 %v5258_v27, %s4432_s29 }
 0x950   : > { %1759 = vrot.lane.b32.xlu0 %v5258_v27, %s4430_s22 }
 0x953   : > { %1981 = vrot.lane.b32.xlu1 %v5258_v27, %s4431_s10 }
 0x9c0   : > { %v1866_v35 = vpop.xlane.xlu0 %1865 }
 0x9c7   : > { %v1754_v36 = vpop.xlane.xlu0 %1753 }
 0x9c8   : > { %3688 = vrcp.f32 %v1754_v36 }
 0x9c9   : > { %3690 = vrcp.f32 %v1866_v35 }
 0x9cb   : > { %v1760_v37 = vpop.permute.xlu0 %1759  ;;  %v1977_v39 = vpop.xlane.xlu1 %1976 }
 0x9cc   : > { %v1765_v38 = vsel %vm1649_vm4, %v1760_v37, 0  ;;  %3692 = vrcp.f32 %v1977_v39  ;;  %v3645_v39 = vld [vmem:[%s5174_s15 + $0x30] ss:$8 sps:$4 sm:$0xff]  }
 0x9cd   : > { %3295 = vmatpush3.bf16.msra.mxu1 %v1765_v38  ;;  %v3647_v38 = vld [vmem:[%s5174_s15 + $0x34] ss:$8 sps:$4 sm:$0xff]  }
 0x9ce   : > { %3306 = vmatprep.subr.bf16.mxu1 %v4427_v29 }
 0x9cf   : > { %v1871_v42 = vpop.permute.xlu1 %1870 }
 0x9d0   : > { %v1876_v45 = vsel %vm1649_vm4, %v1871_v42, 0  ;;  %v3653_v42 = vld [vmem:[%s5174_s15 + $0x54] ss:$8 sps:$4 sm:$0xff]  }
 0x9d2   : > { %v3689_v40 = vpop.eup %3688 }
 0x9d3   : > { %v1756_v41 = vmul.f32 %v3689_v40, %v3685_v31  ;;  %v3691_v44 = vpop.eup %3690  ;;  %v1982_v46 = vpop.permute.xlu1 %1981  ;;  %v3639_v31 = vld [vmem:[%s5174_s15 + $0x10] ss:$8 sps:$4 sm:$0xff]   ;;  %v3650_v40 = vld [vmem:[%s5174_s15 + $0x44] ss:$8 sps:$4 sm:$0xff]  }
 0x9d4   : > { %v1868_v27 = vmul.f32 %v3691_v44, %v3683_v28  ;;  %v1987_v49 = vsel %vm1649_vm4, %v1982_v46, 0  ;;  %v3638_v28 = vld [vmem:[%s5174_s15 + $0x4] ss:$8 sps:$4 sm:$0xff]   ;;  %v3657_v46 = vld [vmem:[%s5174_s15 + $0x70] ss:$8 sps:$4 sm:$0xff]  }
 0x9d5   : > { %v1757_v43 = vpack.c.bf16 %v1756_v41, %v1756_v41  ;;  %v3648_v41 = vld [vmem:[%s5174_s15 + $0x40] ss:$8 sps:$4 sm:$0xff]   ;;  %v3656_v44 = vld [vmem:[%s5174_s15 + $0x64] ss:$8 sps:$4 sm:$0xff]  }
 0x9d6   : > { %v1869_v47 = vpack.c.bf16 %v1868_v27, %v1868_v27  ;;  %v3693_v48 = vpop.eup %3692  ;;  %v3659_v27 = vld [vmem:[%s5174_s15 + $0x74] ss:$8 sps:$4 sm:$0xff]  }
 0x9d7   : > { %3297 = vmatmul.mubr.msk.bf16.vlgmr.msra.gmra.mrb[16].mxu1 %vm1645_vm6, %v1757_v43  ;;  %v1979_v50 = vmul.f32 %v3693_v48, %v3687_v33  ;;  %v3651_v43 = vld [vmem:[%s5174_s15 + $0x50] ss:$8 sps:$4 sm:$0xff]  }
 0x9d8   : > { %3307 = vmatpush3.bf16.msra.mxu1 %v1876_v45  ;;  %3308 = vmatprep.mubr.msk.bf16.mxu1 %vm4429_vm2, %v4427_v29  ;;  %v3654_v45 = vld [vmem:[%s5174_s15 + $0x60] ss:$8 sps:$4 sm:$0xff]  }
 0x9d9   : > { %3318 = vmatprep.subr.bf16.mxu1 %v4427_v29  ;;  %v1980_v51 = vpack.c.bf16 %v1979_v50, %v1979_v50 }
 0x9df   : > { %3309 = vmatmul.mubr.msk.bf16.vlgmr.msra.gmra.mrb[20].mxu1 %vm1645_vm6, %v1869_v47 }
 0x9e0   : > { %3319 = vmatpush3.bf16.msra.mxu1 %v1987_v49  ;;  %3320 = vmatprep.mubr.msk.bf16.mxu1 %vm4429_vm2, %v4427_v29 }
 0x9e1   : > { %2298 = vmatprep.subr.bf16.mxu1 %v3638_v28 }
 0x9e7   : > { %3321 = vmatmul.mubr.msk.bf16.vlgmr.msra.gmra.mrb[24].mxu1 %vm1645_vm6, %v1980_v51  ;;  %v3136_v51 = vld [vmem:[%s969_s1] ss:$0 sm:$0xff] }
 0x9e8   : > { %2330 = vmatprep.mubr.bf16.mxu1 %v4428_v52  ;;  %v3633_v52 = vld [vmem:[%s5169_s20 + $0x28] sm:$0xff]   ;;  %2299 = vmatpush1.bf16.msra.mxu1 %v3636_v26 }
 0x9e9   : > { %3335 = vmatpush3.bf16.msra.mxu0 %v3633_v52  ;;  %2300 = vmatprep.subr.bf16.mxu1 %v3641_v30  ;;  %v3660_v52 = vld [vmem:[%s5178_s4 + $0x40] sm:$0xff]  }
 0x9ea   : > { %3336 = vmatprep.subr.bf16.mxu0 %v4427_v29 }
 0x9ec   : > { %2301 = vmatpush1.bf16.msra.mxu1 %v3639_v31 }
 0x9ed   : > { %3337 = vmatpush3.bf16.msra.mxu0 %v3634_v59  ;;  %v3661_v59 = vld [vmem:[%s5178_s4] sm:$0xff]  }
 0x9ee   : > { %3338 = vmatprep.subr.bf16.mxu0 %v4427_v29 }
 0x9f1   : > { %3339 = vmatpush3.bf16.msra.mxu0 %v3635_v0  ;;  %v3666_v0 = vld [vmem:[%s5178_s4 + $0x58] sm:$0xff]  }
 0x9f2   : > { %3225 = vmatprep.subr.bf16.mxu0 %v3660_v52  ;;  %v3704_v52 = vld [vmem:[#allocation25 + $0x20] sm:$0xff] (!%p3171_p6)  }
 0xaaa   : > { %v1801_v60 = vpop.f32.mrb[16].mxu1 }
 0xaab   : > { %2030 = vrot.lane.b32.xlu1 %v1801_v60, %s4431_s10  ;;  %v3298_v61 = vpop.f32.mrb[17].mxu1  ;;  %v3662_v60 = vld [vmem:[%s5178_s4 + $0x48] sm:$0xff]  }
 0xaac   : > { %v1804_v62 = vpop.f32.mrb[18].mxu1  ;;  %v3663_v61 = vld [vmem:[%s5178_s4 + $0x8] sm:$0xff]  }
 0xaad   : > { %v3299_v63 = vpop.f32.mrb[19].mxu1  ;;  %v3664_v62 = vld [vmem:[%s5178_s4 + $0x50] sm:$0xff]  }
 0xaae   : > { %v3665_v63 = vld [vmem:[%s5178_s4 + $0x10] sm:$0xff]  }
 0xab2   : > { %v1912_v1 = vpop.f32.mrb[20].mxu1 }
 0xab3   : > { %2034 = vrot.lane.b32.xlu0 %v1912_v1, %s4432_s29  ;;  %v3310_v2 = vpop.f32.mrb[21].mxu1  ;;  %v3667_v1 = vld [vmem:[%s5178_s4 + $0x18] sm:$0xff]  }
 0xab4   : > { %v1915_v3 = vpop.f32.mrb[22].mxu1  ;;  %v3668_v2 = vld [vmem:[%s5178_s4 + $0x60] sm:$0xff]  }
 0xab5   : > { %v3311_v4 = vpop.f32.mrb[23].mxu1  ;;  %v3669_v3 = vld [vmem:[%s5178_s4 + $0x20] sm:$0xff]  }
 0xab6   : > { %v3670_v4 = vld [vmem:[%s5178_s4 + $0x68] sm:$0xff]  }
 0xaba   : > { %v2023_v7 = vpop.f32.mrb[24].mxu1 }
 0xabb   : > { %2038 = vrot.lane.b32.xlu1 %v2023_v7, %s4430_s22  ;;  %v3322_v8 = vpop.f32.mrb[25].mxu1  ;;  %v3671_v7 = vld [vmem:[%s5178_s4 + $0x28] sm:$0xff]  }
 0xabc   : > { %v2026_v9 = vpop.f32.mrb[26].mxu1  ;;  %v3672_v8 = vld [vmem:[%s5178_s4 + $0x70] sm:$0xff]  }
 0xabd   : > { %v3323_v11 = vpop.f32.mrb[27].mxu1  ;;  %v3673_v9 = vld [vmem:[%s5178_s4 + $0x30] sm:$0xff]  }
 0xabe   : > { %v3674_v11 = vld [vmem:[%s5178_s4 + $0x78] sm:$0xff]  }
 0xb1d   : > { %v2031_v12 = vpop.permute.xlu1 %2030 }
 0xb1e   : > { %v2041_v29 = vsel %vm1584_vm3, %v5291_v56, %v2031_v12  ;;  %v3675_v12 = vld [vmem:[%s5178_s4 + $0x38] sm:$0xff]  }
 0xb25   : > { %v2035_v13 = vpop.permute.xlu0 %2034 }
 0xb26   : > { %v2043_v14 = vsel %vm2042_vm7, %v2041_v29, %v2035_v13  ;;  %v2206_v13 = vld [vmem:[%s5176_s24] sm:$0x3] }
 0xb27   : > { %v2211_v29 = vrot.slane %v2206_v13, %v1359_v10 }
 0xb2d   : > { %v2039_v15 = vpop.permute.xlu1 %2038 }
 0xb2e   : > { %v2045_v16 = vsel %vm2044_vm8, %v2043_v14, %v2039_v15  ;;  %v2215_v14 = vrot.slane %v2206_v13, %v1363_v6 }
 0xb2f   : > { %v2062_v17 = vpack.c.bf16 %v2045_v16, %v2045_v16 }
 0xb31   : > { %3341 = vmatmul.mubr.bf16.vlgmr.msra.gmra.mrb[12].mxu0 %v2062_v17 }
 0xb32   : > { %3226 = vmatpush3.bf16.msra.mxu0 %v3661_v59  ;;  %v3705_v59 = vld [vmem:[#allocation25 + $0x28] sm:$0xff] (!%p3171_p6)  }
 0xb33   : > { %3227 = vmatprep.subr.bf16.mxu0 %v3662_v60  ;;  %v3706_v60 = vld [vmem:[#allocation25 + $0x30] sm:$0xff] (!%p3171_p6)  }
 0xb36   : > { %3228 = vmatpush3.bf16.msra.mxu0 %v3663_v61  ;;  %v3707_v61 = vld [vmem:[#allocation25 + $0x38] sm:$0xff] (!%p3171_p6)  }
 0xb37   : > { %3229 = vmatprep.subr.bf16.mxu0 %v3664_v62 }
 0xb3a   : > { %3230 = vmatpush3.bf16.msra.mxu0 %v3665_v63 }
 0xb3b   : > { %3231 = vmatprep.subr.bf16.mxu0 %v3666_v0 }
 0xb3e   : > { %3232 = vmatpush3.bf16.msra.mxu0 %v3667_v1 }
 0xb3f   : > { %3233 = vmatprep.subr.bf16.mxu0 %v3668_v2  ;;  %v3172_v2 = vld [vmem:[#allocation23] ss:$0 sm:$0xff] (!%p3171_p6) }
 0xb42   : > { %3234 = vmatpush3.bf16.msra.mxu0 %v3669_v3 }
 0xb43   : > { %3235 = vmatprep.subr.bf16.mxu0 %v3670_v4  ;;  %v3173_v4 = vld [vmem:[#allocation24] ss:$0 sm:$0xff] (!%p3171_p6) }
 0xb46   : > { %3236 = vmatpush3.bf16.msra.mxu0 %v3671_v7 }
 0xb47   : > { %3237 = vmatprep.subr.bf16.mxu0 %v3672_v8 }
 0xb4a   : > { %3238 = vmatpush3.bf16.msra.mxu0 %v3673_v9 }
 0xb4b   : > { %3239 = vmatprep.subr.bf16.mxu0 %v3674_v11  ;;  %v3174_v11 = vld [vmem:[#allocation27] ss:$0 sm:$0xff] (!%p3171_p6) }
 0xb4e   : > { %3240 = vmatpush3.bf16.msra.mxu0 %v3675_v12 }
 0xc04   : > { %v2145_v18 = vpop.f32.mrb[12].mxu0 }
 0xc05   : > { %v2151_v20 = vadd.f32 %v2145_v18, %v5194_v25  ;;  %v3342_v21 = vpop.f32.mrb[13].mxu0  ;;  %v3644_v25 = vld [vmem:[%s5174_s15 + $0x24] ss:$8 sps:$4 sm:$0xff]  }
 0xc06   : > { %v2148_v22 = vpop.f32.mrb[14].mxu0  ;;  %2302 = vmatprep.subr.bf16.mxu1 %v3644_v25 }
 0xc07   : > { %v5341_v23 = vadd.f32 %v3135_v19, %v2151_v20  ;;  %v3343_v56 = vpop.f32.mrb[15].mxu0  ;;  %2303 = vmatpush1.bf16.msra.mxu1 %v3642_v32 }
 0xc08   : > { %2304 = vmatprep.subr.bf16.mxu1 %v3647_v38 }
 0xc09   : > { %v2162_v24 = vsel %vm1293_vm1, %v5341_v23, 0.0 }
 0xc0a   : > { %2163 = vadd.xlane.f32.xlu0 %v2162_v24 }
 0xc0b   : > { %2305 = vmatpush1.bf16.msra.mxu1 %v3645_v39 }
 0xc0c   : > { %2306 = vmatprep.subr.bf16.mxu1 %v3650_v40 }
 0xc0f   : > { %2307 = vmatpush1.bf16.msra.mxu1 %v3648_v41 }
 0xc10   : > { %2308 = vmatprep.subr.bf16.mxu1 %v3653_v42 }
 0xc13   : > { %2309 = vmatpush1.bf16.msra.mxu1 %v3651_v43 }
 0xc14   : > { %2310 = vmatprep.subr.bf16.mxu1 %v3656_v44  ;;  %v3170_v44 = vld [vmem:[%s1012_s23] ss:$0 sm:$0xff] }
 0xc17   : > { %2311 = vmatpush1.bf16.msra.mxu1 %v3654_v45 }
 0xc18   : > { %2312 = vmatprep.subr.bf16.mxu1 %v3659_v27 }
 0xc1b   : > { %2313 = vmatpush1.bf16.msra.mxu1 %v3657_v46 }
 0xc97   : > { %v2164_v33 = vpop.xlane.xlu0 %2163 }
 0xc98   : > { %v2165_v34 = vmul.f32 0.0078125, %v2164_v33 }
 0xc9a   : > { %v2166_v35 = vsub.f32 %v5341_v23, %v2165_v34 }
 0xc9c   : > { %v2167_v36 = vmul.f32 %v2166_v35, %v2166_v35 }
 0xc9e   : > { %v2168_v37 = vsel %vm1293_vm1, %v2167_v36, 0.0 }
 0xc9f   : > { %2169 = vadd.xlane.f32.xlu1 %v2168_v37 }
 0xd2c   : > { %v2170_v47 = vpop.xlane.xlu1 %2169 }
 0xd2d   : > { %v2171_v48 = vmul.f32 0.0078125, %v2170_v47 }
 0xd2f   : > { %v2172_v49 = vadd.f32 1e-06, %v2171_v48  ;;  %v3700_v48 = vld [vmem:[#allocation25] sm:$0xff] (!%p3171_p6)  }
 0xd31   : > { %3694 = vrsqrt.f32 %v2172_v49  ;;  %v4433_v49 = vmov (!%p3171_p6), 0.0  }
 0xd32   : > { %3344 = vmatprep.subr.bf16.mxu0 (!%p3171_p6), %v4433_v49 }
 0xd3b   : > { %v3695_v50 = vpop.eup %3694 }
 0xd3c   : > { %v2174_v53 = vmul.f32 %v3695_v50, %v2166_v35  ;;  %v3701_v50 = vld [vmem:[#allocation25 + $0x8] sm:$0xff] (!%p3171_p6)  }
 0xd3e   : > { %v2181_v55 = vmul.f32 %v3136_v51, %v2174_v53 }
 0xd40   : > { %v2188_v57 = vadd.f32 %v3137_v54, %v2181_v55 }
 0xd42   : > { %v2205_v58 = vpack.c.bf16 %v2188_v57, %v2188_v57  ;;  %v3702_v57 = vld [vmem:[#allocation25 + $0x10] sm:$0xff] (!%p3171_p6)  }
 0xd44   : > { %2331 = vmatmul.mubr.bf16.vlgmr.msra.gmra.mrb[28].mxu1 %v2205_v58  ;;  %v3703_v58 = vld [vmem:[#allocation25 + $0x18] sm:$0xff] (!%p3171_p6)  }
 0xe17   : > { %v2332_v15 = vpop.f32.mrb[28].mxu1 }
 0xe18   : > { %v2333_v16 = vadd.f32 %v2332_v15, %v2211_v29  ;;  %v2334_v17 = vpop.f32.mrb[29].mxu1 }
 0xe19   : > { %v2335_v18 = vadd.f32 %v2334_v17, %v2215_v14  ;;  %v2336_v19 = vpop.f32.mrb[30].mxu1 }
 0xe1a   : > { %v2341_v20 = vmul.f32 0.044715, %v2333_v16  ;;  %v2337_v21 = vpop.f32.mrb[31].mxu1  ;;  %v2339_v10 = vmul.f32 0.5, %v2333_v16 }
 0xe1b   : > { %v2342_v22 = vmul.f32 0.044715, %v2335_v18  ;;  %v2340_v34 = vmul.f32 0.5, %v2335_v18 }
 0xe1c   : > { %v2343_v56 = vmul.f32 %v2341_v20, %v2333_v16 }
 0xe1d   : > { %v2344_v24 = vmul.f32 %v2342_v22, %v2335_v18 }
 0xe1e   : > { %v2345_v26 = vmul.f32 %v2343_v56, %v2333_v16 }
 0xe1f   : > { %v2346_v28 = vmul.f32 %v2344_v24, %v2335_v18 }
 0xe20   : > { %v2347_v30 = vadd.f32 %v2345_v26, %v2333_v16 }
 0xe21   : > { %v2348_v31 = vadd.f32 %v2346_v28, %v2335_v18 }
 0xe22   : > { %v2349_v25 = vmul.f32 0.7978846, %v2347_v30 }
 0xe23   : > { %v2350_v32 = vmul.f32 0.7978846, %v2348_v31 }
 0xe24   : > { %3696 = vtanh.f32 %v2349_v25 }
 0xe25   : > { %3698 = vtanh.f32 %v2350_v32 }
 0xe2e   : > { %v3697_v5 = vpop.eup %3696 }
 0xe2f   : > { %v3699_v6 = vpop.eup %3698  ;;  %v2353_v33 = vadd.f32 1.0, %v3697_v5 }
 0xe30   : > { %v2354_v35 = vadd.f32 1.0, %v3699_v6 }
 0xe31   : > { %v2355_v36 = vmul.f32 %v2353_v33, %v2339_v10 }
 0xe32   : > { %v2356_v37 = vmul.f32 %v2354_v35, %v2340_v34 }
 0xe33   : > { %v2389_v39 = vpack.c.bf16 %v2355_v36, %v2355_v36 }
 0xe34   : > { %v2390_v38 = vpack.c.bf16 %v2356_v37, %v2356_v37 }
 0xe36   : > { %2519 = vmatprep.mubr.bf16.mxu0 %v2390_v38 }
 0xe37   : > { %2520 = vmatmul.mubr.bf16.vlgmr.msra.gmra.mrb[16].mxu0 %v2389_v39 }
 0xe38   : > { %3345 = vmatpush3.bf16.msra.mxu0 (!%p3171_p6), %v3700_v48  ;;  %3360 = vmatprep.mubr.msk.bf16.mxu0 (!%p3171_p6), %vm4434_vm9, %v4433_v49 }
 0xe39   : > { %3346 = vmatprep.subr.bf16.mxu0 (!%p3171_p6), %v4433_v49 }
 0xe3c   : > { %3347 = vmatpush3.bf16.msra.mxu0 (!%p3171_p6), %v3701_v50 }
 0xe3d   : > { %3348 = vmatprep.subr.bf16.mxu0 (!%p3171_p6), %v4433_v49 }
 0xe40   : > { %3349 = vmatpush3.bf16.msra.mxu0 (!%p3171_p6), %v3702_v57 }
 0xe41   : > { %3350 = vmatprep.subr.bf16.mxu0 (!%p3171_p6), %v4433_v49 }
 0xe44   : > { %3351 = vmatpush3.bf16.msra.mxu0 (!%p3171_p6), %v3703_v58 }
 0xe45   : > { %3352 = vmatprep.subr.bf16.mxu0 (!%p3171_p6), %v4433_v49 }
 0xe48   : > { %3353 = vmatpush3.bf16.msra.mxu0 (!%p3171_p6), %v3704_v52 }
 0xe49   : > { %3354 = vmatprep.subr.bf16.mxu0 (!%p3171_p6), %v4433_v49 }
 0xe4c   : > { %3355 = vmatpush3.bf16.msra.mxu0 (!%p3171_p6), %v3705_v59 }
 0xe4d   : > { %3356 = vmatprep.subr.bf16.mxu0 (!%p3171_p6), %v4433_v49 }
 0xe50   : > { %3357 = vmatpush3.bf16.msra.mxu0 (!%p3171_p6), %v3706_v60 }
 0xe51   : > { %3358 = vmatprep.subr.bf16.mxu0 (!%p3171_p6), %v4433_v49 }
 0xe54   : > { %3359 = vmatpush3.bf16.msra.mxu0 (!%p3171_p6), %v3707_v61 }
 0xf0a   : > { %v3241_v40 = vpop.f32.mrb[16].mxu0 }
 0xf0b   : > { %v3242_v41 = vpop.f32.mrb[17].mxu0 }
 0xf0c   : > { %v3243_v42 = vadd.f32 %v3242_v41, %v3241_v40  ;;  %v3244_v43 = vpop.f32.mrb[18].mxu0  ;;  %2540 = sbr.rel (%p3171_p6) target bundleno = 4392 (0x1128), region = 188 }
 0xf0d   : > { %v3245_v45 = vpop.f32.mrb[19].mxu0 }
 0xf0e   : > { %v2527_v27 = vadd.f32 %v3243_v42, %v5341_v23 }
 0xf10   : > { %v2535_v46 = vadd.f32 %v3170_v44, %v2527_v27 }
 0xf12   : > { %2536 = vst [vmem:[#allocation2] sm:$0xf] %v2535_v46  ;;  %v2543_v47 = vsel (!%p3171_p6), %vm1293_vm1, %v2535_v46, 0.0 }
 0xf13   : > { %2544 = vadd.xlane.f32.xlu0 %v2543_v47 }
 0xfa0   : > { %v2545_v51 = vpop.xlane.xlu0 %2544 }
 0xfa1   : > { %v2546_v53 = vmul.f32 0.0078125, %v2545_v51 }
 0xfa3   : > { %v2547_v54 = vsub.f32 %v2535_v46, %v2546_v53 }
 0xfa5   : > { %v2548_v23 = vmul.f32 %v2547_v54, %v2547_v54 }
 0xfa7   : > { %v2549_v55 = vsel %vm1293_vm1, %v2548_v23, 0.0 }
 0xfa8   : > { %2550 = vadd.xlane.f32.xlu0 %v2549_v55 }
0x1035   : > { %v2551_v62 = vpop.xlane.xlu0 %2550 }
0x1036   : > { %v2552_v63 = vmul.f32 0.0078125, %v2551_v62 }
0x1038   : > { %v2553_v0 = vadd.f32 1e-06, %v2552_v63 }
0x103a   : > { %3708 = vrsqrt.f32 %v2553_v0 }
0x1044   : > { %v3709_v1 = vpop.eup %3708 }
0x1045   : > { %v2555_v3 = vmul.f32 %v3709_v1, %v2547_v54 }
0x1047   : > { %v2562_v7 = vmul.f32 %v3172_v2, %v2555_v3 }
0x1049   : > { %v2569_v8 = vadd.f32 %v3173_v4, %v2562_v7 }
0x104b   : > { %v2586_v9 = vpack.c.bf16 %v2569_v8, %v2569_v8 }
0x104d   : > { %3361 = vmatmul.mubr.bf16.vlgmr.msra.gmra.mrb[0].mxu0 %v2586_v9 }
0x1120   : > { %v2676_v12 = vpop.f32.mrb[0].mxu0 }
0x1121   : > { %v2677_v13 = vadd.f32 %v3174_v11, %v2676_v12  ;;  %v3362_v29 = vpop.f32.mrb[1].mxu0 }
0x1122   : > { %v2679_v14 = vpop.f32.mrb[2].mxu0 }
0x1123   : > { %v2682_v15 = vmul.f32 0.088388346, %v2677_v13  ;;  %v3363_v16 = vpop.f32.mrb[3].mxu0 }
0x1125   : > { %v2683_v17 = vpack.c.bf16 %v2682_v15, %v2682_v15 }
0x1127   : > { %2684 = vst [vmem:[#allocation28] sm:$0x3] %v2683_v17 }
0x1128 PF: > { %s5598_s14 = sld [smem:[#allocation41_spill]]  ;;  %s4435_s26 = smov [#allocation28]  }
0x1129   : > { %s2694_s16 = sshll.u32 %s4435_s26, 4  ;;  %s2695_s16 = int_to_ptr.vmem [resolvable:$true] %s2694_s16 }
0x112a   : > { %s4294_s30 = scalar_lea.vmem %s2695_s16, 32  ;;  %p4301_p0 = scmp.lt.s32.totalorder %s2695_s16, %s2695_s16 }
0x112b   : > { %p4295_p7 = scmp.ne.s32.totalorder %s2695_s16, %s4294_s30  ;;  %p4302_p13 = scmp.lt.s32.totalorder %s4294_s30, %s4294_s30 }
0x112d   : > { %p4303_p9 = por %p4302_p13, %p4301_p0 }
0x112e   : > { %p3509_p5 = scmp.eq.s32.totalorder %s5598_s14, 1 }
0x1130   : > { %p4296_p3 = pnand %p4295_p7, %p3509_p5 }
0x1132   : > { %p4297_p1 = pneg %p4296_p3 }
0x1134   : > { %p4304_p2 = pnand %p4303_p9, %p4297_p1 }
0x1136   : > { %4307 = shalt.err (!%p4304_p2)
}
0x1137   : > { %s5599_s20 = sld [smem:[#allocation64_spill]] }
0x113d   : > { %s4308_s11 = scalar_lea.hbm %s5599_s20, 32 }
0x113e   : > { %p4309_p10 = scmp.ne.s32.totalorder %s5599_s20, %s4308_s11  ;;  %p4314_p11 = scmp.lt.u32.totalorder %s4308_s11, %s5599_s20 }
0x1140   : > { %p4310_p12 = pnand %p4309_p10, %p3509_p5 }
0x1142   : > { %p4311_p8 = pneg %p4310_p12 }
0x1144   : > { %p4316_p4 = pnand %p4314_p11, %p4311_p8 }
0x1146   : > { %4319 = shalt.err (!%p4316_p4)
}
0x1147   : > { %3427 = dma.vmem_to_hbm [thread:$0]  (%p3509_p5), %s2695_s16, 32, %s5599_s20, [#allocation5]  }
0x1148   : > { %4373 = dma.done.wait (%p3509_p5), [#allocation5], 32  }
0x1149   : > { %4375 = vsyncadd (%p3509_p5), [#allocation5], 4294967264 }
0x114a PF: > { %s5600_s7 = sld [smem:[#allocation40_spill]]  ;;  %s5601_s1 = sld [smem:[#allocation37_spill]] }
0x114b   : > { %s5602_s22 = sld [smem:[#allocation38_spill]]  ;;  %s5603_s23 = sld [smem:[#allocation45_spill]] }
0x114c   : > { %s5604_s10 = sld [smem:[#allocation44_spill]]  ;;  %s5605_s24 = smov %s4394_s2 }
0x1150   : > { %s35_s25 = sadd.s32 1, %s5600_s7  }
0x1151   : > { %p32_p6 = scmp.ge.s32.totalorder %s35_s25, 4  }
0x1152   : > { %s5606_s2 = smov %s5604_s10 }
0x1153   :  { %34 = sbr.rel (!%p32_p6) target bundleno = 27 (0x1b), region = 299 }
0x115a   :  { %2707 = vsyncpa [#allocation4], 1 }
0x115b   :  { %2709 = vsyncpa [#allocation4 + $0x1], 1 }
0x115c   :  { %2710 = vsyncpa [#allocation7], 1 }
0x115d   :  { %2711 = vsyncpa [#allocation10], 1 }
0x115e   :  { %2712 = vsyncpa [#allocation26], 1 }
0x115f   :  { %2713 = vsyncpa [#allocation5], 1 }
0x1160   :  { %2715 = vsyncpa [#allocation5 + $0x1], 1 }

</bundles_post_ra>
